<compile_context>
chip_gen: v5e
topology: v5e:2x2
jax: 0.10.0
libtpu: 0.0.40
codegen_flags: <defaults>
</compile_context>

<pallas_src>
import functools

import numpy as np
import jax
import jax.numpy as jnp
from jax.experimental import pallas as pl
from jax.experimental.pallas import tpu as pltpu

BN_EPS = 1e-5


def _full_spec(shape):
    """Whole-array BlockSpec whose index_map arity always matches block rank."""
    nd = len(shape)
    return pl.BlockSpec(tuple(shape), lambda i, _nd=nd: (0,) * _nd)


# ----------------------------------------------------------------------------
# Fused decoder-stage kernel:
#   pad -> conv(KxK) -> SCSE -> batch stats -> BN -> ReLU -> 1x1 output conv
# ----------------------------------------------------------------------------
def _decoder_stage_kernel(x_ref, w_ref, b_ref, w1t_ref, b1_ref, w2_ref, b2_ref,
                          ws_ref, bs_ref, g_ref, beta_ref, wo_ref, bo_ref,
                          o_ref, pad_ref, *, K, pad, dil, eps):
    N, Ht, Wt, Cin = x_ref.shape
    Cout = w_ref.shape[-1]
    Cr = w1t_ref.shape[0]
    Hp, Wp = Ht + 2 * pad, Wt + 2 * pad
    Ho = Hp - dil * (K - 1)
    Wo = Wp - dil * (K - 1)
    HW = Ho * Wo
    M = N * HW

    # ---- zero padding folded into a VMEM scratch (no padded tensor in HBM) --
    if pad > 0:
        pad_ref[...] = jnp.zeros(pad_ref.shape, pad_ref.dtype)
        pad_ref[:, pad:pad + Ht, pad:pad + Wt, :] = x_ref[...]
        xp_ref = pad_ref
    else:
        xp_ref = x_ref

    # ---- KxK conv: taps unrolled, batch folded into the MXU M dimension -----
    acc = jnp.zeros((M, Cout), jnp.float32)
    for i in range(K):
        for j in range(K):
            patch = xp_ref[:, i * dil:i * dil + Ho, j * dil:j * dil + Wo, :]
            acc = acc + jnp.dot(patch.reshape(M, Cin), w_ref[i, j],
                                preferred_element_type=jnp.float32)
    y = acc + b_ref[...]                                        # (M, Cout)
    y3 = y.reshape(N, HW, Cout)

    # ---- SCSE attention ------------------------------------------------------
    pooled = jnp.mean(y3, axis=1)                               # (N, Cout)
    # cSE MLP on the VPU (Cr = Cout//16 is tiny -> skip 1-2 lane MXU pushes)
    cse_logit = jnp.zeros((N, Cout), jnp.float32) + b2_ref[...]
    for r in range(Cr):
        hr = jnp.sum(pooled * w1t_ref[r:r + 1, :], axis=-1, keepdims=True)
        hr = jnp.maximum(hr + b1_ref[:, r:r + 1], 0.0)          # (N, 1)
        cse_logit = cse_logit + hr * w2_ref[r:r + 1, :]
    cse = jax.nn.sigmoid(cse_logit)                             # (N, Cout)
    sse = jax.nn.sigmoid(jnp.dot(y, ws_ref[...],
                                 preferred_element_type=jnp.float32)
                         + bs_ref[...])                         # (M, 1)
    attn = (y3 * cse.reshape(N, 1, Cout)
            + y3 * sse.reshape(N, HW, 1)).reshape(M, Cout)

    # ---- BatchNorm (training-mode batch statistics) + ReLU -------------------
    mean = jnp.mean(attn, axis=0, keepdims=True)                # (1, Cout)
    var = jnp.mean(attn * attn, axis=0, keepdims=True) - mean * mean
    var = jnp.maximum(var, 0.0)                                 # cancellation guard
    scale = g_ref[...] * jax.lax.rsqrt(var + eps)
    xr = jnp.maximum((attn - mean) * scale + beta_ref[...], 0.0)

    # ---- fused 1x1 `output` conv + (lane-dense when possible) store ----------
    out = jnp.dot(xr, wo_ref[...], preferred_element_type=jnp.float32) + bo_ref[...]
    o_ref[...] = out.reshape(o_ref.shape)


def decoder_stage(x, bp, wo, bo, cfg):
    """x: (N, H, W, Cin) NHWC (already upsampled + concatenated)."""
    N, Ht, Wt, Cin = x.shape
    K, pad, dil, stride = (cfg["kernel_size"], cfg["padding"],
                           cfg["dilation"], cfg["stride"])
    if stride != 1:
        # TODO(synk): strided conv not implemented (decoder blocks use stride=1)
        raise NotImplementedError("stride != 1")
    Hp, Wp = Ht + 2 * pad, Wt + 2 * pad
    Ho, Wo = Hp - dil * (K - 1), Wp - dil * (K - 1)
    M = N * Ho * Wo
    OutC = wo.shape[-1]

    w1t = jnp.transpose(bp["w1"])           # (Cr, Cout) for the VPU cSE path
    args = (x, bp["w"], bp["b"], w1t, bp["b1"], bp["w2"], bp["b2"],
            bp["ws"], bp["bs"], bp["gamma"], bp["beta"], wo, bo)
    kern = functools.partial(_decoder_stage_kernel, K=K, pad=pad, dil=dil,
                             eps=BN_EPS)

    def build(out_shape):
        return pl.pallas_call(
            kern,
            out_shape=jax.ShapeDtypeStruct(out_shape, jnp.float32),
            grid=(1,),
            in_specs=[_full_spec(a.shape) for a in args],
            out_specs=_full_spec(out_shape),
            scratch_shapes=[pltpu.VMEM((N, Hp, Wp, Cin), jnp.float32)],
            compiler_params=pltpu.CompilerParams(
                dimension_semantics=("arbitrary",),
                vmem_limit_bytes=64 * 1024 * 1024),
        )

    out = None
    if (M * OutC) % 128 == 0:
        # lane-dense packed output (last dim = 128); row-major identical bytes.
        try:
            out = build((M * OutC // 128, 128))(*args)
            out = jax.block_until_ready(out)
        except Exception:
            out = None  # packed relayout unsupported on this backend -> fall back
    if out is None:
        out = build((M, OutC))(*args)
    return out.reshape(N, Ho, Wo, OutC)


# ----------------------------------------------------------------------------
# Parameters (deterministic, mirrors Decoder.__init__ channel bookkeeping)
# ----------------------------------------------------------------------------
def make_decoder_params(cfg, key):
    enc = list(cfg["encoder_channels"])[::-1]
    bottleneck = enc.pop(0)
    dec = list(cfg["decoder_channels"])
    cat = [bool(c) for c in enc]
    K = cfg["kernel_size"]
    reduction = 16
    if len(dec) > 1:
        # the in-loop shared `output` conv only composes with the next stage if:
        assert all(d == dec[0] for d in dec) and cfg["out_channels"] == dec[0], (
            "reference nn.Module requires equal decoder_channels and "
            "out_channels == decoder_channels[-1] for the in-loop output conv")
    blocks = []
    for i, dc in enumerate(dec):
        cin = (bottleneck if i == 0 else dec[i - 1]) + enc[i]
        cr = dc // reduction
        key, *ks = jax.random.split(key, 9)
        s_conv = 1.0 / np.sqrt(cin * K * K)
        blocks.append(dict(
            w=jax.random.normal(ks[0], (K, K, cin, dc), jnp.float32) * s_conv,
            b=jax.random.normal(ks[1], (1, dc), jnp.float32) * s_conv,
            w1=jax.random.normal(ks[2], (dc, cr), jnp.float32) / np.sqrt(dc),
            b1=jax.random.normal(ks[3], (1, cr), jnp.float32) / np.sqrt(dc),
            w2=jax.random.normal(ks[4], (cr, dc), jnp.float32) / np.sqrt(cr),
            b2=jax.random.normal(ks[5], (1, dc), jnp.float32) / np.sqrt(cr),
            ws=jax.random.normal(ks[6], (dc, 1), jnp.float32) / np.sqrt(dc),
            bs=jax.random.normal(ks[7], (1, 1), jnp.float32) / np.sqrt(dc),
            gamma=jnp.ones((1, dc), jnp.float32),    # BatchNorm2d defaults
            beta=jnp.zeros((1, dc), jnp.float32),
        ))
    key, k1, k2 = jax.random.split(key, 3)
    out_c = cfg["out_channels"]
    return dict(
        cat=cat, blocks=blocks,
        wo=jax.random.normal(k1, (dec[-1], out_c), jnp.float32) / np.sqrt(dec[-1]),
        bo=jax.random.normal(k2, (1, out_c), jnp.float32) / np.sqrt(dec[-1]),
    )


# ----------------------------------------------------------------------------
# Decoder forward: upsample/concat glue + one fused Pallas kernel per stage.
# ----------------------------------------------------------------------------
def decoder_forward(encoder_features, params, cfg):
    """encoder_features: list of NHWC arrays, finest -> coarsest (bottleneck last)."""
    feats = list(encoder_features)[::-1]
    x = feats[0]
    feats = feats[1:]
    for i in range(len(cfg["decoder_channels"])):
        # TODO(synk): fold nearest-x2 upsample + skip concat into the stage
        # kernel by splitting the conv contraction over the channel split.
        x = jnp.repeat(jnp.repeat(x, 2, axis=1), 2, axis=2)        # nearest x2
        if params["cat"][i]:
            x = jnp.concatenate([x, feats[i]], axis=-1)
        # NOTE: the reference Decoder applies self.output inside the loop.
        x = decoder_stage(x, params["blocks"][i], params["wo"], params["bo"], cfg)
    return x


# ----------------------------------------------------------------------------
# Pure-JAX reference (same semantics) for a correctness check.
# ----------------------------------------------------------------------------
def reference_forward(encoder_features, params, cfg):
    hp = jax.lax.Precision.HIGHEST
    feats = list(encoder_features)[::-1]
    x = feats[0]
    feats = feats[1:]
    for i in range(len(cfg["decoder_channels"])):
        x = jnp.repeat(jnp.repeat(x, 2, axis=1), 2, axis=2)
        if params["cat"][i]:
            x = jnp.concatenate([x, feats[i]], axis=-1)
        bp = params["blocks"][i]
        p = cfg["padding"]
        y = jax.lax.conv_general_dilated(
            x, bp["w"], window_strides=(1, 1), padding=[(p, p), (p, p)],
            rhs_dilation=(cfg["dilation"],) * 2,
            dimension_numbers=("NHWC", "HWIO", "NHWC"),
            precision=hp) + bp["b"].reshape(1, 1, 1, -1)
        pooled = jnp.mean(y, axis=(1, 2), keepdims=True)
        h = jnp.maximum(jnp.einsum("nhwc,cr->nhwr", pooled, bp["w1"], precision=hp)
                        + bp["b1"].reshape(1, 1, 1, -1), 0.0)
        cse = jax.nn.sigmoid(jnp.einsum("nhwr,rc->nhwc", h, bp["w2"], precision=hp)
                             + bp["b2"].reshape(1, 1, 1, -1))
        sse = jax.nn.sigmoid(jnp.einsum("nhwc,co->nhwo", y, bp["ws"], precision=hp)
                             + bp["bs"].reshape(1, 1, 1, -1))
        attn = y * cse + y * sse
        mean = jnp.mean(attn, axis=(0, 1, 2))
        var = jnp.maximum(jnp.mean(attn * attn, axis=(0, 1, 2)) - mean * mean, 0.0)
        xn = (attn - mean) * bp["gamma"].reshape(-1) / jnp.sqrt(var + BN_EPS) \
             + bp["beta"].reshape(-1)
        xr = jnp.maximum(xn, 0.0)
        x = jnp.einsum("nhwc,co->nhwo", xr, params["wo"], precision=hp) \
            + params["bo"].reshape(1, 1, 1, -1)
    return x


# ----------------------------------------------------------------------------
if __name__ == "__main__":
    cfg = dict(
        encoder_channels=[16, 24, 48],   # finest -> coarsest (bottleneck = 48)
        decoder_channels=[32, 32],
        out_channels=32,                 # == decoder_channels so the in-loop
        kernel_size=3, padding=1,        #    `output` conv composes with the
        stride=1, dilation=1,            #    next stage (as the module requires)
    )
    key = jax.random.PRNGKey(0)
    kp, kf = jax.random.split(key)
    params = make_decoder_params(cfg, kp)

    # Encoder features in the PyTorch NCHW convention, finest -> coarsest.
    k0, k1, k2 = jax.random.split(kf, 3)
    f0_nchw = jax.random.normal(k0, (2, 16, 16, 16), jnp.float32)
    f1_nchw = jax.random.normal(k1, (2, 24, 8, 8), jnp.float32)
    f2_nchw = jax.random.normal(k2, (2, 48, 4, 4), jnp.float32)   # bottleneck
    feats_nhwc = [jnp.transpose(f, (0, 2, 3, 1)) for f in (f0_nchw, f1_nchw, f2_nchw)]

    out = decoder_forward(feats_nhwc, params, cfg)       # (2, 16, 16, 32) NHWC
    out = jax.block_until_ready(out)

    ref = reference_forward(feats_nhwc, params, cfg)
    np.testing.assert_allclose(np.asarray(out), np.asarray(ref), rtol=2e-2, atol=2e-2)

    print("KERNEL_OK")
</pallas_src>

<mosaic_0001>
module attributes {stable_mosaic.version = 11 : i64} {
  func.func @_decoder_stage_kernel(%arg0: i32, %arg1: memref<2x8x8x72xf32, #tpu.memory_space<vmem>>, %arg2: memref<3x3x72x32xf32, #tpu.memory_space<vmem>>, %arg3: memref<1x32xf32, #tpu.memory_space<vmem>>, %arg4: memref<2x32xf32, #tpu.memory_space<vmem>>, %arg5: memref<1x2xf32, #tpu.memory_space<vmem>>, %arg6: memref<2x32xf32, #tpu.memory_space<vmem>>, %arg7: memref<1x32xf32, #tpu.memory_space<vmem>>, %arg8: memref<32x1xf32, #tpu.memory_space<vmem>>, %arg9: memref<1x1xf32, #tpu.memory_space<vmem>>, %arg10: memref<1x32xf32, #tpu.memory_space<vmem>>, %arg11: memref<1x32xf32, #tpu.memory_space<vmem>>, %arg12: memref<32x32xf32, #tpu.memory_space<vmem>>, %arg13: memref<1x32xf32, #tpu.memory_space<vmem>>, %arg14: memref<32x128xf32, #tpu.memory_space<vmem>>, %arg15: memref<2x10x10x72xf32, #tpu.memory_space<vmem>>) attributes {dimension_semantics = [#tpu.dimension_semantics<arbitrary>], iteration_bounds = array<i64: 1>, scalar_prefetch = 0 : i64, scratch_operands = 1 : i64, tpu.core_type = #tpu.core_type<tc>, window_params = [{pipeline_mode = #tpu.pipeline_mode<synchronous>, transform_indices = @transform_0, window_bounds = array<i64: 2, 8, 8, 72>}, {pipeline_mode = #tpu.pipeline_mode<synchronous>, transform_indices = @transform_1, window_bounds = array<i64: 3, 3, 72, 32>}, {pipeline_mode = #tpu.pipeline_mode<synchronous>, transform_indices = @transform_2, window_bounds = array<i64: 1, 32>}, {pipeline_mode = #tpu.pipeline_mode<synchronous>, transform_indices = @transform_3, window_bounds = array<i64: 2, 32>}, {pipeline_mode = #tpu.pipeline_mode<synchronous>, transform_indices = @transform_4, window_bounds = array<i64: 1, 2>}, {pipeline_mode = #tpu.pipeline_mode<synchronous>, transform_indices = @transform_5, window_bounds = array<i64: 2, 32>}, {pipeline_mode = #tpu.pipeline_mode<synchronous>, transform_indices = @transform_6, window_bounds = array<i64: 1, 32>}, {pipeline_mode = #tpu.pipeline_mode<synchronous>, transform_indices = @transform_7, window_bounds = array<i64: 32, 1>}, {pipeline_mode = #tpu.pipeline_mode<synchronous>, transform_indices = @transform_8, window_bounds = array<i64: 1, 1>}, {pipeline_mode = #tpu.pipeline_mode<synchronous>, transform_indices = @transform_9, window_bounds = array<i64: 1, 32>}, {pipeline_mode = #tpu.pipeline_mode<synchronous>, transform_indices = @transform_10, window_bounds = array<i64: 1, 32>}, {pipeline_mode = #tpu.pipeline_mode<synchronous>, transform_indices = @transform_11, window_bounds = array<i64: 32, 32>}, {pipeline_mode = #tpu.pipeline_mode<synchronous>, transform_indices = @transform_12, window_bounds = array<i64: 1, 32>}, {pipeline_mode = #tpu.pipeline_mode<synchronous>, transform_indices = @transform_13, window_bounds = array<i64: 32, 128>}]} {
    %cst = arith.constant 0.000000e+00 : f32
    %0 = vector.broadcast %cst : f32 to vector<2x10x10x72xf32>
    %c0 = arith.constant 0 : index
    %c0_0 = arith.constant 0 : index
    %c0_1 = arith.constant 0 : index
    %c0_2 = arith.constant 0 : index
    %1 = vector.load %arg15[%c0, %c0_0, %c0_1, %c0_2] : memref<2x10x10x72xf32, #tpu.memory_space<vmem>>, vector<2x10x10x72xf32>
    tpu.vector_store %arg15[%c0, %c0_0, %c0_1, %c0_2], %0 {strides = array<i32>} : memref<2x10x10x72xf32, #tpu.memory_space<vmem>>, vector<2x10x10x72xf32>,
    %c0_3 = arith.constant 0 : index
    %c0_4 = arith.constant 0 : index
    %c0_5 = arith.constant 0 : index
    %c0_6 = arith.constant 0 : index
    %2 = vector.load %arg1[%c0_3, %c0_4, %c0_5, %c0_6] : memref<2x8x8x72xf32, #tpu.memory_space<vmem>>, vector<2x8x8x72xf32>
    %c0_7 = arith.constant 0 : index
    %c1 = arith.constant 1 : index
    %c1_8 = arith.constant 1 : index
    %c0_9 = arith.constant 0 : index
    %3 = vector.load %arg15[%c0_7, %c1, %c1_8, %c0_9] : memref<2x10x10x72xf32, #tpu.memory_space<vmem>>, vector<2x8x8x72xf32>
    tpu.vector_store %arg15[%c0_7, %c1, %c1_8, %c0_9], %2 {strides = array<i32>} : memref<2x10x10x72xf32, #tpu.memory_space<vmem>>, vector<2x8x8x72xf32>,
    %cst_10 = arith.constant 0.000000e+00 : f32
    %4 = vector.broadcast %cst_10 : f32 to vector<128x32xf32>
    %c0_11 = arith.constant 0 : index
    %c0_12 = arith.constant 0 : index
    %c0_13 = arith.constant 0 : index
    %c0_14 = arith.constant 0 : index
    %5 = vector.load %arg15[%c0_11, %c0_12, %c0_13, %c0_14] : memref<2x10x10x72xf32, #tpu.memory_space<vmem>>, vector<2x8x8x72xf32>
    %6 = vector.shape_cast %5 : vector<2x8x8x72xf32> to vector<128x72xf32>
    %c0_15 = arith.constant 0 : index
    %c0_16 = arith.constant 0 : index
    %c0_17 = arith.constant 0 : index
    %c0_18 = arith.constant 0 : index
    %7 = vector.load %arg2[%c0_15, %c0_16, %c0_17, %c0_18] : memref<3x3x72x32xf32, #tpu.memory_space<vmem>>, vector<1x1x72x32xf32>
    %8 = vector.shape_cast %7 : vector<1x1x72x32xf32> to vector<72x32xf32>
    %cst_19 = arith.constant dense<0.000000e+00> : vector<128x32xf32>
    %9 = tpu.matmul %6, %8, %cst_19 {dimension_numbers = #tpu.dot_dimension_numbers<[1], [0], [0], [1], [0, 0, 1, 1], [], []>} : vector<128x72xf32>, vector<72x32xf32>, vector<128x32xf32> -> vector<128x32xf32>
    %10 = arith.addf %4, %9 : vector<128x32xf32>
    %c0_20 = arith.constant 0 : index
    %c0_21 = arith.constant 0 : index
    %c1_22 = arith.constant 1 : index
    %c0_23 = arith.constant 0 : index
    %11 = vector.load %arg15[%c0_20, %c0_21, %c1_22, %c0_23] : memref<2x10x10x72xf32, #tpu.memory_space<vmem>>, vector<2x8x8x72xf32>
    %12 = vector.shape_cast %11 : vector<2x8x8x72xf32> to vector<128x72xf32>
    %c0_24 = arith.constant 0 : index
    %c1_25 = arith.constant 1 : index
    %c0_26 = arith.constant 0 : index
    %c0_27 = arith.constant 0 : index
    %13 = vector.load %arg2[%c0_24, %c1_25, %c0_26, %c0_27] : memref<3x3x72x32xf32, #tpu.memory_space<vmem>>, vector<1x1x72x32xf32>
    %14 = vector.shape_cast %13 : vector<1x1x72x32xf32> to vector<72x32xf32>
    %cst_28 = arith.constant dense<0.000000e+00> : vector<128x32xf32>
    %15 = tpu.matmul %12, %14, %cst_28 {dimension_numbers = #tpu.dot_dimension_numbers<[1], [0], [0], [1], [0, 0, 1, 1], [], []>} : vector<128x72xf32>, vector<72x32xf32>, vector<128x32xf32> -> vector<128x32xf32>
    %16 = arith.addf %10, %15 : vector<128x32xf32>
    %c0_29 = arith.constant 0 : index
    %c0_30 = arith.constant 0 : index
    %c2 = arith.constant 2 : index
    %c0_31 = arith.constant 0 : index
    %17 = vector.load %arg15[%c0_29, %c0_30, %c2, %c0_31] : memref<2x10x10x72xf32, #tpu.memory_space<vmem>>, vector<2x8x8x72xf32>
    %18 = vector.shape_cast %17 : vector<2x8x8x72xf32> to vector<128x72xf32>
    %c0_32 = arith.constant 0 : index
    %c2_33 = arith.constant 2 : index
    %c0_34 = arith.constant 0 : index
    %c0_35 = arith.constant 0 : index
    %19 = vector.load %arg2[%c0_32, %c2_33, %c0_34, %c0_35] : memref<3x3x72x32xf32, #tpu.memory_space<vmem>>, vector<1x1x72x32xf32>
    %20 = vector.shape_cast %19 : vector<1x1x72x32xf32> to vector<72x32xf32>
    %cst_36 = arith.constant dense<0.000000e+00> : vector<128x32xf32>
    %21 = tpu.matmul %18, %20, %cst_36 {dimension_numbers = #tpu.dot_dimension_numbers<[1], [0], [0], [1], [0, 0, 1, 1], [], []>} : vector<128x72xf32>, vector<72x32xf32>, vector<128x32xf32> -> vector<128x32xf32>
    %22 = arith.addf %16, %21 : vector<128x32xf32>
    %c0_37 = arith.constant 0 : index
    %c1_38 = arith.constant 1 : index
    %c0_39 = arith.constant 0 : index
    %c0_40 = arith.constant 0 : index
    %23 = vector.load %arg15[%c0_37, %c1_38, %c0_39, %c0_40] : memref<2x10x10x72xf32, #tpu.memory_space<vmem>>, vector<2x8x8x72xf32>
    %24 = vector.shape_cast %23 : vector<2x8x8x72xf32> to vector<128x72xf32>
    %c1_41 = arith.constant 1 : index
    %c0_42 = arith.constant 0 : index
    %c0_43 = arith.constant 0 : index
    %c0_44 = arith.constant 0 : index
    %25 = vector.load %arg2[%c1_41, %c0_42, %c0_43, %c0_44] : memref<3x3x72x32xf32, #tpu.memory_space<vmem>>, vector<1x1x72x32xf32>
    %26 = vector.shape_cast %25 : vector<1x1x72x32xf32> to vector<72x32xf32>
    %cst_45 = arith.constant dense<0.000000e+00> : vector<128x32xf32>
    %27 = tpu.matmul %24, %26, %cst_45 {dimension_numbers = #tpu.dot_dimension_numbers<[1], [0], [0], [1], [0, 0, 1, 1], [], []>} : vector<128x72xf32>, vector<72x32xf32>, vector<128x32xf32> -> vector<128x32xf32>
    %28 = arith.addf %22, %27 : vector<128x32xf32>
    %c0_46 = arith.constant 0 : index
    %c1_47 = arith.constant 1 : index
    %c1_48 = arith.constant 1 : index
    %c0_49 = arith.constant 0 : index
    %29 = vector.load %arg15[%c0_46, %c1_47, %c1_48, %c0_49] : memref<2x10x10x72xf32, #tpu.memory_space<vmem>>, vector<2x8x8x72xf32>
    %30 = vector.shape_cast %29 : vector<2x8x8x72xf32> to vector<128x72xf32>
    %c1_50 = arith.constant 1 : index
    %c1_51 = arith.constant 1 : index
    %c0_52 = arith.constant 0 : index
    %c0_53 = arith.constant 0 : index
    %31 = vector.load %arg2[%c1_50, %c1_51, %c0_52, %c0_53] : memref<3x3x72x32xf32, #tpu.memory_space<vmem>>, vector<1x1x72x32xf32>
    %32 = vector.shape_cast %31 : vector<1x1x72x32xf32> to vector<72x32xf32>
    %cst_54 = arith.constant dense<0.000000e+00> : vector<128x32xf32>
    %33 = tpu.matmul %30, %32, %cst_54 {dimension_numbers = #tpu.dot_dimension_numbers<[1], [0], [0], [1], [0, 0, 1, 1], [], []>} : vector<128x72xf32>, vector<72x32xf32>, vector<128x32xf32> -> vector<128x32xf32>
    %34 = arith.addf %28, %33 : vector<128x32xf32>
    %c0_55 = arith.constant 0 : index
    %c1_56 = arith.constant 1 : index
    %c2_57 = arith.constant 2 : index
    %c0_58 = arith.constant 0 : index
    %35 = vector.load %arg15[%c0_55, %c1_56, %c2_57, %c0_58] : memref<2x10x10x72xf32, #tpu.memory_space<vmem>>, vector<2x8x8x72xf32>
    %36 = vector.shape_cast %35 : vector<2x8x8x72xf32> to vector<128x72xf32>
    %c1_59 = arith.constant 1 : index
    %c2_60 = arith.constant 2 : index
    %c0_61 = arith.constant 0 : index
    %c0_62 = arith.constant 0 : index
    %37 = vector.load %arg2[%c1_59, %c2_60, %c0_61, %c0_62] : memref<3x3x72x32xf32, #tpu.memory_space<vmem>>, vector<1x1x72x32xf32>
    %38 = vector.shape_cast %37 : vector<1x1x72x32xf32> to vector<72x32xf32>
    %cst_63 = arith.constant dense<0.000000e+00> : vector<128x32xf32>
    %39 = tpu.matmul %36, %38, %cst_63 {dimension_numbers = #tpu.dot_dimension_numbers<[1], [0], [0], [1], [0, 0, 1, 1], [], []>} : vector<128x72xf32>, vector<72x32xf32>, vector<128x32xf32> -> vector<128x32xf32>
    %40 = arith.addf %34, %39 : vector<128x32xf32>
    %c0_64 = arith.constant 0 : index
    %c2_65 = arith.constant 2 : index
    %c0_66 = arith.constant 0 : index
    %c0_67 = arith.constant 0 : index
    %41 = vector.load %arg15[%c0_64, %c2_65, %c0_66, %c0_67] : memref<2x10x10x72xf32, #tpu.memory_space<vmem>>, vector<2x8x8x72xf32>
    %42 = vector.shape_cast %41 : vector<2x8x8x72xf32> to vector<128x72xf32>
    %c2_68 = arith.constant 2 : index
    %c0_69 = arith.constant 0 : index
    %c0_70 = arith.constant 0 : index
    %c0_71 = arith.constant 0 : index
    %43 = vector.load %arg2[%c2_68, %c0_69, %c0_70, %c0_71] : memref<3x3x72x32xf32, #tpu.memory_space<vmem>>, vector<1x1x72x32xf32>
    %44 = vector.shape_cast %43 : vector<1x1x72x32xf32> to vector<72x32xf32>
    %cst_72 = arith.constant dense<0.000000e+00> : vector<128x32xf32>
    %45 = tpu.matmul %42, %44, %cst_72 {dimension_numbers = #tpu.dot_dimension_numbers<[1], [0], [0], [1], [0, 0, 1, 1], [], []>} : vector<128x72xf32>, vector<72x32xf32>, vector<128x32xf32> -> vector<128x32xf32>
    %46 = arith.addf %40, %45 : vector<128x32xf32>
    %c0_73 = arith.constant 0 : index
    %c2_74 = arith.constant 2 : index
    %c1_75 = arith.constant 1 : index
    %c0_76 = arith.constant 0 : index
    %47 = vector.load %arg15[%c0_73, %c2_74, %c1_75, %c0_76] : memref<2x10x10x72xf32, #tpu.memory_space<vmem>>, vector<2x8x8x72xf32>
    %48 = vector.shape_cast %47 : vector<2x8x8x72xf32> to vector<128x72xf32>
    %c2_77 = arith.constant 2 : index
    %c1_78 = arith.constant 1 : index
    %c0_79 = arith.constant 0 : index
    %c0_80 = arith.constant 0 : index
    %49 = vector.load %arg2[%c2_77, %c1_78, %c0_79, %c0_80] : memref<3x3x72x32xf32, #tpu.memory_space<vmem>>, vector<1x1x72x32xf32>
    %50 = vector.shape_cast %49 : vector<1x1x72x32xf32> to vector<72x32xf32>
    %cst_81 = arith.constant dense<0.000000e+00> : vector<128x32xf32>
    %51 = tpu.matmul %48, %50, %cst_81 {dimension_numbers = #tpu.dot_dimension_numbers<[1], [0], [0], [1], [0, 0, 1, 1], [], []>} : vector<128x72xf32>, vector<72x32xf32>, vector<128x32xf32> -> vector<128x32xf32>
    %52 = arith.addf %46, %51 : vector<128x32xf32>
    %c0_82 = arith.constant 0 : index
    %c2_83 = arith.constant 2 : index
    %c2_84 = arith.constant 2 : index
    %c0_85 = arith.constant 0 : index
    %53 = vector.load %arg15[%c0_82, %c2_83, %c2_84, %c0_85] : memref<2x10x10x72xf32, #tpu.memory_space<vmem>>, vector<2x8x8x72xf32>
    %54 = vector.shape_cast %53 : vector<2x8x8x72xf32> to vector<128x72xf32>
    %c2_86 = arith.constant 2 : index
    %c2_87 = arith.constant 2 : index
    %c0_88 = arith.constant 0 : index
    %c0_89 = arith.constant 0 : index
    %55 = vector.load %arg2[%c2_86, %c2_87, %c0_88, %c0_89] : memref<3x3x72x32xf32, #tpu.memory_space<vmem>>, vector<1x1x72x32xf32>
    %56 = vector.shape_cast %55 : vector<1x1x72x32xf32> to vector<72x32xf32>
    %cst_90 = arith.constant dense<0.000000e+00> : vector<128x32xf32>
    %57 = tpu.matmul %54, %56, %cst_90 {dimension_numbers = #tpu.dot_dimension_numbers<[1], [0], [0], [1], [0, 0, 1, 1], [], []>} : vector<128x72xf32>, vector<72x32xf32>, vector<128x32xf32> -> vector<128x32xf32>
    %58 = arith.addf %52, %57 : vector<128x32xf32>
    %c0_91 = arith.constant 0 : index
    %c0_92 = arith.constant 0 : index
    %59 = vector.load %arg3[%c0_91, %c0_92] : memref<1x32xf32, #tpu.memory_space<vmem>>, vector<1x32xf32>
    %60 = vector.broadcast %59 : vector<1x32xf32> to vector<128x32xf32>
    %61 = arith.addf %58, %60 : vector<128x32xf32>
    %62 = vector.shape_cast %61 : vector<128x32xf32> to vector<2x64x32xf32>
    %cst_93 = arith.constant dense<0.000000e+00> : vector<2x32xf32>
    %63 = vector.multi_reduction <add>, %62, %cst_93 [1] : vector<2x64x32xf32> to vector<2x32xf32>
    %cst_94 = arith.constant 6.400000e+01 : f32
    %64 = vector.broadcast %cst_94 : f32 to vector<2x32xf32>
    %65 = arith.divf %63, %64 : vector<2x32xf32>
    %cst_95 = arith.constant 0.000000e+00 : f32
    %66 = vector.broadcast %cst_95 : f32 to vector<2x32xf32>
    %c0_96 = arith.constant 0 : index
    %c0_97 = arith.constant 0 : index
    %67 = vector.load %arg7[%c0_96, %c0_97] : memref<1x32xf32, #tpu.memory_space<vmem>>, vector<1x32xf32>
    %68 = vector.broadcast %67 : vector<1x32xf32> to vector<2x32xf32>
    %69 = arith.addf %66, %68 : vector<2x32xf32>
    %c0_98 = arith.constant 0 : index
    %c0_99 = arith.constant 0 : index
    %70 = vector.load %arg4[%c0_98, %c0_99] : memref<2x32xf32, #tpu.memory_space<vmem>>, vector<1x32xf32>
    %71 = vector.broadcast %70 : vector<1x32xf32> to vector<2x32xf32>
    %72 = arith.mulf %65, %71 : vector<2x32xf32>
    %cst_100 = arith.constant dense<0.000000e+00> : vector<2xf32>
    %73 = vector.multi_reduction <add>, %72, %cst_100 [1] : vector<2x32xf32> to vector<2xf32>
    %74 = vector.shape_cast %73 : vector<2xf32> to vector<2x1xf32>
    %c0_101 = arith.constant 0 : index
    %c0_102 = arith.constant 0 : index
    %75 = vector.load %arg5[%c0_101, %c0_102] : memref<1x2xf32, #tpu.memory_space<vmem>>, vector<1x1xf32>
    %76 = vector.broadcast %75 : vector<1x1xf32> to vector<2x1xf32>
    %77 = arith.addf %74, %76 : vector<2x1xf32>
    %cst_103 = arith.constant 0.000000e+00 : f32
    %78 = vector.broadcast %cst_103 : f32 to vector<2x1xf32>
    %79 = arith.maximumf %77, %78 : vector<2x1xf32>
    %c0_104 = arith.constant 0 : index
    %c0_105 = arith.constant 0 : index
    %80 = vector.load %arg6[%c0_104, %c0_105] : memref<2x32xf32, #tpu.memory_space<vmem>>, vector<1x32xf32>
    %81 = vector.broadcast %79 : vector<2x1xf32> to vector<2x32xf32>
    %82 = vector.broadcast %80 : vector<1x32xf32> to vector<2x32xf32>
    %83 = arith.mulf %81, %82 : vector<2x32xf32>
    %84 = arith.addf %69, %83 : vector<2x32xf32>
    %c1_106 = arith.constant 1 : index
    %c0_107 = arith.constant 0 : index
    %85 = vector.load %arg4[%c1_106, %c0_107] : memref<2x32xf32, #tpu.memory_space<vmem>>, vector<1x32xf32>
    %86 = vector.broadcast %85 : vector<1x32xf32> to vector<2x32xf32>
    %87 = arith.mulf %65, %86 : vector<2x32xf32>
    %cst_108 = arith.constant dense<0.000000e+00> : vector<2xf32>
    %88 = vector.multi_reduction <add>, %87, %cst_108 [1] : vector<2x32xf32> to vector<2xf32>
    %89 = vector.shape_cast %88 : vector<2xf32> to vector<2x1xf32>
    %c0_109 = arith.constant 0 : index
    %c1_110 = arith.constant 1 : index
    %90 = vector.load %arg5[%c0_109, %c1_110] : memref<1x2xf32, #tpu.memory_space<vmem>>, vector<1x1xf32>
    %91 = vector.broadcast %90 : vector<1x1xf32> to vector<2x1xf32>
    %92 = arith.addf %89, %91 : vector<2x1xf32>
    %cst_111 = arith.constant 0.000000e+00 : f32
    %93 = vector.broadcast %cst_111 : f32 to vector<2x1xf32>
    %94 = arith.maximumf %92, %93 : vector<2x1xf32>
    %c1_112 = arith.constant 1 : index
    %c0_113 = arith.constant 0 : index
    %95 = vector.load %arg6[%c1_112, %c0_113] : memref<2x32xf32, #tpu.memory_space<vmem>>, vector<1x32xf32>
    %96 = vector.broadcast %94 : vector<2x1xf32> to vector<2x32xf32>
    %97 = vector.broadcast %95 : vector<1x32xf32> to vector<2x32xf32>
    %98 = arith.mulf %96, %97 : vector<2x32xf32>
    %99 = arith.addf %84, %98 : vector<2x32xf32>
    %100 = arith.negf %99 : vector<2x32xf32>
    %101 = math.exp %100 : vector<2x32xf32>
    %cst_114 = arith.constant 1.000000e+00 : f32
    %102 = vector.broadcast %cst_114 : f32 to vector<2x32xf32>
    %103 = arith.addf %102, %101 : vector<2x32xf32>
    %104 = arith.divf %102, %103 : vector<2x32xf32>
    %c0_115 = arith.constant 0 : index
    %c0_116 = arith.constant 0 : index
    %105 = vector.load %arg8[%c0_115, %c0_116] : memref<32x1xf32, #tpu.memory_space<vmem>>, vector<32x1xf32>
    %cst_117 = arith.constant dense<0.000000e+00> : vector<128x1xf32>
    %106 = tpu.matmul %61, %105, %cst_117 {dimension_numbers = #tpu.dot_dimension_numbers<[1], [0], [0], [1], [0, 0, 1, 1], [], []>} : vector<128x32xf32>, vector<32x1xf32>, vector<128x1xf32> -> vector<128x1xf32>
    %c0_118 = arith.constant 0 : index
    %c0_119 = arith.constant 0 : index
    %107 = vector.load %arg9[%c0_118, %c0_119] : memref<1x1xf32, #tpu.memory_space<vmem>>, vector<1x1xf32>
    %108 = vector.broadcast %107 : vector<1x1xf32> to vector<128x1xf32>
    %109 = arith.addf %106, %108 : vector<128x1xf32>
    %110 = arith.negf %109 : vector<128x1xf32>
    %111 = math.exp %110 : vector<128x1xf32>
    %cst_120 = arith.constant 1.000000e+00 : f32
    %112 = vector.broadcast %cst_120 : f32 to vector<128x1xf32>
    %113 = arith.addf %112, %111 : vector<128x1xf32>
    %114 = arith.divf %112, %113 : vector<128x1xf32>
    %115 = vector.shape_cast %104 : vector<2x32xf32> to vector<2x1x32xf32>
    %116 = vector.broadcast %115 : vector<2x1x32xf32> to vector<2x64x32xf32>
    %117 = arith.mulf %62, %116 : vector<2x64x32xf32>
    %118 = vector.shape_cast %114 : vector<128x1xf32> to vector<2x64x1xf32>
    %119 = vector.broadcast %118 : vector<2x64x1xf32> to vector<2x64x32xf32>
    %120 = arith.mulf %62, %119 : vector<2x64x32xf32>
    %121 = arith.addf %117, %120 : vector<2x64x32xf32>
    %122 = vector.shape_cast %121 : vector<2x64x32xf32> to vector<128x32xf32>
    %cst_121 = arith.constant dense<0.000000e+00> : vector<32xf32>
    %123 = vector.multi_reduction <add>, %122, %cst_121 [0] : vector<128x32xf32> to vector<32xf32>
    %124 = vector.shape_cast %123 : vector<32xf32> to vector<1x32xf32>
    %cst_122 = arith.constant 1.280000e+02 : f32
    %125 = vector.broadcast %cst_122 : f32 to vector<1x32xf32>
    %126 = arith.divf %124, %125 : vector<1x32xf32>
    %127 = arith.mulf %122, %122 : vector<128x32xf32>
    %cst_123 = arith.constant dense<0.000000e+00> : vector<32xf32>
    %128 = vector.multi_reduction <add>, %127, %cst_123 [0] : vector<128x32xf32> to vector<32xf32>
    %129 = vector.shape_cast %128 : vector<32xf32> to vector<1x32xf32>
    %cst_124 = arith.constant 1.280000e+02 : f32
    %130 = vector.broadcast %cst_124 : f32 to vector<1x32xf32>
    %131 = arith.divf %129, %130 : vector<1x32xf32>
    %132 = arith.mulf %126, %126 : vector<1x32xf32>
    %133 = arith.subf %131, %132 : vector<1x32xf32>
    %cst_125 = arith.constant 0.000000e+00 : f32
    %134 = vector.broadcast %cst_125 : f32 to vector<1x32xf32>
    %135 = arith.maximumf %133, %134 : vector<1x32xf32>
    %c0_126 = arith.constant 0 : index
    %c0_127 = arith.constant 0 : index
    %136 = vector.load %arg10[%c0_126, %c0_127] : memref<1x32xf32, #tpu.memory_space<vmem>>, vector<1x32xf32>
    %cst_128 = arith.constant 9.99999974E-6 : f32
    %137 = vector.broadcast %cst_128 : f32 to vector<1x32xf32>
    %138 = arith.addf %135, %137 : vector<1x32xf32>
    %139 = math.rsqrt %138 : vector<1x32xf32>
    %140 = arith.mulf %136, %139 : vector<1x32xf32>
    %141 = vector.broadcast %126 : vector<1x32xf32> to vector<128x32xf32>
    %142 = arith.subf %122, %141 : vector<128x32xf32>
    %143 = vector.broadcast %140 : vector<1x32xf32> to vector<128x32xf32>
    %144 = arith.mulf %142, %143 : vector<128x32xf32>
    %c0_129 = arith.constant 0 : index
    %c0_130 = arith.constant 0 : index
    %145 = vector.load %arg11[%c0_129, %c0_130] : memref<1x32xf32, #tpu.memory_space<vmem>>, vector<1x32xf32>
    %146 = vector.broadcast %145 : vector<1x32xf32> to vector<128x32xf32>
    %147 = arith.addf %144, %146 : vector<128x32xf32>
    %cst_131 = arith.constant 0.000000e+00 : f32
    %148 = vector.broadcast %cst_131 : f32 to vector<128x32xf32>
    %149 = arith.maximumf %147, %148 : vector<128x32xf32>
    %c0_132 = arith.constant 0 : index
    %c0_133 = arith.constant 0 : index
    %150 = vector.load %arg12[%c0_132, %c0_133] : memref<32x32xf32, #tpu.memory_space<vmem>>, vector<32x32xf32>
    %cst_134 = arith.constant dense<0.000000e+00> : vector<128x32xf32>
    %151 = tpu.matmul %149, %150, %cst_134 {dimension_numbers = #tpu.dot_dimension_numbers<[1], [0], [0], [1], [0, 0, 1, 1], [], []>} : vector<128x32xf32>, vector<32x32xf32>, vector<128x32xf32> -> vector<128x32xf32>
    %c0_135 = arith.constant 0 : index
    %c0_136 = arith.constant 0 : index
    %152 = vector.load %arg13[%c0_135, %c0_136] : memref<1x32xf32, #tpu.memory_space<vmem>>, vector<1x32xf32>
    %153 = vector.broadcast %152 : vector<1x32xf32> to vector<128x32xf32>
    %154 = arith.addf %151, %153 : vector<128x32xf32>
    %155 = vector.shape_cast %154 : vector<128x32xf32> to vector<32x128xf32>
    %c0_137 = arith.constant 0 : index
    %c0_138 = arith.constant 0 : index
    %156 = vector.load %arg14[%c0_137, %c0_138] : memref<32x128xf32, #tpu.memory_space<vmem>>, vector<32x128xf32>
    tpu.vector_store %arg14[%c0_137, %c0_138], %155 {strides = array<i32>} : memref<32x128xf32, #tpu.memory_space<vmem>>, vector<32x128xf32>,
    return
  }
  func.func @transform_0(%arg0: i32) -> (i32, i32, i32, i32) {
    %c0_i32 = arith.constant 0 : i32
    %c0_i32_0 = arith.constant 0 : i32
    %c0_i32_1 = arith.constant 0 : i32
    %c0_i32_2 = arith.constant 0 : i32
    %c0_i32_3 = arith.constant 0 : i32
    return %c0_i32, %c0_i32_0, %c0_i32_1, %c0_i32_2 : i32, i32, i32, i32
  }
  func.func @transform_1(%arg0: i32) -> (i32, i32, i32, i32) {
    %c0_i32 = arith.constant 0 : i32
    %c0_i32_0 = arith.constant 0 : i32
    %c0_i32_1 = arith.constant 0 : i32
    %c0_i32_2 = arith.constant 0 : i32
    %c0_i32_3 = arith.constant 0 : i32
    return %c0_i32, %c0_i32_0, %c0_i32_1, %c0_i32_2 : i32, i32, i32, i32
  }
  func.func @transform_2(%arg0: i32) -> (i32, i32) {
    %c0_i32 = arith.constant 0 : i32
    %c0_i32_0 = arith.constant 0 : i32
    %c0_i32_1 = arith.constant 0 : i32
    return %c0_i32, %c0_i32_0 : i32, i32
  }
  func.func @transform_3(%arg0: i32) -> (i32, i32) {
    %c0_i32 = arith.constant 0 : i32
    %c0_i32_0 = arith.constant 0 : i32
    %c0_i32_1 = arith.constant 0 : i32
    return %c0_i32, %c0_i32_0 : i32, i32
  }
  func.func @transform_4(%arg0: i32) -> (i32, i32) {
    %c0_i32 = arith.constant 0 : i32
    %c0_i32_0 = arith.constant 0 : i32
    %c0_i32_1 = arith.constant 0 : i32
    return %c0_i32, %c0_i32_0 : i32, i32
  }
  func.func @transform_5(%arg0: i32) -> (i32, i32) {
    %c0_i32 = arith.constant 0 : i32
    %c0_i32_0 = arith.constant 0 : i32
    %c0_i32_1 = arith.constant 0 : i32
    return %c0_i32, %c0_i32_0 : i32, i32
  }
  func.func @transform_6(%arg0: i32) -> (i32, i32) {
    %c0_i32 = arith.constant 0 : i32
    %c0_i32_0 = arith.constant 0 : i32
    %c0_i32_1 = arith.constant 0 : i32
    return %c0_i32, %c0_i32_0 : i32, i32
  }
  func.func @transform_7(%arg0: i32) -> (i32, i32) {
    %c0_i32 = arith.constant 0 : i32
    %c0_i32_0 = arith.constant 0 : i32
    %c0_i32_1 = arith.constant 0 : i32
    return %c0_i32, %c0_i32_0 : i32, i32
  }
  func.func @transform_8(%arg0: i32) -> (i32, i32) {
    %c0_i32 = arith.constant 0 : i32
    %c0_i32_0 = arith.constant 0 : i32
    %c0_i32_1 = arith.constant 0 : i32
    return %c0_i32, %c0_i32_0 : i32, i32
  }
  func.func @transform_9(%arg0: i32) -> (i32, i32) {
    %c0_i32 = arith.constant 0 : i32
    %c0_i32_0 = arith.constant 0 : i32
    %c0_i32_1 = arith.constant 0 : i32
    return %c0_i32, %c0_i32_0 : i32, i32
  }
  func.func @transform_10(%arg0: i32) -> (i32, i32) {
    %c0_i32 = arith.constant 0 : i32
    %c0_i32_0 = arith.constant 0 : i32
    %c0_i32_1 = arith.constant 0 : i32
    return %c0_i32, %c0_i32_0 : i32, i32
  }
  func.func @transform_11(%arg0: i32) -> (i32, i32) {
    %c0_i32 = arith.constant 0 : i32
    %c0_i32_0 = arith.constant 0 : i32
    %c0_i32_1 = arith.constant 0 : i32
    return %c0_i32, %c0_i32_0 : i32, i32
  }
  func.func @transform_12(%arg0: i32) -> (i32, i32) {
    %c0_i32 = arith.constant 0 : i32
    %c0_i32_0 = arith.constant 0 : i32
    %c0_i32_1 = arith.constant 0 : i32
    return %c0_i32, %c0_i32_0 : i32, i32
  }
  func.func @transform_13(%arg0: i32) -> (i32, i32) {
    %c0_i32 = arith.constant 0 : i32
    %c0_i32_0 = arith.constant 0 : i32
    %c0_i32_1 = arith.constant 0 : i32
    return %c0_i32, %c0_i32_0 : i32, i32
  }
}

module attributes {stable_mosaic.version = 11 : i64} {
  func.func @_decoder_stage_kernel(%arg0: i32, %arg1: memref<2x8x8x72xf32, #tpu.memory_space<vmem>>, %arg2: memref<3x3x72x32xf32, #tpu.memory_space<vmem>>, %arg3: memref<1x32xf32, #tpu.memory_space<vmem>>, %arg4: memref<2x32xf32, #tpu.memory_space<vmem>>, %arg5: memref<1x2xf32, #tpu.memory_space<vmem>>, %arg6: memref<2x32xf32, #tpu.memory_space<vmem>>, %arg7: memref<1x32xf32, #tpu.memory_space<vmem>>, %arg8: memref<32x1xf32, #tpu.memory_space<vmem>>, %arg9: memref<1x1xf32, #tpu.memory_space<vmem>>, %arg10: memref<1x32xf32, #tpu.memory_space<vmem>>, %arg11: memref<1x32xf32, #tpu.memory_space<vmem>>, %arg12: memref<32x32xf32, #tpu.memory_space<vmem>>, %arg13: memref<1x32xf32, #tpu.memory_space<vmem>>, %arg14: memref<128x32xf32, #tpu.memory_space<vmem>>, %arg15: memref<2x10x10x72xf32, #tpu.memory_space<vmem>>) attributes {dimension_semantics = [#tpu.dimension_semantics<arbitrary>], iteration_bounds = array<i64: 1>, scalar_prefetch = 0 : i64, scratch_operands = 1 : i64, tpu.core_type = #tpu.core_type<tc>, window_params = [{pipeline_mode = #tpu.pipeline_mode<synchronous>, transform_indices = @transform_0, window_bounds = array<i64: 2, 8, 8, 72>}, {pipeline_mode = #tpu.pipeline_mode<synchronous>, transform_indices = @transform_1, window_bounds = array<i64: 3, 3, 72, 32>}, {pipeline_mode = #tpu.pipeline_mode<synchronous>, transform_indices = @transform_2, window_bounds = array<i64: 1, 32>}, {pipeline_mode = #tpu.pipeline_mode<synchronous>, transform_indices = @transform_3, window_bounds = array<i64: 2, 32>}, {pipeline_mode = #tpu.pipeline_mode<synchronous>, transform_indices = @transform_4, window_bounds = array<i64: 1, 2>}, {pipeline_mode = #tpu.pipeline_mode<synchronous>, transform_indices = @transform_5, window_bounds = array<i64: 2, 32>}, {pipeline_mode = #tpu.pipeline_mode<synchronous>, transform_indices = @transform_6, window_bounds = array<i64: 1, 32>}, {pipeline_mode = #tpu.pipeline_mode<synchronous>, transform_indices = @transform_7, window_bounds = array<i64: 32, 1>}, {pipeline_mode = #tpu.pipeline_mode<synchronous>, transform_indices = @transform_8, window_bounds = array<i64: 1, 1>}, {pipeline_mode = #tpu.pipeline_mode<synchronous>, transform_indices = @transform_9, window_bounds = array<i64: 1, 32>}, {pipeline_mode = #tpu.pipeline_mode<synchronous>, transform_indices = @transform_10, window_bounds = array<i64: 1, 32>}, {pipeline_mode = #tpu.pipeline_mode<synchronous>, transform_indices = @transform_11, window_bounds = array<i64: 32, 32>}, {pipeline_mode = #tpu.pipeline_mode<synchronous>, transform_indices = @transform_12, window_bounds = array<i64: 1, 32>}, {pipeline_mode = #tpu.pipeline_mode<synchronous>, transform_indices = @transform_13, window_bounds = array<i64: 128, 32>}]} {
    %cst = arith.constant 0.000000e+00 : f32
    %0 = vector.broadcast %cst : f32 to vector<2x10x10x72xf32>
    %c0 = arith.constant 0 : index
    %c0_0 = arith.constant 0 : index
    %c0_1 = arith.constant 0 : index
    %c0_2 = arith.constant 0 : index
    %1 = vector.load %arg15[%c0, %c0_0, %c0_1, %c0_2] : memref<2x10x10x72xf32, #tpu.memory_space<vmem>>, vector<2x10x10x72xf32>
    tpu.vector_store %arg15[%c0, %c0_0, %c0_1, %c0_2], %0 {strides = array<i32>} : memref<2x10x10x72xf32, #tpu.memory_space<vmem>>, vector<2x10x10x72xf32>,
    %c0_3 = arith.constant 0 : index
    %c0_4 = arith.constant 0 : index
    %c0_5 = arith.constant 0 : index
    %c0_6 = arith.constant 0 : index
    %2 = vector.load %arg1[%c0_3, %c0_4, %c0_5, %c0_6] : memref<2x8x8x72xf32, #tpu.memory_space<vmem>>, vector<2x8x8x72xf32>
    %c0_7 = arith.constant 0 : index
    %c1 = arith.constant 1 : index
    %c1_8 = arith.constant 1 : index
    %c0_9 = arith.constant 0 : index
    %3 = vector.load %arg15[%c0_7, %c1, %c1_8, %c0_9] : memref<2x10x10x72xf32, #tpu.memory_space<vmem>>, vector<2x8x8x72xf32>
    tpu.vector_store %arg15[%c0_7, %c1, %c1_8, %c0_9], %2 {strides = array<i32>} : memref<2x10x10x72xf32, #tpu.memory_space<vmem>>, vector<2x8x8x72xf32>,
    %cst_10 = arith.constant 0.000000e+00 : f32
    %4 = vector.broadcast %cst_10 : f32 to vector<128x32xf32>
    %c0_11 = arith.constant 0 : index
    %c0_12 = arith.constant 0 : index
    %c0_13 = arith.constant 0 : index
    %c0_14 = arith.constant 0 : index
    %5 = vector.load %arg15[%c0_11, %c0_12, %c0_13, %c0_14] : memref<2x10x10x72xf32, #tpu.memory_space<vmem>>, vector<2x8x8x72xf32>
    %6 = vector.shape_cast %5 : vector<2x8x8x72xf32> to vector<128x72xf32>
    %c0_15 = arith.constant 0 : index
    %c0_16 = arith.constant 0 : index
    %c0_17 = arith.constant 0 : index
    %c0_18 = arith.constant 0 : index
    %7 = vector.load %arg2[%c0_15, %c0_16, %c0_17, %c0_18] : memref<3x3x72x32xf32, #tpu.memory_space<vmem>>, vector<1x1x72x32xf32>
    %8 = vector.shape_cast %7 : vector<1x1x72x32xf32> to vector<72x32xf32>
    %cst_19 = arith.constant dense<0.000000e+00> : vector<128x32xf32>
    %9 = tpu.matmul %6, %8, %cst_19 {dimension_numbers = #tpu.dot_dimension_numbers<[1], [0], [0], [1], [0, 0, 1, 1], [], []>} : vector<128x72xf32>, vector<72x32xf32>, vector<128x32xf32> -> vector<128x32xf32>
    %10 = arith.addf %4, %9 : vector<128x32xf32>
    %c0_20 = arith.constant 0 : index
    %c0_21 = arith.constant 0 : index
    %c1_22 = arith.constant 1 : index
    %c0_23 = arith.constant 0 : index
    %11 = vector.load %arg15[%c0_20, %c0_21, %c1_22, %c0_23] : memref<2x10x10x72xf32, #tpu.memory_space<vmem>>, vector<2x8x8x72xf32>
    %12 = vector.shape_cast %11 : vector<2x8x8x72xf32> to vector<128x72xf32>
    %c0_24 = arith.constant 0 : index
    %c1_25 = arith.constant 1 : index
    %c0_26 = arith.constant 0 : index
    %c0_27 = arith.constant 0 : index
    %13 = vector.load %arg2[%c0_24, %c1_25, %c0_26, %c0_27] : memref<3x3x72x32xf32, #tpu.memory_space<vmem>>, vector<1x1x72x32xf32>
    %14 = vector.shape_cast %13 : vector<1x1x72x32xf32> to vector<72x32xf32>
    %cst_28 = arith.constant dense<0.000000e+00> : vector<128x32xf32>
    %15 = tpu.matmul %12, %14, %cst_28 {dimension_numbers = #tpu.dot_dimension_numbers<[1], [0], [0], [1], [0, 0, 1, 1], [], []>} : vector<128x72xf32>, vector<72x32xf32>, vector<128x32xf32> -> vector<128x32xf32>
    %16 = arith.addf %10, %15 : vector<128x32xf32>
    %c0_29 = arith.constant 0 : index
    %c0_30 = arith.constant 0 : index
    %c2 = arith.constant 2 : index
    %c0_31 = arith.constant 0 : index
    %17 = vector.load %arg15[%c0_29, %c0_30, %c2, %c0_31] : memref<2x10x10x72xf32, #tpu.memory_space<vmem>>, vector<2x8x8x72xf32>
    %18 = vector.shape_cast %17 : vector<2x8x8x72xf32> to vector<128x72xf32>
    %c0_32 = arith.constant 0 : index
    %c2_33 = arith.constant 2 : index
    %c0_34 = arith.constant 0 : index
    %c0_35 = arith.constant 0 : index
    %19 = vector.load %arg2[%c0_32, %c2_33, %c0_34, %c0_35] : memref<3x3x72x32xf32, #tpu.memory_space<vmem>>, vector<1x1x72x32xf32>
    %20 = vector.shape_cast %19 : vector<1x1x72x32xf32> to vector<72x32xf32>
    %cst_36 = arith.constant dense<0.000000e+00> : vector<128x32xf32>
    %21 = tpu.matmul %18, %20, %cst_36 {dimension_numbers = #tpu.dot_dimension_numbers<[1], [0], [0], [1], [0, 0, 1, 1], [], []>} : vector<128x72xf32>, vector<72x32xf32>, vector<128x32xf32> -> vector<128x32xf32>
    %22 = arith.addf %16, %21 : vector<128x32xf32>
    %c0_37 = arith.constant 0 : index
    %c1_38 = arith.constant 1 : index
    %c0_39 = arith.constant 0 : index
    %c0_40 = arith.constant 0 : index
    %23 = vector.load %arg15[%c0_37, %c1_38, %c0_39, %c0_40] : memref<2x10x10x72xf32, #tpu.memory_space<vmem>>, vector<2x8x8x72xf32>
    %24 = vector.shape_cast %23 : vector<2x8x8x72xf32> to vector<128x72xf32>
    %c1_41 = arith.constant 1 : index
    %c0_42 = arith.constant 0 : index
    %c0_43 = arith.constant 0 : index
    %c0_44 = arith.constant 0 : index
    %25 = vector.load %arg2[%c1_41, %c0_42, %c0_43, %c0_44] : memref<3x3x72x32xf32, #tpu.memory_space<vmem>>, vector<1x1x72x32xf32>
    %26 = vector.shape_cast %25 : vector<1x1x72x32xf32> to vector<72x32xf32>
    %cst_45 = arith.constant dense<0.000000e+00> : vector<128x32xf32>
    %27 = tpu.matmul %24, %26, %cst_45 {dimension_numbers = #tpu.dot_dimension_numbers<[1], [0], [0], [1], [0, 0, 1, 1], [], []>} : vector<128x72xf32>, vector<72x32xf32>, vector<128x32xf32> -> vector<128x32xf32>
    %28 = arith.addf %22, %27 : vector<128x32xf32>
    %c0_46 = arith.constant 0 : index
    %c1_47 = arith.constant 1 : index
    %c1_48 = arith.constant 1 : index
    %c0_49 = arith.constant 0 : index
    %29 = vector.load %arg15[%c0_46, %c1_47, %c1_48, %c0_49] : memref<2x10x10x72xf32, #tpu.memory_space<vmem>>, vector<2x8x8x72xf32>
    %30 = vector.shape_cast %29 : vector<2x8x8x72xf32> to vector<128x72xf32>
    %c1_50 = arith.constant 1 : index
    %c1_51 = arith.constant 1 : index
    %c0_52 = arith.constant 0 : index
    %c0_53 = arith.constant 0 : index
    %31 = vector.load %arg2[%c1_50, %c1_51, %c0_52, %c0_53] : memref<3x3x72x32xf32, #tpu.memory_space<vmem>>, vector<1x1x72x32xf32>
    %32 = vector.shape_cast %31 : vector<1x1x72x32xf32> to vector<72x32xf32>
    %cst_54 = arith.constant dense<0.000000e+00> : vector<128x32xf32>
    %33 = tpu.matmul %30, %32, %cst_54 {dimension_numbers = #tpu.dot_dimension_numbers<[1], [0], [0], [1], [0, 0, 1, 1], [], []>} : vector<128x72xf32>, vector<72x32xf32>, vector<128x32xf32> -> vector<128x32xf32>
    %34 = arith.addf %28, %33 : vector<128x32xf32>
    %c0_55 = arith.constant 0 : index
    %c1_56 = arith.constant 1 : index
    %c2_57 = arith.constant 2 : index
    %c0_58 = arith.constant 0 : index
    %35 = vector.load %arg15[%c0_55, %c1_56, %c2_57, %c0_58] : memref<2x10x10x72xf32, #tpu.memory_space<vmem>>, vector<2x8x8x72xf32>
    %36 = vector.shape_cast %35 : vector<2x8x8x72xf32> to vector<128x72xf32>
    %c1_59 = arith.constant 1 : index
    %c2_60 = arith.constant 2 : index
    %c0_61 = arith.constant 0 : index
    %c0_62 = arith.constant 0 : index
    %37 = vector.load %arg2[%c1_59, %c2_60, %c0_61, %c0_62] : memref<3x3x72x32xf32, #tpu.memory_space<vmem>>, vector<1x1x72x32xf32>
    %38 = vector.shape_cast %37 : vector<1x1x72x32xf32> to vector<72x32xf32>
    %cst_63 = arith.constant dense<0.000000e+00> : vector<128x32xf32>
    %39 = tpu.matmul %36, %38, %cst_63 {dimension_numbers = #tpu.dot_dimension_numbers<[1], [0], [0], [1], [0, 0, 1, 1], [], []>} : vector<128x72xf32>, vector<72x32xf32>, vector<128x32xf32> -> vector<128x32xf32>
    %40 = arith.addf %34, %39 : vector<128x32xf32>
    %c0_64 = arith.constant 0 : index
    %c2_65 = arith.constant 2 : index
    %c0_66 = arith.constant 0 : index
    %c0_67 = arith.constant 0 : index
    %41 = vector.load %arg15[%c0_64, %c2_65, %c0_66, %c0_67] : memref<2x10x10x72xf32, #tpu.memory_space<vmem>>, vector<2x8x8x72xf32>
    %42 = vector.shape_cast %41 : vector<2x8x8x72xf32> to vector<128x72xf32>
    %c2_68 = arith.constant 2 : index
    %c0_69 = arith.constant 0 : index
    %c0_70 = arith.constant 0 : index
    %c0_71 = arith.constant 0 : index
    %43 = vector.load %arg2[%c2_68, %c0_69, %c0_70, %c0_71] : memref<3x3x72x32xf32, #tpu.memory_space<vmem>>, vector<1x1x72x32xf32>
    %44 = vector.shape_cast %43 : vector<1x1x72x32xf32> to vector<72x32xf32>
    %cst_72 = arith.constant dense<0.000000e+00> : vector<128x32xf32>
    %45 = tpu.matmul %42, %44, %cst_72 {dimension_numbers = #tpu.dot_dimension_numbers<[1], [0], [0], [1], [0, 0, 1, 1], [], []>} : vector<128x72xf32>, vector<72x32xf32>, vector<128x32xf32> -> vector<128x32xf32>
    %46 = arith.addf %40, %45 : vector<128x32xf32>
    %c0_73 = arith.constant 0 : index
    %c2_74 = arith.constant 2 : index
    %c1_75 = arith.constant 1 : index
    %c0_76 = arith.constant 0 : index
    %47 = vector.load %arg15[%c0_73, %c2_74, %c1_75, %c0_76] : memref<2x10x10x72xf32, #tpu.memory_space<vmem>>, vector<2x8x8x72xf32>
    %48 = vector.shape_cast %47 : vector<2x8x8x72xf32> to vector<128x72xf32>
    %c2_77 = arith.constant 2 : index
    %c1_78 = arith.constant 1 : index
    %c0_79 = arith.constant 0 : index
    %c0_80 = arith.constant 0 : index
    %49 = vector.load %arg2[%c2_77, %c1_78, %c0_79, %c0_80] : memref<3x3x72x32xf32, #tpu.memory_space<vmem>>, vector<1x1x72x32xf32>
    %50 = vector.shape_cast %49 : vector<1x1x72x32xf32> to vector<72x32xf32>
    %cst_81 = arith.constant dense<0.000000e+00> : vector<128x32xf32>
    %51 = tpu.matmul %48, %50, %cst_81 {dimension_numbers = #tpu.dot_dimension_numbers<[1], [0], [0], [1], [0, 0, 1, 1], [], []>} : vector<128x72xf32>, vector<72x32xf32>, vector<128x32xf32> -> vector<128x32xf32>
    %52 = arith.addf %46, %51 : vector<128x32xf32>
    %c0_82 = arith.constant 0 : index
    %c2_83 = arith.constant 2 : index
    %c2_84 = arith.constant 2 : index
    %c0_85 = arith.constant 0 : index
    %53 = vector.load %arg15[%c0_82, %c2_83, %c2_84, %c0_85] : memref<2x10x10x72xf32, #tpu.memory_space<vmem>>, vector<2x8x8x72xf32>
    %54 = vector.shape_cast %53 : vector<2x8x8x72xf32> to vector<128x72xf32>
    %c2_86 = arith.constant 2 : index
    %c2_87 = arith.constant 2 : index
    %c0_88 = arith.constant 0 : index
    %c0_89 = arith.constant 0 : index
    %55 = vector.load %arg2[%c2_86, %c2_87, %c0_88, %c0_89] : memref<3x3x72x32xf32, #tpu.memory_space<vmem>>, vector<1x1x72x32xf32>
    %56 = vector.shape_cast %55 : vector<1x1x72x32xf32> to vector<72x32xf32>
    %cst_90 = arith.constant dense<0.000000e+00> : vector<128x32xf32>
    %57 = tpu.matmul %54, %56, %cst_90 {dimension_numbers = #tpu.dot_dimension_numbers<[1], [0], [0], [1], [0, 0, 1, 1], [], []>} : vector<128x72xf32>, vector<72x32xf32>, vector<128x32xf32> -> vector<128x32xf32>
    %58 = arith.addf %52, %57 : vector<128x32xf32>
    %c0_91 = arith.constant 0 : index
    %c0_92 = arith.constant 0 : index
    %59 = vector.load %arg3[%c0_91, %c0_92] : memref<1x32xf32, #tpu.memory_space<vmem>>, vector<1x32xf32>
    %60 = vector.broadcast %59 : vector<1x32xf32> to vector<128x32xf32>
    %61 = arith.addf %58, %60 : vector<128x32xf32>
    %62 = vector.shape_cast %61 : vector<128x32xf32> to vector<2x64x32xf32>
    %cst_93 = arith.constant dense<0.000000e+00> : vector<2x32xf32>
    %63 = vector.multi_reduction <add>, %62, %cst_93 [1] : vector<2x64x32xf32> to vector<2x32xf32>
    %cst_94 = arith.constant 6.400000e+01 : f32
    %64 = vector.broadcast %cst_94 : f32 to vector<2x32xf32>
    %65 = arith.divf %63, %64 : vector<2x32xf32>
    %cst_95 = arith.constant 0.000000e+00 : f32
    %66 = vector.broadcast %cst_95 : f32 to vector<2x32xf32>
    %c0_96 = arith.constant 0 : index
    %c0_97 = arith.constant 0 : index
    %67 = vector.load %arg7[%c0_96, %c0_97] : memref<1x32xf32, #tpu.memory_space<vmem>>, vector<1x32xf32>
    %68 = vector.broadcast %67 : vector<1x32xf32> to vector<2x32xf32>
    %69 = arith.addf %66, %68 : vector<2x32xf32>
    %c0_98 = arith.constant 0 : index
    %c0_99 = arith.constant 0 : index
    %70 = vector.load %arg4[%c0_98, %c0_99] : memref<2x32xf32, #tpu.memory_space<vmem>>, vector<1x32xf32>
    %71 = vector.broadcast %70 : vector<1x32xf32> to vector<2x32xf32>
    %72 = arith.mulf %65, %71 : vector<2x32xf32>
    %cst_100 = arith.constant dense<0.000000e+00> : vector<2xf32>
    %73 = vector.multi_reduction <add>, %72, %cst_100 [1] : vector<2x32xf32> to vector<2xf32>
    %74 = vector.shape_cast %73 : vector<2xf32> to vector<2x1xf32>
    %c0_101 = arith.constant 0 : index
    %c0_102 = arith.constant 0 : index
    %75 = vector.load %arg5[%c0_101, %c0_102] : memref<1x2xf32, #tpu.memory_space<vmem>>, vector<1x1xf32>
    %76 = vector.broadcast %75 : vector<1x1xf32> to vector<2x1xf32>
    %77 = arith.addf %74, %76 : vector<2x1xf32>
    %cst_103 = arith.constant 0.000000e+00 : f32
    %78 = vector.broadcast %cst_103 : f32 to vector<2x1xf32>
    %79 = arith.maximumf %77, %78 : vector<2x1xf32>
    %c0_104 = arith.constant 0 : index
    %c0_105 = arith.constant 0 : index
    %80 = vector.load %arg6[%c0_104, %c0_105] : memref<2x32xf32, #tpu.memory_space<vmem>>, vector<1x32xf32>
    %81 = vector.broadcast %79 : vector<2x1xf32> to vector<2x32xf32>
    %82 = vector.broadcast %80 : vector<1x32xf32> to vector<2x32xf32>
    %83 = arith.mulf %81, %82 : vector<2x32xf32>
    %84 = arith.addf %69, %83 : vector<2x32xf32>
    %c1_106 = arith.constant 1 : index
    %c0_107 = arith.constant 0 : index
    %85 = vector.load %arg4[%c1_106, %c0_107] : memref<2x32xf32, #tpu.memory_space<vmem>>, vector<1x32xf32>
    %86 = vector.broadcast %85 : vector<1x32xf32> to vector<2x32xf32>
    %87 = arith.mulf %65, %86 : vector<2x32xf32>
    %cst_108 = arith.constant dense<0.000000e+00> : vector<2xf32>
    %88 = vector.multi_reduction <add>, %87, %cst_108 [1] : vector<2x32xf32> to vector<2xf32>
    %89 = vector.shape_cast %88 : vector<2xf32> to vector<2x1xf32>
    %c0_109 = arith.constant 0 : index
    %c1_110 = arith.constant 1 : index
    %90 = vector.load %arg5[%c0_109, %c1_110] : memref<1x2xf32, #tpu.memory_space<vmem>>, vector<1x1xf32>
    %91 = vector.broadcast %90 : vector<1x1xf32> to vector<2x1xf32>
    %92 = arith.addf %89, %91 : vector<2x1xf32>
    %cst_111 = arith.constant 0.000000e+00 : f32
    %93 = vector.broadcast %cst_111 : f32 to vector<2x1xf32>
    %94 = arith.maximumf %92, %93 : vector<2x1xf32>
    %c1_112 = arith.constant 1 : index
    %c0_113 = arith.constant 0 : index
    %95 = vector.load %arg6[%c1_112, %c0_113] : memref<2x32xf32, #tpu.memory_space<vmem>>, vector<1x32xf32>
    %96 = vector.broadcast %94 : vector<2x1xf32> to vector<2x32xf32>
    %97 = vector.broadcast %95 : vector<1x32xf32> to vector<2x32xf32>
    %98 = arith.mulf %96, %97 : vector<2x32xf32>
    %99 = arith.addf %84, %98 : vector<2x32xf32>
    %100 = arith.negf %99 : vector<2x32xf32>
    %101 = math.exp %100 : vector<2x32xf32>
    %cst_114 = arith.constant 1.000000e+00 : f32
    %102 = vector.broadcast %cst_114 : f32 to vector<2x32xf32>
    %103 = arith.addf %102, %101 : vector<2x32xf32>
    %104 = arith.divf %102, %103 : vector<2x32xf32>
    %c0_115 = arith.constant 0 : index
    %c0_116 = arith.constant 0 : index
    %105 = vector.load %arg8[%c0_115, %c0_116] : memref<32x1xf32, #tpu.memory_space<vmem>>, vector<32x1xf32>
    %cst_117 = arith.constant dense<0.000000e+00> : vector<128x1xf32>
    %106 = tpu.matmul %61, %105, %cst_117 {dimension_numbers = #tpu.dot_dimension_numbers<[1], [0], [0], [1], [0, 0, 1, 1], [], []>} : vector<128x32xf32>, vector<32x1xf32>, vector<128x1xf32> -> vector<128x1xf32>
    %c0_118 = arith.constant 0 : index
    %c0_119 = arith.constant 0 : index
    %107 = vector.load %arg9[%c0_118, %c0_119] : memref<1x1xf32, #tpu.memory_space<vmem>>, vector<1x1xf32>
    %108 = vector.broadcast %107 : vector<1x1xf32> to vector<128x1xf32>
    %109 = arith.addf %106, %108 : vector<128x1xf32>
    %110 = arith.negf %109 : vector<128x1xf32>
    %111 = math.exp %110 : vector<128x1xf32>
    %cst_120 = arith.constant 1.000000e+00 : f32
    %112 = vector.broadcast %cst_120 : f32 to vector<128x1xf32>
    %113 = arith.addf %112, %111 : vector<128x1xf32>
    %114 = arith.divf %112, %113 : vector<128x1xf32>
    %115 = vector.shape_cast %104 : vector<2x32xf32> to vector<2x1x32xf32>
    %116 = vector.broadcast %115 : vector<2x1x32xf32> to vector<2x64x32xf32>
    %117 = arith.mulf %62, %116 : vector<2x64x32xf32>
    %118 = vector.shape_cast %114 : vector<128x1xf32> to vector<2x64x1xf32>
    %119 = vector.broadcast %118 : vector<2x64x1xf32> to vector<2x64x32xf32>
    %120 = arith.mulf %62, %119 : vector<2x64x32xf32>
    %121 = arith.addf %117, %120 : vector<2x64x32xf32>
    %122 = vector.shape_cast %121 : vector<2x64x32xf32> to vector<128x32xf32>
    %cst_121 = arith.constant dense<0.000000e+00> : vector<32xf32>
    %123 = vector.multi_reduction <add>, %122, %cst_121 [0] : vector<128x32xf32> to vector<32xf32>
    %124 = vector.shape_cast %123 : vector<32xf32> to vector<1x32xf32>
    %cst_122 = arith.constant 1.280000e+02 : f32
    %125 = vector.broadcast %cst_122 : f32 to vector<1x32xf32>
    %126 = arith.divf %124, %125 : vector<1x32xf32>
    %127 = arith.mulf %122, %122 : vector<128x32xf32>
    %cst_123 = arith.constant dense<0.000000e+00> : vector<32xf32>
    %128 = vector.multi_reduction <add>, %127, %cst_123 [0] : vector<128x32xf32> to vector<32xf32>
    %129 = vector.shape_cast %128 : vector<32xf32> to vector<1x32xf32>
    %cst_124 = arith.constant 1.280000e+02 : f32
    %130 = vector.broadcast %cst_124 : f32 to vector<1x32xf32>
    %131 = arith.divf %129, %130 : vector<1x32xf32>
    %132 = arith.mulf %126, %126 : vector<1x32xf32>
    %133 = arith.subf %131, %132 : vector<1x32xf32>
    %cst_125 = arith.constant 0.000000e+00 : f32
    %134 = vector.broadcast %cst_125 : f32 to vector<1x32xf32>
    %135 = arith.maximumf %133, %134 : vector<1x32xf32>
    %c0_126 = arith.constant 0 : index
    %c0_127 = arith.constant 0 : index
    %136 = vector.load %arg10[%c0_126, %c0_127] : memref<1x32xf32, #tpu.memory_space<vmem>>, vector<1x32xf32>
    %cst_128 = arith.constant 9.99999974E-6 : f32
    %137 = vector.broadcast %cst_128 : f32 to vector<1x32xf32>
    %138 = arith.addf %135, %137 : vector<1x32xf32>
    %139 = math.rsqrt %138 : vector<1x32xf32>
    %140 = arith.mulf %136, %139 : vector<1x32xf32>
    %141 = vector.broadcast %126 : vector<1x32xf32> to vector<128x32xf32>
    %142 = arith.subf %122, %141 : vector<128x32xf32>
    %143 = vector.broadcast %140 : vector<1x32xf32> to vector<128x32xf32>
    %144 = arith.mulf %142, %143 : vector<128x32xf32>
    %c0_129 = arith.constant 0 : index
    %c0_130 = arith.constant 0 : index
    %145 = vector.load %arg11[%c0_129, %c0_130] : memref<1x32xf32, #tpu.memory_space<vmem>>, vector<1x32xf32>
    %146 = vector.broadcast %145 : vector<1x32xf32> to vector<128x32xf32>
    %147 = arith.addf %144, %146 : vector<128x32xf32>
    %cst_131 = arith.constant 0.000000e+00 : f32
    %148 = vector.broadcast %cst_131 : f32 to vector<128x32xf32>
    %149 = arith.maximumf %147, %148 : vector<128x32xf32>
    %c0_132 = arith.constant 0 : index
    %c0_133 = arith.constant 0 : index
    %150 = vector.load %arg12[%c0_132, %c0_133] : memref<32x32xf32, #tpu.memory_space<vmem>>, vector<32x32xf32>
    %cst_134 = arith.constant dense<0.000000e+00> : vector<128x32xf32>
    %151 = tpu.matmul %149, %150, %cst_134 {dimension_numbers = #tpu.dot_dimension_numbers<[1], [0], [0], [1], [0, 0, 1, 1], [], []>} : vector<128x32xf32>, vector<32x32xf32>, vector<128x32xf32> -> vector<128x32xf32>
    %c0_135 = arith.constant 0 : index
    %c0_136 = arith.constant 0 : index
    %152 = vector.load %arg13[%c0_135, %c0_136] : memref<1x32xf32, #tpu.memory_space<vmem>>, vector<1x32xf32>
    %153 = vector.broadcast %152 : vector<1x32xf32> to vector<128x32xf32>
    %154 = arith.addf %151, %153 : vector<128x32xf32>
    %c0_137 = arith.constant 0 : index
    %c0_138 = arith.constant 0 : index
    %155 = vector.load %arg14[%c0_137, %c0_138] : memref<128x32xf32, #tpu.memory_space<vmem>>, vector<128x32xf32>
    tpu.vector_store %arg14[%c0_137, %c0_138], %154 {strides = array<i32>} : memref<128x32xf32, #tpu.memory_space<vmem>>, vector<128x32xf32>,
    return
  }
  func.func @transform_0(%arg0: i32) -> (i32, i32, i32, i32) {
    %c0_i32 = arith.constant 0 : i32
    %c0_i32_0 = arith.constant 0 : i32
    %c0_i32_1 = arith.constant 0 : i32
    %c0_i32_2 = arith.constant 0 : i32
    %c0_i32_3 = arith.constant 0 : i32
    return %c0_i32, %c0_i32_0, %c0_i32_1, %c0_i32_2 : i32, i32, i32, i32
  }
  func.func @transform_1(%arg0: i32) -> (i32, i32, i32, i32) {
    %c0_i32 = arith.constant 0 : i32
    %c0_i32_0 = arith.constant 0 : i32
    %c0_i32_1 = arith.constant 0 : i32
    %c0_i32_2 = arith.constant 0 : i32
    %c0_i32_3 = arith.constant 0 : i32
    return %c0_i32, %c0_i32_0, %c0_i32_1, %c0_i32_2 : i32, i32, i32, i32
  }
  func.func @transform_2(%arg0: i32) -> (i32, i32) {
    %c0_i32 = arith.constant 0 : i32
    %c0_i32_0 = arith.constant 0 : i32
    %c0_i32_1 = arith.constant 0 : i32
    return %c0_i32, %c0_i32_0 : i32, i32
  }
  func.func @transform_3(%arg0: i32) -> (i32, i32) {
    %c0_i32 = arith.constant 0 : i32
    %c0_i32_0 = arith.constant 0 : i32
    %c0_i32_1 = arith.constant 0 : i32
    return %c0_i32, %c0_i32_0 : i32, i32
  }
  func.func @transform_4(%arg0: i32) -> (i32, i32) {
    %c0_i32 = arith.constant 0 : i32
    %c0_i32_0 = arith.constant 0 : i32
    %c0_i32_1 = arith.constant 0 : i32
    return %c0_i32, %c0_i32_0 : i32, i32
  }
  func.func @transform_5(%arg0: i32) -> (i32, i32) {
    %c0_i32 = arith.constant 0 : i32
    %c0_i32_0 = arith.constant 0 : i32
    %c0_i32_1 = arith.constant 0 : i32
    return %c0_i32, %c0_i32_0 : i32, i32
  }
  func.func @transform_6(%arg0: i32) -> (i32, i32) {
    %c0_i32 = arith.constant 0 : i32
    %c0_i32_0 = arith.constant 0 : i32
    %c0_i32_1 = arith.constant 0 : i32
    return %c0_i32, %c0_i32_0 : i32, i32
  }
  func.func @transform_7(%arg0: i32) -> (i32, i32) {
    %c0_i32 = arith.constant 0 : i32
    %c0_i32_0 = arith.constant 0 : i32
    %c0_i32_1 = arith.constant 0 : i32
    return %c0_i32, %c0_i32_0 : i32, i32
  }
  func.func @transform_8(%arg0: i32) -> (i32, i32) {
    %c0_i32 = arith.constant 0 : i32
    %c0_i32_0 = arith.constant 0 : i32
    %c0_i32_1 = arith.constant 0 : i32
    return %c0_i32, %c0_i32_0 : i32, i32
  }
  func.func @transform_9(%arg0: i32) -> (i32, i32) {
    %c0_i32 = arith.constant 0 : i32
    %c0_i32_0 = arith.constant 0 : i32
    %c0_i32_1 = arith.constant 0 : i32
    return %c0_i32, %c0_i32_0 : i32, i32
  }
  func.func @transform_10(%arg0: i32) -> (i32, i32) {
    %c0_i32 = arith.constant 0 : i32
    %c0_i32_0 = arith.constant 0 : i32
    %c0_i32_1 = arith.constant 0 : i32
    return %c0_i32, %c0_i32_0 : i32, i32
  }
  func.func @transform_11(%arg0: i32) -> (i32, i32) {
    %c0_i32 = arith.constant 0 : i32
    %c0_i32_0 = arith.constant 0 : i32
    %c0_i32_1 = arith.constant 0 : i32
    return %c0_i32, %c0_i32_0 : i32, i32
  }
  func.func @transform_12(%arg0: i32) -> (i32, i32) {
    %c0_i32 = arith.constant 0 : i32
    %c0_i32_0 = arith.constant 0 : i32
    %c0_i32_1 = arith.constant 0 : i32
    return %c0_i32, %c0_i32_0 : i32, i32
  }
  func.func @transform_13(%arg0: i32) -> (i32, i32) {
    %c0_i32 = arith.constant 0 : i32
    %c0_i32_0 = arith.constant 0 : i32
    %c0_i32_1 = arith.constant 0 : i32
    return %c0_i32, %c0_i32_0 : i32, i32
  }
}

</mosaic_0001>

<bundles_post_ra>
// kernel: tpu_custom_call.1
= control target key start
LH: loop header
LB: loop body
LE: loop exit
PB: predicated region body
PF: predicated region fallthrough
CT: control target
= control target key end

     0   :  { %vm46_vm0 = vcmask 588800   ;;  %vm48_vm1 = vcmask 582656   ;;  %v2904_v2 = vmov 0.0   ;;  %vm1504_vm2 = vcmask 261120   ;;  %s4421_s1 = inlined_call_operand.vmem [shape: f32[3,3,72,32], index: 1, kind: input, shape index: {}]   ;;  %s4422_s0 = inlined_call_operand.vmem [shape: f32[2,8,8,72], index: 0, kind: input, shape index: {}]   ;;  %s4423_s2 = inlined_call_operand.vmem [shape: f32[1,32], index: 2, kind: input, shape index: {}]   ;;  %s4424_s7 = inlined_call_operand.vmem [shape: f32[32,1], index: 7, kind: input, shape index: {}]   ;;  %s4425_s3 = inlined_call_operand.vmem [shape: f32[2,32], index: 3, kind: input, shape index: {}]   ;;  %s4426_s8 = inlined_call_operand.<no memory space> [shape: f32[1,1], index: 8, kind: input, shape index: {}]   ;;  %s4427_s4 = inlined_call_operand.vmem [shape: f32[1,2], index: 4, kind: input, shape index: {}]   ;;  %s4428_s5 = inlined_call_operand.vmem [shape: f32[2,32], index: 5, kind: input, shape index: {}]   ;;  %s4429_s6 = inlined_call_operand.vmem [shape: f32[1,32], index: 6, kind: input, shape index: {}]   ;;  %s4430_s11 = inlined_call_operand.vmem [shape: f32[32,32], index: 11, kind: input, shape index: {}]   ;;  %s4431_s10 = inlined_call_operand.vmem [shape: f32[1,32], index: 10, kind: input, shape index: {}]   ;;  %s4432_s9 = inlined_call_operand.vmem [shape: f32[1,32], index: 9, kind: input, shape index: {}]   ;;  %s4433_s12 = inlined_call_operand.vmem [shape: f32[1,32], index: 12, kind: input, shape index: {}]   ;;  %s4434_s13 = inlined_call_operand.vmem [shape: f32[128,32], index: 13, kind: output, shape index: {}]  }
   0x1   :  { %v2526_v0 = vld [vmem:[%s4421_s1 + $0x88] sm:$0xff]  ;;  %v2525_v1 = vld [vmem:[%s4421_s1 + $0x80] sm:$0xff]  ;;  %76 = vst.msk [vmem:[#allocation2 + $0xe0] sm:$0xff] %vm46_vm0, %v2904_v2  ;;  %v2990_v3 = vld [vmem:[%s4421_s1 + $0xd0] sm:$0xff]  ;;  %vm1568_vm4 = vcmask 1041409   ;;  %vm1571_vm5 = vcmask 254976  }
   0x2   :  { %2783 = vmatpush.msra.mxu3 %v2526_v0  ;;  %v2995_v4 = vld [vmem:[%s4421_s1 + $0xc8] sm:$0xff]  ;;  %227 = vmatpush.msra.mxu0 %v2526_v0  ;;  %77 = vst.msk [vmem:[#allocation2 + $0xe8] sm:$0x3] %vm48_vm1, %v2904_v2  ;;  %v2524_v5 = vld [vmem:[%s4421_s1 + $0x78] sm:$0xff]  ;;  %v3006_v6 = vld [vmem:[%s4421_s1 + $0x40] sm:$0xff] }
   0x3   :  { %479 = vmatpush.msra.mxu2 %v2990_v3  ;;  %47 = vst.msk [vmem:[#allocation2] sm:$0xff] %vm46_vm0, %v2904_v2  ;;  %340 = vmatpush.msra.mxu1 %v3006_v6  ;;  %v3014_v7 = vld [vmem:[%s4421_s1 + $0xc0] sm:$0xff]  ;;  %v3019_v8 = vld [vmem:[%s4421_s1 + $0x38] sm:$0xff]  ;;  %v2523_v9 = vld [vmem:[%s4421_s1 + $0x70] sm:$0xff] }
   0x4   :  { %2784 = vmatpush.msra.mxu3 %v2525_v1  ;;  %49 = vst.msk [vmem:[#allocation2 + $0x8] sm:$0x3] %vm48_vm1, %v2904_v2  ;;  %228 = vmatpush.msra.mxu0 %v2525_v1  ;;  %v3030_v10 = vld [vmem:[%s4421_s1 + $0x30] sm:$0xff]  ;;  %v3038_v11 = vld [vmem:[%s4421_s1 + $0xb8] sm:$0xff]  ;;  %v2522_v12 = vld [vmem:[%s4421_s1 + $0x68] sm:$0xff] }
   0x5   :  { %480 = vmatpush.msra.mxu2 %v2995_v4  ;;  %50 = vst.msk [vmem:[#allocation2 + $0x10] sm:$0xff] %vm46_vm0, %v2904_v2  ;;  %341 = vmatpush.msra.mxu1 %v3019_v8  ;;  %v3049_v13 = vld [vmem:[%s4421_s1 + $0x28] sm:$0xff]  ;;  %v3057_v14 = vld [vmem:[%s4421_s1 + $0xb0] sm:$0xff]  ;;  %v99_v15 = vld [vmem:[%s4422_s0 + $0x58] sm:$0xff] }
   0x6   :  { %2785 = vmatpush.msra.mxu3 %v2524_v5  ;;  %51 = vst.msk [vmem:[#allocation2 + $0x18] sm:$0x3] %vm48_vm1, %v2904_v2  ;;  %229 = vmatpush.msra.mxu0 %v2524_v5  ;;  %v2521_v16 = vld [vmem:[%s4421_s1 + $0x60] sm:$0xff]  ;;  %v3078_v18 = vld [vmem:[%s4421_s1 + $0xa8] sm:$0xff]  ;;  %v2520_v19 = vld [vmem:[%s4421_s1 + $0x58] sm:$0xff] }
   0x7   :  { %481 = vmatpush.msra.mxu2 %v3014_v7  ;;  %52 = vst.msk [vmem:[#allocation2 + $0x20] sm:$0xff] %vm46_vm0, %v2904_v2  ;;  %342 = vmatpush.msra.mxu1 %v3030_v10  ;;  %v3071_v17 = vld [vmem:[%s4421_s1 + $0x20] sm:$0xff]  ;;  %v140_v20 = vld [vmem:[%s4421_s1 + $0x18] sm:$0xff]  ;;  %v2519_v22 = vld [vmem:[%s4421_s1 + $0x50] sm:$0xff] }
   0x8   :  { %2786 = vmatpush.msra.mxu3 %v2523_v9  ;;  %53 = vst.msk [vmem:[#allocation2 + $0x28] sm:$0x3] %vm48_vm1, %v2904_v2  ;;  %230 = vmatpush.msra.mxu0 %v2523_v9  ;;  %v3095_v21 = vld [vmem:[%s4421_s1 + $0xa0] sm:$0xff]  ;;  %v139_v23 = vld [vmem:[%s4421_s1 + $0x10] sm:$0xff]  ;;  %v3113_v24 = vld [vmem:[%s4421_s1 + $0x98] sm:$0xff] }
   0x9   :  { %482 = vmatpush.msra.mxu2 %v3038_v11  ;;  %116 = vst.msk [vmem:[#allocation2 + $0xe1] sm:$0xff] %vm46_vm0, %v99_v15  ;;  %343 = vmatpush.msra.mxu1 %v3049_v13  ;;  %v2518_v25 = vld [vmem:[%s4421_s1 + $0x48] sm:$0xff]  ;;  %v3131_v28 = vld [vmem:[%s4421_s1 + $0x90] sm:$0xff]  ;;  %v137_v30 = vld [vmem:[%s4421_s1] sm:$0xff] }
   0xa   :  { %2787 = vmatpush.msra.mxu3 %v2522_v12  ;;  %54 = vst.msk [vmem:[#allocation2 + $0x30] sm:$0xff] %vm46_vm0, %v2904_v2  ;;  %231 = vmatpush.msra.mxu0 %v2522_v12  ;;  %v138_v26 = vld [vmem:[%s4421_s1 + $0x8] sm:$0xff]  ;;  %v121_v32 = vld [vmem:[#allocation2] sm:$0xff]  ;;  %v2616_v34 = vld [vmem:[%s4421_s1 + $0x158] sm:$0xff] }
   0xb   :  { %483 = vmatpush.msra.mxu2 %v3057_v14  ;;  %55 = vst.msk [vmem:[#allocation2 + $0x38] sm:$0x3] %vm48_vm1, %v2904_v2  ;;  %344 = vmatpush.msra.mxu1 %v3071_v17  ;;  %v398_v29 = vld [vmem:[#allocation2 + $0x2] sm:$0xff]  ;;  %v2615_v35 = vld [vmem:[%s4421_s1 + $0x150] sm:$0xff]  ;;  %v91_v42 = vld [vmem:[%s4422_s0 + $0x18] sm:$0xff] }
   0xc   :  { %2788 = vmatpush.msra.mxu3 %v2521_v16  ;;  %56 = vst.msk [vmem:[#allocation2 + $0x40] sm:$0xff] %vm46_vm0, %v2904_v2  ;;  %232 = vmatpush.msra.mxu0 %v2521_v16  ;;  %v146_v31 = vld [vmem:[#allocation2 + $0x1] sm:$0xff]  ;;  %v102_v40 = vld [vmem:[%s4422_s0 + $0x70] sm:$0xff]  ;;  %v2612_v60 = vld [vmem:[%s4421_s1 + $0x138] sm:$0xff] }
   0xd   :  { %484 = vmatpush.msra.mxu2 %v3078_v18  ;;  %57 = vst.msk [vmem:[#allocation2 + $0x48] sm:$0x3] %vm48_vm1, %v2904_v2  ;;  %345 = vmatpush.msra.mxu1 %v140_v20  ;;  %v2617_v33 = vld [vmem:[%s4421_s1 + $0x160] sm:$0xff]  ;;  %v101_v38 = vld [vmem:[%s4422_s0 + $0x68] sm:$0xff]  ;;  %v90_v41 = vld [vmem:[%s4422_s0 + $0x10] sm:$0xff] }
   0xe   :  { %2789 = vmatpush.msra.mxu3 %v2520_v19  ;;  %58 = vst.msk [vmem:[#allocation2 + $0x50] sm:$0xff] %vm46_vm0, %v2904_v2  ;;  %233 = vmatpush.msra.mxu0 %v2520_v19  ;;  %v100_v36 = vld [vmem:[%s4422_s0 + $0x60] sm:$0xff]  ;;  %v89_v39 = vld [vmem:[%s4422_s0 + $0x8] sm:$0xff]  ;;  %v94_v55 = vld [vmem:[%s4422_s0 + $0x30] sm:$0xff] }
   0xf   :  { %485 = vmatpush.msra.mxu2 %v3095_v21  ;;  %59 = vst.msk [vmem:[#allocation2 + $0x58] sm:$0x3] %vm48_vm1, %v2904_v2  ;;  %346 = vmatpush.msra.mxu1 %v139_v23  ;;  %v88_v37 = vld [vmem:[%s4422_s0] sm:$0xff]  ;;  %v2614_v48 = vld [vmem:[%s4421_s1 + $0x148] sm:$0xff]  ;;  %v2592_v1 = vld [vmem:[%s4421_s1 + $0x118] sm:$0xff] }
  0x10   :  { %2790 = vmatpush.msra.mxu3 %v2519_v22  ;;  %v3124_v27 = vld [vmem:[#allocation2 + $0xe1] sm:$0xff]  ;;  %60 = vst.msk [vmem:[#allocation2 + $0x60] sm:$0xff] %vm46_vm0, %v2904_v2  ;;  %234 = vmatpush.msra.mxu0 %v2519_v22  ;;  %v2611_v9 = vld [vmem:[%s4421_s1 + $0x130] sm:$0xff] }
  0x11   :  { %61 = vst.msk [vmem:[#allocation2 + $0x68] sm:$0x3] %vm48_vm1, %v2904_v2  ;;  %486 = vmatpush.msra.mxu2 %v3113_v24  ;;  %347 = vmatpush.msra.mxu1 %v138_v26  ;;  %v92_v43 = vld [vmem:[%s4422_s0 + $0x20] sm:$0xff]  ;;  %v93_v49 = vld [vmem:[%s4422_s0 + $0x28] sm:$0xff]  ;;  %v2667_v19 = vld [vmem:[%s4421_s1 + $0x1f0] sm:$0xff] }
  0x12   :  { %2791 = vmatpush.msra.mxu3 %v2518_v25  ;;  %62 = vst.msk [vmem:[#allocation2 + $0x70] sm:$0xff] %vm46_vm0, %v2904_v2  ;;  %235 = vmatpush.msra.mxu0 %v2518_v25  ;;  %v2613_v54 = vld [vmem:[%s4421_s1 + $0x140] sm:$0xff]  ;;  %v97_v12 = vld [vmem:[%s4422_s0 + $0x48] sm:$0xff]  ;;  %v98_v22 = vld [vmem:[%s4422_s0 + $0x50] sm:$0xff] }
  0x13   :  { %2539 = vmatmul.msk.f32.vlgmr.msra.gmra.mxu3 %vm46_vm0, %v3124_v27  ;;  %63 = vst.msk [vmem:[#allocation2 + $0x78] sm:$0x3] %vm48_vm1, %v2904_v2  ;;  %487 = vmatpush.msra.mxu2 %v3131_v28  ;;  %v3313_v61 = vld [vmem:[#allocation2 + $0xe0] sm:$0xff] }
  0x14   :  { %64 = vst.msk [vmem:[#allocation2 + $0x80] sm:$0xff] %vm46_vm0, %v2904_v2  ;;  %2792 = vmatpush.msrb.mxu3 %v3006_v6  ;;  %2568 = vmatmul.msk.f32.vlgmr.msra.gmra.mxu2 %vm46_vm0, %v398_v29  ;;  %v2642_v29 = vld [vmem:[%s4421_s1 + $0x1a8] sm:$0xff] }
  0x15   :  { %65 = vst.msk [vmem:[#allocation2 + $0x88] sm:$0x3] %vm48_vm1, %v2904_v2  ;;  %348 = vmatpush.msra.mxu1 %v137_v30  ;;  %2527 = vmatmul.msk.f32.vlgmr.msra.gmra.mxu0 %vm46_vm0, %v146_v31  ;;  %v2584_v31 = vld [vmem:[%s4421_s1 + $0xd8] sm:$0xff] }
  0x16   :  { %66 = vst.msk [vmem:[#allocation2 + $0x90] sm:$0xff] %vm46_vm0, %v2904_v2  ;;  %2793 = vmatpush.msrb.mxu3 %v3019_v8  ;;  %2543 = vmatmul.msk.f32.vlgmr.msra.gmra.mxu1 %vm46_vm0, %v121_v32  ;;  %v2590_v8 = vld [vmem:[%s4421_s1 + $0x108] sm:$0xff]  ;;  %v2641_v32 = vld [vmem:[%s4421_s1 + $0x1a0] sm:$0xff] }
  0x17   :  { %67 = vst.msk [vmem:[#allocation2 + $0x98] sm:$0x3] %vm48_vm1, %v2904_v2  ;;  %789 = vmatpush.msrb.mxu0 %v2617_v33  ;;  %1100 = vmatpush.msrb.mxu2 %v2667_v19  ;;  %v2664_v33 = vld [vmem:[%s4421_s1 + $0x1d8] sm:$0xff] }
  0x18   :  { %68 = vst.msk [vmem:[#allocation2 + $0xa0] sm:$0xff] %vm46_vm0, %v2904_v2  ;;  %2794 = vmatpush.msrb.mxu3 %v3030_v10  ;;  %v2589_v10 = vld [vmem:[%s4421_s1 + $0x100] sm:$0xff]  ;;  %944 = vmatpush.msrb.mxu1 %v2642_v29 }
  0x19   :  { %69 = vst.msk [vmem:[#allocation2 + $0xa8] sm:$0x3] %vm48_vm1, %v2904_v2  ;;  %790 = vmatpush.msrb.mxu0 %v2616_v34  ;;  %v2609_v34 = vld [vmem:[%s4421_s1 + $0x120] sm:$0xff] }
  0x1a   :  { %70 = vst.msk [vmem:[#allocation2 + $0xb0] sm:$0xff] %vm46_vm0, %v2904_v2  ;;  %2795 = vmatpush.msrb.mxu3 %v3049_v13  ;;  %945 = vmatpush.msrb.mxu1 %v2641_v32  ;;  %v2690_v32 = vld [vmem:[%s4421_s1 + $0x228] sm:$0xff] }
  0x1b   :  { %71 = vst.msk [vmem:[#allocation2 + $0xb8] sm:$0x3] %vm48_vm1, %v2904_v2  ;;  %791 = vmatpush.msrb.mxu0 %v2615_v35  ;;  %v2640_v35 = vld [vmem:[%s4421_s1 + $0x198] sm:$0xff] }
  0x1c   :  { %72 = vst.msk [vmem:[#allocation2 + $0xc0] sm:$0xff] %vm46_vm0, %v2904_v2  ;;  %2796 = vmatpush.msrb.mxu3 %v3071_v17  ;;  %v2587_v17 = vld [vmem:[%s4421_s1 + $0xf0] sm:$0xff]  ;;  %946 = vmatpush.msrb.mxu1 %v2640_v35 }
  0x1d   :  { %73 = vst.msk [vmem:[#allocation2 + $0xc8] sm:$0x3] %vm48_vm1, %v2904_v2  ;;  %792 = vmatpush.msrb.mxu0 %v2614_v48  ;;  %v2661_v48 = vld [vmem:[%s4421_s1 + $0x1c0] sm:$0xff] }
  0x1e   :  { %74 = vst.msk [vmem:[#allocation2 + $0xd0] sm:$0xff] %vm46_vm0, %v2904_v2  ;;  %2797 = vmatpush.msrb.mxu3 %v140_v20  ;;  %v2586_v20 = vld [vmem:[%s4421_s1 + $0xe8] sm:$0xff] }
  0x1f   :  { %75 = vst.msk [vmem:[#allocation2 + $0xd8] sm:$0x3] %vm48_vm1, %v2904_v2  ;;  %793 = vmatpush.msrb.mxu0 %v2613_v54  ;;  %v2660_v54 = vld [vmem:[%s4421_s1 + $0x1b8] sm:$0xff] }
  0x20   :  { %78 = vst.msk [vmem:[#allocation2 + $0xf0] sm:$0xff] %vm46_vm0, %v2904_v2  ;;  %2798 = vmatpush.msrb.mxu3 %v139_v23 }
  0x21   :  { %79 = vst.msk [vmem:[#allocation2 + $0xf8] sm:$0x3] %vm48_vm1, %v2904_v2  ;;  %794 = vmatpush.msrb.mxu0 %v2612_v60 }
  0x22   :  { %80 = vst.msk [vmem:[#allocation2 + $0x100] sm:$0xff] %vm46_vm0, %v2904_v2  ;;  %2799 = vmatpush.msrb.mxu3 %v138_v26 }
  0x23   :  { %81 = vst.msk [vmem:[#allocation2 + $0x108] sm:$0x3] %vm48_vm1, %v2904_v2  ;;  %795 = vmatpush.msrb.mxu0 %v2611_v9  ;;  %v2636_v9 = vld [vmem:[%s4421_s1 + $0x178] sm:$0xff] }
  0x24   :  { %82 = vst.msk [vmem:[#allocation2 + $0x110] sm:$0xff] %vm46_vm0, %v2904_v2  ;;  %2800 = vmatpush.msrb.mxu3 %v137_v30  ;;  %v2665_v30 = vld [vmem:[%s4421_s1 + $0x1e0] sm:$0xff] }
  0x25   :  { %83 = vst.msk [vmem:[#allocation2 + $0x118] sm:$0x3] %vm48_vm1, %v2904_v2 }
  0x26   :  { %2801 = vmatpush.msra.mxu3 %v2990_v3  ;;  %84 = vst.msk [vmem:[#allocation2 + $0x120] sm:$0xff] %vm46_vm0, %v2904_v2  ;;  %v96_v3 = vld [vmem:[%s4422_s0 + $0x40] sm:$0xff] }
  0x27   :  { %85 = vst.msk [vmem:[#allocation2 + $0x128] sm:$0x3] %vm48_vm1, %v2904_v2 }
  0x28   :  { %2802 = vmatpush.msra.mxu3 %v2995_v4  ;;  %86 = vst.msk [vmem:[#allocation2 + $0x130] sm:$0xff] %vm46_vm0, %v2904_v2 }
  0x29   :  { %87 = vst.msk [vmem:[#allocation2 + $0x138] sm:$0x3] %vm48_vm1, %v2904_v2  ;;  %v2591_v2 = vld [vmem:[%s4421_s1 + $0x110] sm:$0xff] }
  0x2a   :  { %2803 = vmatpush.msra.mxu3 %v3014_v7  ;;  %117 = vst.msk [vmem:[#allocation2 + $0xf1] sm:$0xff] %vm46_vm0, %v100_v36  ;;  %v2663_v36 = vld [vmem:[%s4421_s1 + $0x1d0] sm:$0xff] }
  0x2b   :  { %105 = vst.msk [vmem:[#allocation2 + $0x11] sm:$0xff] %vm46_vm0, %v88_v37  ;;  %v3449_v37 = vld [vmem:[#allocation2 + $0xe2] sm:$0xff] }
  0x2c   :  { %2804 = vmatpush.msra.mxu3 %v3038_v11  ;;  %118 = vst.msk [vmem:[#allocation2 + $0x101] sm:$0xff] %vm46_vm0, %v101_v38  ;;  %v2588_v11 = vld [vmem:[%s4421_s1 + $0xf8] sm:$0xff]  ;;  %v406_v38 = vld [vmem:[#allocation2 + $0xa2] sm:$0xff] }
  0x2d   :  { %106 = vst.msk [vmem:[#allocation2 + $0x21] sm:$0xff] %vm46_vm0, %v89_v39  ;;  %v154_v39 = vld [vmem:[#allocation2 + $0xa1] sm:$0xff] }
  0x2e   :  { %2805 = vmatpush.msra.mxu3 %v3057_v14  ;;  %119 = vst.msk [vmem:[#allocation2 + $0x111] sm:$0xff] %vm46_vm0, %v102_v40  ;;  %v129_v40 = vld [vmem:[#allocation2 + $0xa0] sm:$0xff] }
  0x2f   :  { %107 = vst.msk [vmem:[#allocation2 + $0x31] sm:$0xff] %vm46_vm0, %v90_v41  ;;  %v2662_v41 = vld [vmem:[%s4421_s1 + $0x1c8] sm:$0xff] }
  0x30   :  { %2806 = vmatpush.msra.mxu3 %v3078_v18  ;;  %108 = vst.msk [vmem:[#allocation2 + $0x41] sm:$0xff] %vm46_vm0, %v91_v42  ;;  %v2610_v18 = vld [vmem:[%s4421_s1 + $0x128] sm:$0xff]  ;;  %v2639_v42 = vld [vmem:[%s4421_s1 + $0x190] sm:$0xff] }
  0x31   :  { %v3244_v44 = vld [vmem:[#allocation2 + $0xf1] sm:$0xff]  ;;  %109 = vst.msk [vmem:[#allocation2 + $0x51] sm:$0xff] %vm46_vm0, %v92_v43  ;;  %796 = vmatpush.msrb.mxu0 %v2610_v18  ;;  %947 = vmatpush.msrb.mxu1 %v2639_v42 }
  0x32   :  { %2807 = vmatpush.msra.mxu3 %v3095_v21  ;;  %v3250_v45 = vld [vmem:[#allocation2 + $0x12] sm:$0xff]  ;;  %110 = vst.msk [vmem:[#allocation2 + $0x61] sm:$0xff] %vm46_vm0, %v93_v49  ;;  %v2666_v21 = vld [vmem:[%s4421_s1 + $0x1e8] sm:$0xff] }
  0x33   :  { %2540 = vmatmul.msk.f32.gmra.mxu3 %vm46_vm0, %v3244_v44  ;;  %v3252_v46 = vld [vmem:[#allocation2 + $0x11] sm:$0xff]  ;;  %2569 = vmatmul.msk.f32.gmra.mxu2 %vm46_vm0, %v3250_v45  ;;  %v3270_v50 = vld [vmem:[#allocation2 + $0x101] sm:$0xff]  ;;  %111 = vst.msk [vmem:[#allocation2 + $0x71] sm:$0xff] %vm46_vm0, %v94_v55 }
  0x34   :  { %v3254_v47 = vld [vmem:[#allocation2 + $0x10] sm:$0xff]  ;;  %2528 = vmatmul.msk.f32.gmra.mxu0 %vm46_vm0, %v3252_v46  ;;  %2808 = vmatpush.msra.mxu3 %v3113_v24  ;;  %v3273_v51 = vld [vmem:[#allocation2 + $0x22] sm:$0xff]  ;;  %113 = vst.msk [vmem:[#allocation2 + $0xb1] sm:$0xff] %vm46_vm0, %v96_v3  ;;  %v2692_v43 = vld [vmem:[%s4421_s1 + $0x238] sm:$0xff] }
  0x35   :  { %2544 = vmatmul.msk.f32.gmra.mxu1 %vm46_vm0, %v3254_v47  ;;  %v3275_v52 = vld [vmem:[#allocation2 + $0x21] sm:$0xff]  ;;  %v3293_v56 = vld [vmem:[#allocation2 + $0x111] sm:$0xff]  ;;  %114 = vst.msk [vmem:[#allocation2 + $0xc1] sm:$0xff] %vm46_vm0, %v97_v12  ;;  %1101 = vmatpush.msrb.mxu2 %v2666_v21 }
  0x36   :  { %2809 = vmatpush.msra.mxu3 %v3131_v28  ;;  %v3277_v53 = vld [vmem:[#allocation2 + $0x20] sm:$0xff]  ;;  %v3296_v57 = vld [vmem:[#allocation2 + $0x32] sm:$0xff]  ;;  %115 = vst.msk [vmem:[#allocation2 + $0xd1] sm:$0xff] %vm46_vm0, %v98_v22  ;;  %797 = vmatpush.msrb.mxu0 %v2609_v34  ;;  %v2638_v49 = vld [vmem:[%s4421_s1 + $0x188] sm:$0xff] }
  0x37   :  { %v3298_v58 = vld [vmem:[#allocation2 + $0x31] sm:$0xff]  ;;  %v3315_v62 = vld [vmem:[#allocation2 + $0x42] sm:$0xff]  ;;  %1102 = vmatpush.msrb.mxu2 %v2665_v30  ;;  %948 = vmatpush.msrb.mxu1 %v2638_v49 }
  0x38   :  { %v3300_v59 = vld [vmem:[#allocation2 + $0x30] sm:$0xff]  ;;  %v3317_v63 = vld [vmem:[#allocation2 + $0x41] sm:$0xff]  ;;  %v2716_v22 = vld [vmem:[%s4421_s1 + $0x278] sm:$0xff] }
  0x39   :  { %v3319_v0 = vld [vmem:[#allocation2 + $0x40] sm:$0xff]  ;;  %v3339_v4 = vld [vmem:[#allocation2 + $0xf0] sm:$0xff]  ;;  %1103 = vmatpush.msrb.mxu2 %v2664_v33 }
  0x3a   :  { %v3341_v5 = vld [vmem:[#allocation2 + $0x52] sm:$0xff]  ;;  %v3370_v13 = vld [vmem:[#allocation2 + $0x100] sm:$0xff] }
  0x3b   :  { %2541 = vmatmul.msk.f32.gmra.mxu3 %vm46_vm0, %v3270_v50  ;;  %2570 = vmatmul.msk.f32.gmra.mxu2 %vm46_vm0, %v3273_v51  ;;  %v3343_v6 = vld [vmem:[#allocation2 + $0x51] sm:$0xff]  ;;  %v3373_v14 = vld [vmem:[#allocation2 + $0x62] sm:$0xff] }
  0x3c   :  { %2529 = vmatmul.msk.f32.gmra.mxu0 %vm46_vm0, %v3275_v52  ;;  %v3345_v7 = vld [vmem:[#allocation2 + $0x50] sm:$0xff]  ;;  %v3375_v15 = vld [vmem:[#allocation2 + $0x61] sm:$0xff]  ;;  %1104 = vmatpush.msrb.mxu2 %v2663_v36 }
  0x3d   :  { %2545 = vmatmul.msk.f32.gmra.mxu1 %vm46_vm0, %v3277_v53  ;;  %v3377_v16 = vld [vmem:[#allocation2 + $0x60] sm:$0xff]  ;;  %v3406_v23 = vld [vmem:[#allocation2 + $0x110] sm:$0xff] }
  0x3e   :  { %v3408_v24 = vld [vmem:[#allocation2 + $0x72] sm:$0xff]  ;;  %v2585_v28 = vld [vmem:[%s4421_s1 + $0xe0] sm:$0xff]  ;;  %1105 = vmatpush.msrb.mxu2 %v2662_v41  ;;  %v2686_v41 = vld [vmem:[%s4421_s1 + $0x208] sm:$0xff] }
  0x3f   :  { %v3410_v25 = vld [vmem:[#allocation2 + $0x71] sm:$0xff]  ;;  %v2637_v55 = vld [vmem:[%s4421_s1 + $0x180] sm:$0xff] }
  0x40   :  { %v3412_v26 = vld [vmem:[#allocation2 + $0x70] sm:$0xff]  ;;  %1106 = vmatpush.msrb.mxu2 %v2661_v48  ;;  %949 = vmatpush.msrb.mxu1 %v2637_v55  ;;  %v3511_v18 = vld [vmem:[#allocation2 + $0x102] sm:$0xff] }
  0x41   :  { %v3477_v60 = vld [vmem:[#allocation2 + $0xf2] sm:$0xff]  ;;  %v3513_v19 = vld [vmem:[#allocation2 + $0xc2] sm:$0xff] }
  0x42   :  { %v3484_v3 = vld [vmem:[#allocation2 + $0xb1] sm:$0xff]  ;;  %1107 = vmatpush.msrb.mxu2 %v2660_v54  ;;  %950 = vmatpush.msrb.mxu1 %v2636_v9  ;;  %v3517_v21 = vld [vmem:[#allocation2 + $0xc0] sm:$0xff] }
  0x43   :  { %2542 = vmatmul.msk.f32.gmra.mxu3 %vm46_vm0, %v3293_v56  ;;  %2571 = vmatmul.msk.f32.gmra.mxu2 %vm46_vm0, %v3296_v57  ;;  %v2635_v12 = vld [vmem:[%s4421_s1 + $0x170] sm:$0xff] }
  0x44   :  { %2530 = vmatmul.msk.f32.gmra.mxu0 %vm46_vm0, %v3298_v58  ;;  %951 = vmatpush.msrb.mxu1 %v2635_v12  ;;  %v3532_v29 = vld [vmem:[#allocation2 + $0xd2] sm:$0xff] }
  0x45   :  { %2546 = vmatmul.msk.f32.gmra.mxu1 %vm46_vm0, %v3300_v59  ;;  %v3534_v30 = vld [vmem:[#allocation2 + $0xd1] sm:$0xff] }
  0x46   :  { %v2715_v33 = vld [vmem:[%s4421_s1 + $0x270] sm:$0xff]  ;;  %v103_v12 = vld [vmem:[%s4422_s0 + $0x78] sm:$0xff] }
  0x47   :  { %v1026_v42 = vld [vmem:[#allocation2 + $0x90] sm:$0xff]  ;;  %120 = vst.msk [vmem:[#allocation2 + $0x121] sm:$0xff] %vm46_vm0, %v103_v12 }
  0x48   :  { %v2711_v54 = vld [vmem:[%s4421_s1 + $0x250] sm:$0xff] }
  0x4b   :  { %2555 = vmatmul.msk.f32.vlgmr.msrb.gmra.mxu3 %vm46_vm0, %v3313_v61  ;;  %2572 = vmatmul.msk.f32.gmra.mxu2 %vm46_vm0, %v3315_v62 }
  0x4c   :  { %2531 = vmatmul.msk.f32.gmra.mxu0 %vm46_vm0, %v3317_v63  ;;  %634 = vmatpush.msrb.mxu3 %v2592_v1  ;;  %v2659_v1 = vld [vmem:[%s4421_s1 + $0x1b0] sm:$0xff] }
  0x4d   :  { %2547 = vmatmul.msk.f32.gmra.mxu1 %vm46_vm0, %v3319_v0  ;;  %1108 = vmatpush.msrb.mxu2 %v2659_v1 }
  0x4e   :  { %635 = vmatpush.msrb.mxu3 %v2591_v2  ;;  %v3482_v2 = vld [vmem:[#allocation2 + $0xb2] sm:$0xff] }
  0x50   :  { %636 = vmatpush.msrb.mxu3 %v2590_v8  ;;  %v3486_v8 = vld [vmem:[#allocation2 + $0xb0] sm:$0xff] }
  0x52   :  { %637 = vmatpush.msrb.mxu3 %v2589_v10  ;;  %v2717_v10 = vld [vmem:[%s4421_s1 + $0x280] sm:$0xff] }
  0x53   :  { %2556 = vmatmul.msk.f32.gmra.mxu3 %vm46_vm0, %v3339_v4  ;;  %2573 = vmatmul.msk.f32.gmra.mxu2 %vm46_vm0, %v3341_v5 }
  0x54   :  { %2532 = vmatmul.msk.f32.gmra.mxu0 %vm46_vm0, %v3343_v6  ;;  %638 = vmatpush.msrb.mxu3 %v2588_v11  ;;  %v2691_v11 = vld [vmem:[%s4421_s1 + $0x230] sm:$0xff] }
  0x55   :  { %2548 = vmatmul.msk.f32.gmra.mxu1 %vm46_vm0, %v3345_v7  ;;  %1410 = vmatpush.msra.mxu0 %v2717_v10  ;;  %v2685_v10 = vld [vmem:[%s4421_s1 + $0x200] sm:$0xff] }
  0x56   :  { %639 = vmatpush.msrb.mxu3 %v2587_v17  ;;  %v2634_v17 = vld [vmem:[%s4421_s1 + $0x168] sm:$0xff] }
  0x57   :  { %952 = vmatpush.msrb.mxu1 %v2634_v17  ;;  %1411 = vmatpush.msra.mxu0 %v2716_v22 }
  0x58   :  { %640 = vmatpush.msrb.mxu3 %v2586_v20  ;;  %v3515_v20 = vld [vmem:[#allocation2 + $0xc1] sm:$0xff] }
  0x59   :  { %1412 = vmatpush.msra.mxu0 %v2715_v33 }
  0x5a   :  { %641 = vmatpush.msrb.mxu3 %v2585_v28  ;;  %v3530_v28 = vld [vmem:[#allocation2 + $0x112] sm:$0xff] }
  0x5b   :  { %2557 = vmatmul.msk.f32.gmra.mxu3 %vm46_vm0, %v3370_v13  ;;  %2574 = vmatmul.msk.f32.gmra.mxu2 %vm46_vm0, %v3373_v14 }
  0x5c   :  { %2533 = vmatmul.msk.f32.gmra.mxu0 %vm46_vm0, %v3375_v15  ;;  %642 = vmatpush.msrb.mxu3 %v2584_v31  ;;  %v3536_v31 = vld [vmem:[#allocation2 + $0xd0] sm:$0xff] }
  0x5d   :  { %2549 = vmatmul.msk.f32.gmra.mxu1 %vm46_vm0, %v3377_v16 }
  0x63   :  { %2558 = vmatmul.msk.f32.gmra.mxu3 %vm46_vm0, %v3406_v23  ;;  %2575 = vmatmul.msk.f32.gmra.mxu2 %vm46_vm0, %v3408_v24 }
  0x64   :  { %2534 = vmatmul.msk.f32.gmra.mxu0 %vm46_vm0, %v3410_v25 }
  0x65   :  { %2550 = vmatmul.msk.f32.gmra.mxu1 %vm46_vm0, %v3412_v26 }
  0x6b   :  { %2580 = vmatmul.msk.f32.vlgmr.msra.gmra.mxu3 %vm46_vm0, %v3449_v37  ;;  %2576 = vmatmul.msk.f32.gmra.mxu2 %vm46_vm0, %v406_v38 }
  0x6c   :  { %2535 = vmatmul.msk.f32.gmra.mxu0 %vm46_vm0, %v154_v39  ;;  %1255 = vmatpush.msra.mxu3 %v2692_v43 }
  0x6d   :  { %2551 = vmatmul.msk.f32.gmra.mxu1 %vm46_vm0, %v129_v40 }
  0x6e   :  { %1256 = vmatpush.msra.mxu3 %v2691_v11 }
  0x70   :  { %1257 = vmatpush.msra.mxu3 %v2690_v32 }
  0x73   :  { %2581 = vmatmul.msk.f32.gmra.mxu3 %vm46_vm0, %v3477_v60  ;;  %2577 = vmatmul.msk.f32.gmra.mxu2 %vm46_vm0, %v3482_v2 }
  0x74   :  { %2536 = vmatmul.msk.f32.gmra.mxu0 %vm46_vm0, %v3484_v3 }
  0x75   :  { %2552 = vmatmul.msk.f32.gmra.mxu1 %vm46_vm0, %v3486_v8 }
  0x7b   :  { %2582 = vmatmul.msk.f32.gmra.mxu3 %vm46_vm0, %v3511_v18  ;;  %2578 = vmatmul.msk.f32.gmra.mxu2 %vm46_vm0, %v3513_v19 }
  0x7c   :  { %2537 = vmatmul.msk.f32.gmra.mxu0 %vm46_vm0, %v3515_v20 }
  0x7d   :  { %2553 = vmatmul.msk.f32.gmra.mxu1 %vm46_vm0, %v3517_v21 }
  0x83   :  { %2583 = vmatmul.msk.f32.gmra.mxu3 %vm46_vm0, %v3530_v28  ;;  %2579 = vmatmul.msk.f32.gmra.mxu2 %vm46_vm0, %v3532_v29 }
  0x84   :  { %2538 = vmatmul.msk.f32.gmra.mxu0 %vm46_vm0, %v3534_v30 }
  0x85   :  { %2554 = vmatmul.msk.f32.gmra.mxu1 %vm46_vm0, %v3536_v31 }
  0x8b   :  { %2593 = vmatmul.msk.f32.vlgmr.msrb.gmra.mxu3 %vm46_vm0, %v3254_v47  ;;  %2668 = vmatmul.msk.f32.vlgmr.msrb.gmra.mxu2 %vm46_vm0, %v3277_v53  ;;  %v2714_v47 = vld [vmem:[%s4421_s1 + $0x268] sm:$0xff] }
  0x8c   :  { %2618 = vmatmul.msk.f32.vlgmr.msrb.gmra.mxu0 %vm46_vm0, %v3252_v46  ;;  %v2689_v46 = vld [vmem:[%s4421_s1 + $0x220] sm:$0xff] }
  0x8d   :  { %2643 = vmatmul.msk.f32.vlgmr.msrb.gmra.mxu1 %vm46_vm0, %v3250_v45  ;;  %1258 = vmatpush.msra.mxu3 %v2689_v46  ;;  %v95_v45 = vld [vmem:[%s4422_s0 + $0x38] sm:$0xff] }
  0x8e   :  { %112 = vst.msk [vmem:[#allocation2 + $0x81] sm:$0xff] %vm46_vm0, %v95_v45  ;;  %1413 = vmatpush.msra.mxu0 %v2714_v47 }
  0x93   :  { %2594 = vmatmul.msk.f32.gmra.mxu3 %vm46_vm0, %v3277_v53  ;;  %2669 = vmatmul.msk.f32.gmra.mxu2 %vm46_vm0, %v3300_v59  ;;  %v2688_v53 = vld [vmem:[%s4421_s1 + $0x218] sm:$0xff]  ;;  %v350_v47 = vpop.f32.mrf.mxu1 }
  0x94   :  { %2619 = vmatmul.msk.f32.gmra.mxu0 %vm46_vm0, %v3275_v52  ;;  %1259 = vmatpush.msra.mxu3 %v2688_v53 }
  0x95   :  { %2644 = vmatmul.msk.f32.gmra.mxu1 %vm46_vm0, %v3273_v51  ;;  %v1025_v39 = vld [vmem:[#allocation2 + $0x80] sm:$0xff] }
  0x96   :  { %v273_v34 = vpop.f32.mrf.mxu3  ;;  %v3640_v43 = vld [vmem:[#allocation2 + $0x81] sm:$0xff] }
  0x97   :  { %v3642_v48 = vld [vmem:[#allocation2 + $0x82] sm:$0xff]  ;;  %v489_v46 = vpop.f32.mrf.mxu2 }
  0x9b   :  { %2595 = vmatmul.msk.f32.gmra.mxu3 %vm46_vm0, %v3300_v59  ;;  %2670 = vmatmul.msk.f32.gmra.mxu2 %vm46_vm0, %v3319_v0  ;;  %v3597_v59 = vpop.f32.mrf.mxu0 }
  0x9c   :  { %2620 = vmatmul.msk.f32.gmra.mxu0 %vm46_vm0, %v3298_v58 }
  0x9d   :  { %2645 = vmatmul.msk.f32.gmra.mxu1 %vm46_vm0, %v3296_v57 }
  0xa3   :  { %2596 = vmatmul.msk.f32.gmra.mxu3 %vm46_vm0, %v3319_v0  ;;  %2671 = vmatmul.msk.f32.gmra.mxu2 %vm46_vm0, %v3345_v7  ;;  %v2713_v0 = vld [vmem:[%s4421_s1 + $0x260] sm:$0xff] }
  0xa4   :  { %2621 = vmatmul.msk.f32.gmra.mxu0 %vm46_vm0, %v3317_v63 }
  0xa5   :  { %2646 = vmatmul.msk.f32.gmra.mxu1 %vm46_vm0, %v3315_v62  ;;  %1414 = vmatpush.msra.mxu0 %v2713_v0 }
  0xab   :  { %2597 = vmatmul.msk.f32.gmra.mxu3 %vm46_vm0, %v3345_v7  ;;  %2672 = vmatmul.msk.f32.gmra.mxu2 %vm46_vm0, %v3377_v16  ;;  %v2687_v7 = vld [vmem:[%s4421_s1 + $0x210] sm:$0xff] }
  0xac   :  { %2622 = vmatmul.msk.f32.gmra.mxu0 %vm46_vm0, %v3343_v6  ;;  %1260 = vmatpush.msra.mxu3 %v2687_v7 }
  0xad   :  { %2647 = vmatmul.msk.f32.gmra.mxu1 %vm46_vm0, %v3341_v5 }
  0xae   :  { %1261 = vmatpush.msra.mxu3 %v2686_v41 }
  0xb0   :  { %1262 = vmatpush.msra.mxu3 %v2685_v10 }
  0xb1   :  { %v3610_v35 = vpop.f32.mrf.mxu0 }
  0xb2   :  { %v353_v7 = vpop.f32.mrf.mxu1 }
  0xb3   :  { %2598 = vmatmul.msk.f32.gmra.mxu3 %vm46_vm0, %v3377_v16  ;;  %2673 = vmatmul.msk.f32.gmra.mxu2 %vm46_vm0, %v3412_v26  ;;  %v2712_v16 = vld [vmem:[%s4421_s1 + $0x258] sm:$0xff] }
  0xb4   :  { %2623 = vmatmul.msk.f32.gmra.mxu0 %vm46_vm0, %v3375_v15 }
  0xb5   :  { %2648 = vmatmul.msk.f32.gmra.mxu1 %vm46_vm0, %v3373_v14  ;;  %1415 = vmatpush.msra.mxu0 %v2712_v16  ;;  %v1033_v16 = vld [vmem:[#allocation2 + $0x120] sm:$0xff] }
  0xb6   :  { %v276_v36 = vpop.f32.mrf.mxu3 }
  0xb7   :  { %1416 = vmatpush.msra.mxu0 %v2711_v54  ;;  %v3746_v54 = vld [vmem:[#allocation2 + $0x121] sm:$0xff] }
  0xb9   :  { %v3623_v38 = vpop.f32.mrf.mxu0 }
  0xba   :  { %v356_v41 = vpop.f32.mrf.mxu1 }
  0xbb   :  { %2599 = vmatmul.msk.f32.gmra.mxu3 %vm46_vm0, %v3412_v26  ;;  %2674 = vmatmul.msk.f32.gmra.mxu2 %vm46_vm0, %v1025_v39 }
  0xbc   :  { %2624 = vmatmul.msk.f32.gmra.mxu0 %vm46_vm0, %v3410_v25 }
  0xbd   :  { %2649 = vmatmul.msk.f32.gmra.mxu1 %vm46_vm0, %v3408_v24 }
  0xbe   :  { %v279_v40 = vpop.f32.mrf.mxu3 }
  0xc1   :  { %v3638_v26 = vpop.f32.mrf.mxu0 }
  0xc3   :  { %2600 = vmatmul.msk.f32.gmra.mxu3 %vm46_vm0, %v1025_v39  ;;  %2675 = vmatmul.msk.f32.gmra.mxu2 %vm46_vm0, %v1026_v42 }
  0xc4   :  { %2625 = vmatmul.msk.f32.gmra.mxu0 %vm46_vm0, %v3640_v43 }
  0xc5   :  { %2650 = vmatmul.msk.f32.gmra.mxu1 %vm46_vm0, %v3642_v48 }
  0xc6   :  { %v282_v49 = vpop.f32.mrf.mxu3 }
  0xc9   :  { %v3653_v55 = vpop.f32.mrf.mxu0 }
  0xcb   :  { %2601 = vmatmul.msk.f32.gmra.mxu3 %vm46_vm0, %v3486_v8  ;;  %2676 = vmatmul.msk.f32.gmra.mxu2 %vm46_vm0, %v3517_v21  ;;  %v2710_v8 = vld [vmem:[%s4421_s1 + $0x248] sm:$0xff] }
  0xcc   :  { %2626 = vmatmul.msk.f32.gmra.mxu0 %vm46_vm0, %v3484_v3 }
  0xcd   :  { %2651 = vmatmul.msk.f32.gmra.mxu1 %vm46_vm0, %v3482_v2  ;;  %1417 = vmatpush.msra.mxu0 %v2710_v8 }
  0xce   :  { %v386_v1 = vpop.f32.mrf.mxu3 }
  0xcf   :  { %v387_v9 = vadd.f32 %v386_v1, %v273_v34  ;;  %v492_v34 = vpop.f32.mrf.mxu2  ;;  %v3748_v1 = vld [vmem:[#allocation2 + $0x122] sm:$0xff] }
  0xd1   :  { %v3666_v11 = vpop.f32.mrf.mxu0 }
  0xd3   :  { %2602 = vmatmul.msk.f32.gmra.mxu3 %vm46_vm0, %v3517_v21  ;;  %2677 = vmatmul.msk.f32.gmra.mxu2 %vm46_vm0, %v3536_v31  ;;  %v2684_v21 = vld [vmem:[%s4421_s1 + $0x1f8] sm:$0xff] }
  0xd4   :  { %2627 = vmatmul.msk.f32.gmra.mxu0 %vm46_vm0, %v3515_v20  ;;  %1263 = vmatpush.msra.mxu3 %v2684_v21 }
  0xd5   :  { %2652 = vmatmul.msk.f32.gmra.mxu1 %vm46_vm0, %v3513_v19 }
  0xd6   :  { %v389_v2 = vpop.f32.mrf.mxu3 }
  0xd7   :  { %v390_v3 = vadd.f32 %v389_v2, %v276_v36  ;;  %v351_v2 = vadd.f32 %v350_v47, %v3597_v59 }
  0xd9   :  { %v3682_v17 = vpop.f32.mrf.mxu0  ;;  %v537_v8 = vadd.f32 %v489_v46, %v351_v2 }
  0xdb   :  { %2603 = vmatmul.msk.f32.gmra.mxu3 %vm46_vm0, %v3536_v31  ;;  %2678 = vmatmul.msk.f32.gmra.mxu2 %vm46_vm0, %v3313_v61  ;;  %v2709_v31 = vld [vmem:[%s4421_s1 + $0x240] sm:$0xff] }
  0xdc   :  { %2628 = vmatmul.msk.f32.gmra.mxu0 %vm46_vm0, %v3534_v30 }
  0xdd   :  { %2653 = vmatmul.msk.f32.gmra.mxu1 %vm46_vm0, %v3532_v29  ;;  %1418 = vmatpush.msra.mxu0 %v2709_v31 }
  0xde   :  { %v392_v22 = vpop.f32.mrf.mxu3 }
  0xdf   :  { %v393_v32 = vadd.f32 %v392_v22, %v279_v40  ;;  %v495_v40 = vpop.f32.mrf.mxu2  ;;  %v354_v22 = vadd.f32 %v353_v7, %v3610_v35 }
  0xe1   :  { %v3696_v33 = vpop.f32.mrf.mxu0  ;;  %v538_v59 = vadd.f32 %v492_v34, %v354_v22 }
  0xe3   :  { %2604 = vmatmul.msk.f32.gmra.mxu3 %vm46_vm0, %v3313_v61  ;;  %2679 = vmatmul.msk.f32.gmra.mxu2 %vm46_vm0, %v3339_v4 }
  0xe4   :  { %2629 = vmatmul.msk.f32.gmra.mxu0 %vm46_vm0, %v3124_v27 }
  0xe5   :  { %2654 = vmatmul.msk.f32.gmra.mxu1 %vm46_vm0, %v3449_v37 }
  0xe6   :  { %v395_v45 = vpop.f32.mrf.mxu3 }
  0xe7   :  { %v396_v53 = vadd.f32 %v395_v45, %v282_v49  ;;  %v1034_v49 = vld [vmem:[#allocation2 + $0x130] sm:$0xff] }
  0xe9   :  { %v3709_v0 = vpop.f32.mrf.mxu0 }
  0xeb   :  { %2605 = vmatmul.msk.f32.gmra.mxu3 %vm46_vm0, %v3339_v4  ;;  %2680 = vmatmul.msk.f32.gmra.mxu2 %vm46_vm0, %v3370_v13 }
  0xec   :  { %2630 = vmatmul.msk.f32.gmra.mxu0 %vm46_vm0, %v3244_v44 }
  0xed   :  { %2655 = vmatmul.msk.f32.gmra.mxu1 %vm46_vm0, %v3477_v60 }
  0xee   :  { %v525_v27 = vpop.f32.mrf.mxu3 }
  0xef   :  { %v3719_v61 = vadd.f32 %v525_v27, %v387_v9 }
  0xf1   :  { %v3721_v36 = vpop.f32.mrf.mxu0 }
  0xf3   :  { %2606 = vmatmul.msk.f32.gmra.mxu3 %vm46_vm0, %v3370_v13  ;;  %2681 = vmatmul.msk.f32.gmra.mxu2 %vm46_vm0, %v3406_v23 }
  0xf4   :  { %2631 = vmatmul.msk.f32.gmra.mxu0 %vm46_vm0, %v3270_v50 }
  0xf5   :  { %2656 = vmatmul.msk.f32.gmra.mxu1 %vm46_vm0, %v3511_v18 }
  0xf6   :  { %v528_v44 = vpop.f32.mrf.mxu3 }
  0xf7   :  { %v3731_v4 = vadd.f32 %v528_v44, %v390_v3 }
  0xf9   :  { %v3733_v39 = vpop.f32.mrf.mxu0 }
  0xfb   :  { %2607 = vmatmul.msk.f32.gmra.mxu3 %vm46_vm0, %v3406_v23  ;;  %2682 = vmatmul.msk.f32.gmra.mxu2 %vm46_vm0, %v1033_v16  ;;  %v498_v23 = vpop.f32.mrf.mxu2 }
  0xfc   :  { %2632 = vmatmul.msk.f32.gmra.mxu0 %vm46_vm0, %v3293_v56  ;;  %v359_v56 = vpop.f32.mrf.mxu1 }
  0xfd   :  { %2657 = vmatmul.msk.f32.gmra.mxu1 %vm46_vm0, %v3530_v28 }
  0xfe   :  { %v531_v50 = vpop.f32.mrf.mxu3 }
  0xff   :  { %v3742_v13 = vadd.f32 %v531_v50, %v393_v32 }
 0x101   :  { %v3744_v42 = vpop.f32.mrf.mxu0 }
 0x103   :  { %2608 = vmatmul.msk.f32.gmra.mxu3 %vm46_vm0, %v1033_v16  ;;  %2683 = vmatmul.msk.f32.gmra.mxu2 %vm46_vm0, %v1034_v49  ;;  %v501_v35 = vpop.f32.mrf.mxu2 }
 0x104   :  { %2633 = vmatmul.msk.f32.gmra.mxu0 %vm46_vm0, %v3746_v54  ;;  %v362_v47 = vpop.f32.mrf.mxu1 }
 0x105   :  { %2658 = vmatmul.msk.f32.gmra.mxu1 %vm46_vm0, %v3748_v1 }
 0x106   :  { %v534_v9 = vpop.f32.mrf.mxu3 }
 0x107   :  { %v3756_v10 = vadd.f32 %v534_v9, %v396_v53 }
 0x109   :  { %v799_v3 = vpop.f32.mrf.mxu0 }
 0x10b   :  { %2693 = vmatmul.msk.f32.vlgmr.msra.gmra.mxu3 %vm46_vm0, %v3275_v52 }
 0x10c   :  { %2718 = vmatmul.msk.f32.vlgmr.msra.gmra.mxu0 %vm46_vm0, %v3273_v51  ;;  %v357_v51 = vadd.f32 %v356_v41, %v3623_v38  ;;  %v365_v16 = vpop.f32.mrf.mxu1  ;;  %v504_v38 = vpop.f32.mrf.mxu2 }
 0x10e   :  { %v644_v12 = vpop.f32.mrf.mxu3 }
 0x10f   :  { %v692_v21 = vadd.f32 %v644_v12, %v537_v8 }
 0x111   :  { %v3764_v32 = vadd.f32 %v799_v3, %v692_v21  ;;  %v802_v31 = vpop.f32.mrf.mxu0 }
 0x113   :  { %2694 = vmatmul.msk.f32.gmra.mxu3 %vm46_vm0, %v3298_v58  ;;  %v539_v58 = vadd.f32 %v495_v40, %v357_v51 }
 0x114   :  { %2719 = vmatmul.msk.f32.gmra.mxu0 %vm46_vm0, %v3296_v57  ;;  %v360_v57 = vadd.f32 %v359_v56, %v3638_v26  ;;  %v368_v26 = vpop.f32.mrf.mxu1 }
 0x116   :  { %v647_v45 = vpop.f32.mrf.mxu3 }
 0x117   :  { %v693_v52 = vadd.f32 %v647_v45, %v538_v59 }
 0x119   :  { %v3771_v46 = vadd.f32 %v802_v31, %v693_v52  ;;  %v805_v53 = vpop.f32.mrf.mxu0  ;;  %v1181_v52 = vld [vmem:[#allocation2 + $0x91] sm:$0xff] }
 0x11b   :  { %2695 = vmatmul.msk.f32.gmra.mxu3 %vm46_vm0, %v3317_v63  ;;  %v540_v63 = vadd.f32 %v498_v23, %v360_v57  ;;  %v366_v23 = vadd.f32 %v365_v16, %v3666_v11  ;;  %v369_v11 = vadd.f32 %v368_v26, %v3682_v17 }
 0x11c   :  { %2720 = vmatmul.msk.f32.gmra.mxu0 %vm46_vm0, %v3315_v62  ;;  %v363_v62 = vadd.f32 %v362_v47, %v3653_v55  ;;  %v371_v55 = vpop.f32.mrf.mxu1 }
 0x11d   :  { %v372_v47 = vadd.f32 %v371_v55, %v3696_v33 }
 0x11e   :  { %v650_v27 = vpop.f32.mrf.mxu3 }
 0x11f   :  { %v694_v7 = vadd.f32 %v650_v27, %v539_v58 }
 0x121   :  { %v3778_v34 = vadd.f32 %v805_v53, %v694_v7  ;;  %v808_v44 = vpop.f32.mrf.mxu0  ;;  %v1336_v53 = vld [vmem:[#allocation2 + $0x92] sm:$0xff] }
 0x123   :  { %2696 = vmatmul.msk.f32.gmra.mxu3 %vm46_vm0, %v3343_v6  ;;  %v541_v6 = vadd.f32 %v501_v35, %v363_v62 }
 0x124   :  { %2721 = vmatmul.msk.f32.gmra.mxu0 %vm46_vm0, %v3341_v5  ;;  %v507_v5 = vpop.f32.mrf.mxu2  ;;  %v374_v45 = vpop.f32.mrf.mxu1 }
 0x126   :  { %v653_v41 = vpop.f32.mrf.mxu3 }
 0x127   :  { %v695_v50 = vadd.f32 %v653_v41, %v540_v63 }
 0x129   :  { %v3785_v40 = vadd.f32 %v808_v44, %v695_v50  ;;  %v811_v49 = vpop.f32.mrf.mxu0 }
 0x12b   :  { %2697 = vmatmul.msk.f32.gmra.mxu3 %vm46_vm0, %v3375_v15  ;;  %v542_v15 = vadd.f32 %v504_v38, %v366_v23 }
 0x12c   :  { %2722 = vmatmul.msk.f32.gmra.mxu0 %vm46_vm0, %v3373_v14  ;;  %v1635_v14 = vld [vmem:[%s4424_s7 + $0x18] sm:$0xff]  ;;  %v510_v31 = vpop.f32.mrf.mxu2  ;;  %v377_v44 = vpop.f32.mrf.mxu1 }
 0x12d   :  { %1700 = vmatpush.msra.mxu1 %v1635_v14  ;;  %v378_v41 = vadd.f32 %v377_v44, %v3721_v36  ;;  %v1184_v36 = vld [vmem:[#allocation2 + $0xe1] sm:$0xff] }
 0x12e   :  { %v656_v56 = vpop.f32.mrf.mxu3 }
 0x12f   :  { %v696_v9 = vadd.f32 %v656_v56, %v541_v6 }
 0x131   :  { %v3792_v2 = vadd.f32 %v811_v49, %v696_v9  ;;  %v814_v3 = vpop.f32.mrf.mxu0 }
 0x133   :  { %2698 = vmatmul.msk.f32.gmra.mxu3 %vm46_vm0, %v3410_v25 }
 0x134   :  { %2723 = vmatmul.msk.f32.gmra.mxu0 %vm46_vm0, %v3408_v24  ;;  %v543_v24 = vadd.f32 %v507_v5, %v369_v11  ;;  %v513_v35 = vpop.f32.mrf.mxu2 }
 0x136   :  { %v659_v8 = vpop.f32.mrf.mxu3 }
 0x137   :  { %v697_v12 = vadd.f32 %v659_v8, %v542_v15  ;;  %v1185_v15 = vld [vmem:[#allocation2 + $0xf1] sm:$0xff] }
 0x139   :  { %v3802_v21 = vadd.f32 %v814_v3, %v697_v12  ;;  %v817_v22 = vpop.f32.mrf.mxu0 }
 0x13b   :  { %2699 = vmatmul.msk.f32.gmra.mxu3 %vm46_vm0, %v3640_v43  ;;  %v544_v43 = vadd.f32 %v510_v31, %v372_v47  ;;  %v1186_v31 = vld [vmem:[#allocation2 + $0x101] sm:$0xff] }
 0x13c   :  { %2724 = vmatmul.msk.f32.gmra.mxu0 %vm46_vm0, %v3642_v48  ;;  %v375_v48 = vadd.f32 %v374_v45, %v3709_v0  ;;  %v516_v16 = vpop.f32.mrf.mxu2  ;;  %v380_v0 = vpop.f32.mrf.mxu1 }
 0x13d   :  { %v381_v56 = vadd.f32 %v380_v0, %v3733_v39 }
 0x13e   :  { %v662_v25 = vpop.f32.mrf.mxu3  ;;  %v545_v33 = vadd.f32 %v513_v35, %v375_v48  ;;  %v1632_v35 = vld [vmem:[%s4424_s7] sm:$0xff] }
 0x13f   :  { %v698_v59 = vadd.f32 %v662_v25, %v543_v24 }
 0x141   :  { %v3809_v51 = vadd.f32 %v817_v22, %v698_v59  ;;  %v820_v17 = vpop.f32.mrf.mxu0 }
 0x143   :  { %2700 = vmatmul.msk.f32.gmra.mxu3 %vm46_vm0, %v1181_v52  ;;  %v1187_v52 = vld [vmem:[#allocation2 + $0x111] sm:$0xff] }
 0x144   :  { %2725 = vmatmul.msk.f32.gmra.mxu0 %vm46_vm0, %v1336_v53  ;;  %v519_v6 = vpop.f32.mrf.mxu2 }
 0x146   :  { %v665_v58 = vpop.f32.mrf.mxu3 }
 0x147   :  { %v699_v27 = vadd.f32 %v665_v58, %v544_v43 }
 0x149   :  { %v3814_v7 = vadd.f32 %v820_v17, %v699_v27  ;;  %v823_v57 = vpop.f32.mrf.mxu0  ;;  %v1633_v17 = vld [vmem:[%s4424_s7 + $0x8] sm:$0xff] }
 0x14b   :  { %2701 = vmatmul.msk.f32.gmra.mxu3 %vm46_vm0, %v3515_v20  ;;  %v546_v20 = vadd.f32 %v516_v16, %v378_v41 }
 0x14c   :  { %2726 = vmatmul.msk.f32.gmra.mxu0 %vm46_vm0, %v3513_v19  ;;  %v1634_v19 = vld [vmem:[%s4424_s7 + $0x10] sm:$0xff]  ;;  %v522_v12 = vpop.f32.mrf.mxu2 }
 0x14d   :  { %1701 = vmatpush.msra.mxu1 %v1634_v19 }
 0x14e   :  { %v668_v63 = vpop.f32.mrf.mxu3 }
 0x14f   :  { %v700_v38 = vadd.f32 %v668_v63, %v545_v33  ;;  %1702 = vmatpush.msra.mxu1 %v1633_v17 }
 0x151   :  { %v3821_v50 = vadd.f32 %v823_v57, %v700_v38  ;;  %v826_v62 = vpop.f32.mrf.mxu0  ;;  %1703 = vmatpush.msra.mxu1 %v1632_v35  ;;  %v1344_v38 = vld [vmem:[#allocation2 + $0x132] sm:$0xff] }
 0x153   :  { %2702 = vmatmul.msk.f32.gmra.mxu3 %vm46_vm0, %v3534_v30  ;;  %v383_v30 = vpop.f32.mrf.mxu1 }
 0x154   :  { %2727 = vmatmul.msk.f32.gmra.mxu0 %vm46_vm0, %v3532_v29  ;;  %v547_v29 = vadd.f32 %v519_v6, %v381_v56  ;;  %v384_v14 = vadd.f32 %v383_v30, %v3744_v42  ;;  %v1110_v42 = vpop.f32.mrf.mxu2 }
 0x156   :  { %v671_v49 = vpop.f32.mrf.mxu3  ;;  %v548_v39 = vadd.f32 %v522_v12, %v384_v14 }
 0x157   :  { %v701_v26 = vadd.f32 %v671_v49, %v546_v20 }
 0x159   :  { %v3831_v9 = vadd.f32 %v826_v62, %v701_v26  ;;  %v829_v5 = vpop.f32.mrf.mxu0  ;;  %v3878_v26 = vld [vmem:[%s4423_s2] ss:$0 sm:$0xff] }
 0x15b   :  { %2703 = vmatmul.msk.f32.gmra.mxu3 %vm46_vm0, %v1184_v36 }
 0x15c   :  { %2728 = vmatmul.msk.f32.gmra.mxu0 %vm46_vm0, %v3449_v37  ;;  %v954_v37 = vpop.f32.mrf.mxu1 }
 0x15d   :  { %v1002_v62 = vadd.f32 %v954_v37, %v3764_v32 }
 0x15e   :  { %v674_v23 = vpop.f32.mrf.mxu3 }
 0x15f   :  { %v702_v3 = vadd.f32 %v674_v23, %v547_v29  ;;  %v1158_v20 = vadd.f32 %v1110_v42, %v1002_v62 }
 0x161   :  { %v3837_v55 = vadd.f32 %v829_v5, %v702_v3  ;;  %v832_v8 = vpop.f32.mrf.mxu0 }
 0x163   :  { %2704 = vmatmul.msk.f32.gmra.mxu3 %vm46_vm0, %v1185_v15 }
 0x164   :  { %2729 = vmatmul.msk.f32.gmra.mxu0 %vm46_vm0, %v3477_v60  ;;  %v957_v53 = vpop.f32.mrf.mxu1 }
 0x165   :  { %v1003_v36 = vadd.f32 %v957_v53, %v3771_v46 }
 0x166   :  { %v677_v11 = vpop.f32.mrf.mxu3 }
 0x167   :  { %v703_v22 = vadd.f32 %v677_v11, %v548_v39 }
 0x169   :  { %v3842_v24 = vadd.f32 %v832_v8, %v703_v22  ;;  %v835_v25 = vpop.f32.mrf.mxu0 }
 0x16b   :  { %2705 = vmatmul.msk.f32.gmra.mxu3 %vm46_vm0, %v1186_v31 }
 0x16c   :  { %2730 = vmatmul.msk.f32.gmra.mxu0 %vm46_vm0, %v3511_v18  ;;  %v1113_v18 = vpop.f32.mrf.mxu2  ;;  %v960_v48 = vpop.f32.mrf.mxu1 }
 0x16d   :  { %v1159_v29 = vadd.f32 %v1113_v18, %v1003_v36  ;;  %v1004_v3 = vadd.f32 %v960_v48, %v3778_v34 }
 0x16e   :  { %v680_v59 = vpop.f32.mrf.mxu3 }
 0x16f   :  { %v704_v45 = vadd.f32 %v680_v59, %v3719_v61 }
 0x171   :  { %v3848_v47 = vadd.f32 %v835_v25, %v704_v45  ;;  %v838_v60 = vpop.f32.mrf.mxu0 }
 0x173   :  { %2706 = vmatmul.msk.f32.gmra.mxu3 %vm46_vm0, %v1187_v52 }
 0x174   :  { %2731 = vmatmul.msk.f32.gmra.mxu0 %vm46_vm0, %v3530_v28  ;;  %v1116_v33 = vpop.f32.mrf.mxu2  ;;  %v1189_v28 = vld [vmem:[#allocation2 + $0x131] sm:$0xff] }
 0x175   :  { %v1160_v12 = vadd.f32 %v1116_v33, %v1004_v3 }
 0x176   :  { %v683_v61 = vpop.f32.mrf.mxu3 }
 0x177   :  { %v705_v43 = vadd.f32 %v683_v61, %v3731_v4  ;;  %v963_v4 = vpop.f32.mrf.mxu1 }
 0x178   :  { %v1005_v37 = vadd.f32 %v963_v4, %v3785_v40 }
 0x179   :  { %v3860_v58 = vadd.f32 %v838_v60, %v705_v43  ;;  %v841_v27 = vpop.f32.mrf.mxu0 }
 0x17b   :  { %2707 = vmatmul.msk.f32.gmra.mxu3 %vm46_vm0, %v3746_v54 }
 0x17c   :  { %2732 = vmatmul.msk.f32.gmra.mxu0 %vm46_vm0, %v3748_v1 }
 0x17e   :  { %v686_v57 = vpop.f32.mrf.mxu3 }
 0x17f   :  { %v706_v44 = vadd.f32 %v686_v57, %v3742_v13  ;;  %v1119_v13 = vpop.f32.mrf.mxu2  ;;  %v966_v6 = vpop.f32.mrf.mxu1 }
 0x180   :  { %v1161_v59 = vadd.f32 %v1119_v13, %v1005_v37  ;;  %v1006_v17 = vadd.f32 %v966_v6, %v3792_v2 }
 0x181   :  { %v3867_v16 = vadd.f32 %v841_v27, %v706_v44  ;;  %v844_v63 = vpop.f32.mrf.mxu0 }
 0x183   :  { %2708 = vmatmul.msk.f32.gmra.mxu3 %vm46_vm0, %v1189_v28 }
 0x184   :  { %2733 = vmatmul.msk.f32.gmra.mxu0 %vm46_vm0, %v1344_v38 }
 0x186   :  { %v689_v41 = vpop.f32.mrf.mxu3 }
 0x187   :  { %v707_v54 = vadd.f32 %v689_v41, %v3756_v10  ;;  %v1122_v32 = vpop.f32.mrf.mxu2  ;;  %v969_v8 = vpop.f32.mrf.mxu1 }
 0x188   :  { %v1162_v40 = vadd.f32 %v1122_v32, %v1006_v17  ;;  %v1007_v48 = vadd.f32 %v969_v8, %v3802_v21 }
 0x189   :  { %v3873_v1 = vadd.f32 %v844_v63, %v707_v54  ;;  %v1420_v0 = vpop.f32.mrf.mxu0 }
 0x18e   :  { %v1265_v19 = vpop.f32.mrf.mxu3 }
 0x18f   :  { %v1313_v49 = vadd.f32 %v1265_v19, %v1158_v20  ;;  %v1125_v39 = vpop.f32.mrf.mxu2  ;;  %v972_v34 = vpop.f32.mrf.mxu1 }
 0x190   :  { %v1163_v2 = vadd.f32 %v1125_v39, %v1007_v48  ;;  %v1008_v41 = vadd.f32 %v972_v34, %v3809_v51 }
 0x191   :  { %v1468_v56 = vadd.f32 %v1420_v0, %v1313_v49  ;;  %v1423_v5 = vpop.f32.mrf.mxu0 }
 0x193   :  { %v3882_v10 = vadd.f32 %v3878_v26, %v1468_v56 }
 0x195   :  { %2735 = vmatmul.msk.f32.vlgmr.msra.gmra.mxu1 %vm1504_vm2, %v3882_v10 }
 0x196   :  { %v1268_v30 = vpop.f32.mrf.mxu3 }
 0x197   :  { %v1314_v23 = vadd.f32 %v1268_v30, %v1159_v29  ;;  %v1128_v60 = vpop.f32.mrf.mxu2  ;;  %v975_v61 = vpop.f32.mrf.mxu1 }
 0x198   :  { %v1164_v13 = vadd.f32 %v1128_v60, %v1008_v41  ;;  %v1009_v49 = vadd.f32 %v975_v61, %v3814_v7 }
 0x199   :  { %v1469_v15 = vadd.f32 %v1423_v5, %v1314_v23  ;;  %v1426_v14 = vpop.f32.mrf.mxu0 }
 0x19b   :  { %v3888_v46 = vadd.f32 %v3878_v26, %v1469_v15 }
 0x19d   :  { %2736 = vmatmul.msk.f32.gmra.mxu1 %vm1504_vm2, %v3888_v46 }
 0x19e   :  { %v1271_v11 = vpop.f32.mrf.mxu3 }
 0x19f   :  { %v1315_v22 = vadd.f32 %v1271_v11, %v1160_v12  ;;  %v1131_v33 = vpop.f32.mrf.mxu2  ;;  %v978_v4 = vpop.f32.mrf.mxu1 }
 0x1a0   :  { %v1165_v51 = vadd.f32 %v1131_v33, %v1009_v49  ;;  %v1010_v23 = vadd.f32 %v978_v4, %v3821_v50 }
 0x1a1   :  { %v1470_v31 = vadd.f32 %v1426_v14, %v1315_v22  ;;  %v1429_v25 = vpop.f32.mrf.mxu0 }
 0x1a3   :  { %v3894_v42 = vadd.f32 %v3878_v26, %v1470_v31 }
 0x1a5   :  { %2737 = vmatmul.msk.f32.gmra.mxu1 %vm1504_vm2, %v3894_v42 }
 0x1a6   :  { %v1274_v45 = vpop.f32.mrf.mxu3 }
 0x1a7   :  { %v1316_v52 = vadd.f32 %v1274_v45, %v1161_v59  ;;  %v1134_v21 = vpop.f32.mrf.mxu2  ;;  %v981_v56 = vpop.f32.mrf.mxu1 }
 0x1a8   :  { %v1166_v8 = vadd.f32 %v1134_v21, %v1010_v23  ;;  %v1011_v22 = vadd.f32 %v981_v56, %v3831_v9  ;;  %v1508_v56 = vsel %vm1504_vm2, %v3894_v42, 0.0 }
 0x1a9   :  { %v1471_v53 = vadd.f32 %v1429_v25, %v1316_v52  ;;  %v1432_v35 = vpop.f32.mrf.mxu0 }
 0x1ab   :  { %v3900_v18 = vadd.f32 %v3878_v26, %v1471_v53 }
 0x1ad   :  { %2738 = vmatmul.msk.f32.gmra.mxu1 %vm1504_vm2, %v3900_v18  ;;  %v1510_v23 = vsel %vm1504_vm2, %v3900_v18, 0.0 }
 0x1ae   :  { %v1277_v43 = vpop.f32.mrf.mxu3 }
 0x1af   :  { %v1317_v27 = vadd.f32 %v1277_v43, %v1162_v40  ;;  %v1137_v32 = vpop.f32.mrf.mxu2  ;;  %v984_v7 = vpop.f32.mrf.mxu1 }
 0x1b0   :  { %v1167_v50 = vadd.f32 %v1137_v32, %v1011_v22  ;;  %v1012_v52 = vadd.f32 %v984_v7, %v3837_v55 }
 0x1b1   :  { %v1472_v57 = vadd.f32 %v1432_v35, %v1317_v27  ;;  %v1435_v44 = vpop.f32.mrf.mxu0 }
 0x1b3   :  { %v3906_v28 = vadd.f32 %v3878_v26, %v1472_v57 }
 0x1b5   :  { %2739 = vmatmul.msk.f32.gmra.mxu1 %vm1504_vm2, %v3906_v28 }
 0x1b6   :  { %v1280_v63 = vpop.f32.mrf.mxu3 }
 0x1b7   :  { %v1318_v38 = vadd.f32 %v1280_v63, %v1163_v2  ;;  %v1140_v11 = vpop.f32.mrf.mxu2  ;;  %v987_v34 = vpop.f32.mrf.mxu1 }
 0x1b8   :  { %v1168_v9 = vadd.f32 %v1140_v11, %v1012_v52  ;;  %v1013_v27 = vadd.f32 %v987_v34, %v3842_v24  ;;  %v18_v24 = vstv %s4426_s8 }
 0x1b9   :  { %v1473_v54 = vadd.f32 %v1435_v44, %v1318_v38  ;;  %v1438_v62 = vpop.f32.mrf.mxu0  ;;  %19 = vst [vmem:[#allocation3] sm:$0x1] %v18_v24 }
 0x1bb   :  { %v3912_v0 = vadd.f32 %v3878_v26, %v1473_v54 }
 0x1bd   :  { %2740 = vmatmul.msk.f32.gmra.mxu1 %vm1504_vm2, %v3912_v0  ;;  %v1514_v11 = vsel %vm1504_vm2, %v3912_v0, 0.0 }
 0x1be   :  { %v1283_v20 = vpop.f32.mrf.mxu3 }
 0x1bf   :  { %v1319_v19 = vadd.f32 %v1283_v20, %v1164_v13  ;;  %v1143_v53 = vpop.f32.mrf.mxu2  ;;  %v990_v43 = vpop.f32.mrf.mxu1 }
 0x1c0   :  { %v1169_v33 = vadd.f32 %v1143_v53, %v1013_v27  ;;  %v1014_v38 = vadd.f32 %v990_v43, %v3848_v47  ;;  %v1506_v47 = vsel %vm1504_vm2, %v3888_v46, 0.0  ;;  %v2905_v43 = vmov 64.0  }
 0x1c1   :  { %v1474_v6 = vadd.f32 %v1438_v62, %v1319_v19  ;;  %v1441_v36 = vpop.f32.mrf.mxu0  ;;  %2830 = vrcp.f32 %v2905_v43 }
 0x1c3   :  { %v3918_v5 = vadd.f32 %v3878_v26, %v1474_v6 }
 0x1c5   :  { %2741 = vmatmul.msk.f32.gmra.mxu1 %vm1504_vm2, %v3918_v5 }
 0x1c6   :  { %v1286_v29 = vpop.f32.mrf.mxu3 }
 0x1c7   :  { %v1320_v30 = vadd.f32 %v1286_v29, %v1165_v51  ;;  %v1146_v55 = vpop.f32.mrf.mxu2  ;;  %v993_v54 = vpop.f32.mrf.mxu1 }
 0x1c8   :  { %v1170_v21 = vadd.f32 %v1146_v55, %v1014_v38  ;;  %v1015_v49 = vadd.f32 %v993_v54, %v3860_v58  ;;  %v1512_v58 = vsel %vm1504_vm2, %v3906_v28, 0.0  ;;  %v2831_v24 = vpop.eup %2830 }
 0x1c9   :  { %v1475_v3 = vadd.f32 %v1441_v36, %v1320_v30  ;;  %v1444_v15 = vpop.f32.mrf.mxu0  ;;  %v1505_v36 = vsel %vm1504_vm2, %v3882_v10, 0.0  ;;  %vm1552_vm3 = vweird.f32 %v2831_v24 }
 0x1ca   :  { %v1507_v32 = vadd.f32 %v1506_v47, %v1505_v36  ;;  %v1548_v36 = vmul.f32 64.0, %v2831_v24 }
 0x1cb   :  { %v3924_v14 = vadd.f32 %v3878_v26, %v1475_v3 }
 0x1cd   :  { %2742 = vmatmul.msk.f32.gmra.mxu1 %vm1504_vm2, %v3924_v14 }
 0x1ce   :  { %v1289_v12 = vpop.f32.mrf.mxu3 }
 0x1cf   :  { %v1321_v39 = vadd.f32 %v1289_v12, %v1166_v8  ;;  %v1149_v13 = vpop.f32.mrf.mxu2  ;;  %v996_v30 = vpop.f32.mrf.mxu1 }
 0x1d0   :  { %v1171_v3 = vadd.f32 %v1149_v13, %v1015_v49  ;;  %v1016_v22 = vadd.f32 %v996_v30, %v3867_v16 }
 0x1d1   :  { %v1476_v37 = vadd.f32 %v1444_v15, %v1321_v39  ;;  %v1447_v31 = vpop.f32.mrf.mxu0  ;;  %v1509_v15 = vadd.f32 %v1508_v56, %v1507_v32 }
 0x1d3   :  { %v3930_v25 = vadd.f32 %v3878_v26, %v1476_v37  ;;  %v1511_v8 = vadd.f32 %v1510_v23, %v1509_v15  ;;  %v1549_v15 = vsub.f32 1.0, %v1548_v36 }
 0x1d5   :  { %2743 = vmatmul.msk.f32.gmra.mxu1 %vm1504_vm2, %v3930_v25  ;;  %v1513_v37 = vadd.f32 %v1512_v58, %v1511_v8  ;;  %v4010_v8 = vld [vmem:[#allocation3] ss:$0 sm:$0xff] }
 0x1d6   :  { %v1292_v59 = vpop.f32.mrf.mxu3 }
 0x1d7   :  { %v1322_v45 = vadd.f32 %v1292_v59, %v1167_v50  ;;  %v1152_v39 = vpop.f32.mrf.mxu2  ;;  %v1516_v50 = vsel %vm1504_vm2, %v3918_v5, 0.0  ;;  %v1515_v34 = vadd.f32 %v1514_v11, %v1513_v37  ;;  %v999_v53 = vpop.f32.mrf.mxu1  ;;  %v1550_v11 = vmul.f32 %v2831_v24, %v1549_v15 }
 0x1d8   :  { %v1017_v27 = vadd.f32 %v999_v53, %v3873_v1 }
 0x1d9   :  { %v1477_v60 = vadd.f32 %v1447_v31, %v1322_v45  ;;  %v1450_v17 = vpop.f32.mrf.mxu0  ;;  %v1518_v45 = vsel %vm1504_vm2, %v3924_v14, 0.0 }
 0x1db   :  { %v3936_v35 = vadd.f32 %v3878_v26, %v1477_v60  ;;  %v1172_v60 = vadd.f32 %v1152_v39, %v1016_v22  ;;  %v2906_v22 = vmov 0  }
 0x1dc   :  { %2817 = vset.pattern.permute.xlu2 %v2906_v22  ;;  %2818 = vset.pattern.permute.xlu0 %v2906_v22 }
 0x1dd   :  { %2744 = vmatmul.msk.f32.gmra.mxu1 %vm1504_vm2, %v3936_v35  ;;  %2815 = vset.pattern.permute.xlu1 %v2906_v22 }
 0x1de   :  { %v1295_v40 = vpop.f32.mrf.mxu3 }
 0x1df   :  { %v1323_v61 = vadd.f32 %v1295_v40, %v1168_v9  ;;  %v1527_v40 = vsel %vm1504_vm2, %v3936_v35, 0.0 }
 0x1e1   :  { %v1478_v48 = vadd.f32 %v1450_v17, %v1323_v61  ;;  %v1453_v57 = vpop.f32.mrf.mxu0  ;;  %v1517_v17 = vadd.f32 %v1516_v50, %v1515_v34 }
 0x1e3   :  { %v3942_v44 = vadd.f32 %v3878_v26, %v1478_v48  ;;  %v1519_v9 = vadd.f32 %v1518_v45, %v1517_v17  ;;  %v1526_v48 = vsel %vm1504_vm2, %v3930_v25, 0.0  ;;  %v1551_v45 = vadd.f32 %v2831_v24, %v1550_v11 }
 0x1e5   :  { %2745 = vmatmul.msk.f32.gmra.mxu1 %vm1504_vm2, %v3942_v44 }
 0x1e6   :  { %v1298_v2 = vpop.f32.mrf.mxu3 }
 0x1e7   :  { %v1324_v63 = vadd.f32 %v1298_v2, %v1169_v33  ;;  %v1155_v33 = vpop.f32.mrf.mxu2  ;;  %v1528_v2 = vadd.f32 %v1527_v40, %v1526_v48 }
 0x1e8   :  { %v1173_v54 = vadd.f32 %v1155_v33, %v1017_v27  ;;  %v2822_v27 = vld [vmem:[%s4425_s3] ss:$0 sm:$0xff] }
 0x1e9   :  { %v1479_v4 = vadd.f32 %v1453_v57, %v1324_v63  ;;  %v1456_v41 = vpop.f32.mrf.mxu0  ;;  %v1529_v57 = vsel %vm1504_vm2, %v3942_v44, 0.0  ;;  %v1520_v63 = vrot.slane %v1519_v9, 4 }
 0x1eb   :  { %v3951_v62 = vadd.f32 %v3878_v26, %v1479_v4  ;;  %v1521_v49 = vadd.f32 %v1520_v63, %v1519_v9  ;;  %v2823_v63 = vld [vmem:[%s4425_s3 + $0x1] ss:$0 sm:$0xff] }
 0x1ed   :  { %2746 = vmatmul.msk.f32.gmra.mxu1 %vm1504_vm2, %v3951_v62  ;;  %v1531_v38 = vsel %vm1504_vm2, %v3951_v62, 0.0  ;;  %v1522_v23 = vrot.slane %v1521_v49, 2 }
 0x1ee   :  { %v1301_v20 = vpop.f32.mrf.mxu3 }
 0x1ef   :  { %v1325_v19 = vadd.f32 %v1301_v20, %v1170_v21 }
 0x1f1   :  { %v1480_v6 = vadd.f32 %v1456_v41, %v1325_v19  ;;  %v1459_v51 = vpop.f32.mrf.mxu0  ;;  %v1530_v41 = vadd.f32 %v1529_v57, %v1528_v2 }
 0x1f3   :  { %v3963_v29 = vadd.f32 %v3878_v26, %v1480_v6  ;;  %v1532_v21 = vadd.f32 %v1531_v38, %v1530_v41 }
 0x1f5   :  { %2747 = vmatmul.msk.f32.gmra.mxu1 %vm1504_vm2, %v3963_v29  ;;  %v1533_v1 = vsel %vm1504_vm2, %v3963_v29, 0.0 }
 0x1f6   :  { %v1304_v7 = vpop.f32.mrf.mxu3  ;;  %v1534_v6 = vadd.f32 %v1533_v1, %v1532_v21 }
 0x1f7   :  { %v1326_v12 = vadd.f32 %v1304_v7, %v1171_v3 }
 0x1f9   :  { %v1481_v31 = vadd.f32 %v1459_v51, %v1326_v12  ;;  %v1462_v52 = vpop.f32.mrf.mxu0  ;;  %v1523_v12 = vadd.f32 %v1522_v23, %v1521_v49 }
 0x1fb   :  { %v3977_v59 = vadd.f32 %v3878_v26, %v1481_v31  ;;  %v1524_v50 = vrot.slane %v1523_v12, 1 }
 0x1fd   :  { %2748 = vmatmul.msk.f32.gmra.mxu1 %vm1504_vm2, %v3977_v59  ;;  %v1535_v19 = vsel %vm1504_vm2, %v3977_v59, 0.0  ;;  %v1525_v17 = vadd.f32 %v1524_v50, %v1523_v12 }
 0x1fe   :  { %v1307_v16 = vpop.f32.mrf.mxu3  ;;  %v1536_v32 = vadd.f32 %v1535_v19, %v1534_v6 }
 0x1ff   :  { %v1327_v61 = vadd.f32 %v1307_v16, %v1172_v60  ;;  %v1553_v16 = vsel %vm1552_vm3, %v2831_v24, %v1551_v45 }
 0x200   :  { %v1554_v43 = vmul.f32 %v1553_v16, %v1525_v17 }
 0x201   :  { %v1482_v55 = vadd.f32 %v1462_v52, %v1327_v61  ;;  %v1465_v20 = vpop.f32.mrf.mxu0 }
 0x202   :  { %v1563_v38 = vmul.f32 %v2822_v27, %v1554_v43  ;;  %v1592_v36 = vmul.f32 %v2823_v63, %v1554_v43 }
 0x203   :  { %v3993_v4 = vadd.f32 %v3878_v26, %v1482_v55 }
 0x205   :  { %2749 = vmatmul.msk.f32.gmra.mxu1 %vm1504_vm2, %v3993_v4  ;;  %v1537_v56 = vsel %vm1504_vm2, %v3993_v4, 0.0 }
 0x206   :  { %v1310_v13 = vpop.f32.mrf.mxu3  ;;  %v1538_v3 = vadd.f32 %v1537_v56, %v1536_v32 }
 0x207   :  { %v1328_v47 = vadd.f32 %v1310_v13, %v1173_v54 }
 0x209   :  { %v1483_v51 = vadd.f32 %v1465_v20, %v1328_v47 }
 0x20b   :  { %v4004_v30 = vadd.f32 %v3878_v26, %v1483_v51 }
 0x20d   :  { %v1539_v58 = vsel %vm1504_vm2, %v4004_v30, 0.0  ;;  %2750 = vmatmul.msk.f32.gmra.mxu1 %vm1504_vm2, %v4004_v30 }
 0x20e   :  { %v1540_v7 = vadd.f32 %v1539_v58, %v1538_v3 }
 0x210   :  { %v1541_v39 = vrot.slane %v1540_v7, 4 }
 0x212   :  { %v1542_v26 = vadd.f32 %v1541_v39, %v1540_v7  ;;  %v1705_v37 = vpop.f32.mrf.mxu1 }
 0x213   :  { %v1706_v31 = vadd.f32 %v4010_v8, %v1705_v37 }
 0x214   :  { %v1543_v34 = vrot.slane %v1542_v26, 2 }
 0x215   :  { %v2751_v52 = vmul.f32 -1.442695, %v1706_v31 }
 0x216   :  { %v1544_v60 = vadd.f32 %v1543_v34, %v1542_v26 }
 0x217   :  { %2832 = vpow2.f32 %v2751_v52 }
 0x218   :  { %v1545_v53 = vrot.slane %v1544_v60, 1 }
 0x21a   :  { %v1708_v9 = vpop.f32.mrf.mxu1  ;;  %v1546_v40 = vadd.f32 %v1545_v53, %v1544_v60 }
 0x21b   :  { %v1709_v61 = vadd.f32 %v4010_v8, %v1708_v9 }
 0x21c   :  { %v1555_v48 = vmul.f32 %v1553_v16, %v1546_v40 }
 0x21d   :  { %v2833_v57 = vpop.eup %2832  ;;  %v2752_v55 = vmul.f32 -1.442695, %v1709_v61 }
 0x21e   :  { %v1801_v33 = vadd.f32 1.0, %v2833_v57  ;;  %v1564_v2 = vmul.f32 %v2822_v27, %v1555_v48  ;;  %v1593_v24 = vmul.f32 %v2823_v63, %v1555_v48 }
 0x21f   :  { %2834 = vpow2.f32 %v2752_v55 }
 0x220   :  { %2836 = vrcp.f32 %v1801_v33  ;;  %v1567_v41 = vrot.slane %v1564_v2, 7  ;;  %v1596_v20 = vrot.slane %v1593_v24, 7  ;;  %v1828_v3 = vand.u32 2147483648, %v1801_v33 }
 0x221   :  { %v1826_v7 = vand.u32 2147483647, %v1801_v33  ;;  %vm1822_vm7 = vweird.f32 %v1801_v33 }
 0x222   :  { %v1711_v54 = vpop.f32.mrf.mxu1  ;;  %v1569_v1 = vsel %vm1568_vm4, %v1567_v41, %v1563_v38  ;;  %v1597_v51 = vsel %vm1568_vm4, %v1596_v20, %v1592_v36  ;;  %v1829_v37 = vor.u32 1.1754944e-38, %v1828_v3 }
 0x223   :  { %v1712_v21 = vadd.f32 %v4010_v8, %v1711_v54  ;;  %v1572_v13 = vsel %vm1571_vm5, %v1569_v1, 0.0  ;;  %v1599_v15 = vsel %vm1571_vm5, %v1597_v51, 0.0  ;;  %vm1827_vm9 = vcmp.eq.f32.partialorder %v1826_v7, 8.507059e+37 }
 0x224   :  { %1573 = vadd.xlane.f32.xlu0 %v1572_v13 }
 0x225   :  { %v2835_v19 = vpop.eup %2834  ;;  %v2753_v47 = vmul.f32 -1.442695, %v1712_v21 }
 0x226   :  { %v2837_v49 = vpop.eup %2836  ;;  %v1802_v6 = vadd.f32 1.0, %v2835_v19 }
 0x227   :  { %2838 = vpow2.f32 %v2753_v47  ;;  %v1818_v56 = vmul.f32 %v2837_v49, %v1801_v33  ;;  %vm1823_vm6 = vweird.f32 %v2837_v49 }
 0x228   :  { %2840 = vrcp.f32 %v1802_v6  ;;  %vm1824_vm8 = vmor %vm1822_vm7, %vm1823_vm6  ;;  %v1843_v60 = vand.u32 2147483648, %v1802_v6  ;;  %v1841_v16 = vand.u32 2147483647, %v1802_v6  ;;  %vm1837_vm11 = vweird.f32 %v1802_v6 }
 0x229   :  { %v1819_v32 = vsub.f32 1.0, %v1818_v56 }
 0x22a   :  { %v4027_v23 = vpop.f32.mrf.mxu1  ;;  %v1844_v43 = vor.u32 1.1754944e-38, %v1843_v60  ;;  %vm1842_vm13 = vcmp.eq.f32.partialorder %v1841_v16, 8.507059e+37 }
 0x22b   :  { %v1820_v58 = vmul.f32 %v2837_v49, %v1819_v32 }
 0x22c   :  { %1600 = vadd.xlane.f32.xlu0 %v1599_v15 }
 0x22d   :  { %v2839_v12 = vpop.eup %2838  ;;  %v1821_v39 = vadd.f32 %v2837_v49, %v1820_v58 }
 0x22e   :  { %v2841_v11 = vpop.eup %2840  ;;  %v1803_v26 = vadd.f32 1.0, %v2839_v12 }
 0x22f   :  { %v1825_v31 = vsel %vm1824_vm8, %v2837_v49, %v1821_v39  ;;  %v1833_v50 = vmul.f32 %v2841_v11, %v1802_v6  ;;  %vm1838_vm10 = vweird.f32 %v2841_v11 }
 0x230   :  { %2842 = vrcp.f32 %v1803_v26  ;;  %v1830_v34 = vsel %vm1827_vm9, %v1829_v37, %v1825_v31  ;;  %vm1839_vm12 = vmor %vm1837_vm11, %vm1838_vm10  ;;  %v1858_v2 = vand.u32 2147483648, %v1803_v26  ;;  %v1856_v38 = vand.u32 2147483647, %v1803_v26 }
 0x231   :  { %2081 = vperm.xlu2 %2817, %v1830_v34   ;;  %v1834_v45 = vsub.f32 1.0, %v1833_v50  ;;  %vm1852_vm15 = vweird.f32 %v1803_v26 }
 0x232   :  { %v1717_v52 = vpop.f32.mrf.mxu1  ;;  %v1859_v1 = vor.u32 1.1754944e-38, %v1858_v2  ;;  %vm1857_vm1 = vcmp.eq.f32.partialorder %v1856_v38, 8.507059e+37 }
 0x233   :  { %v1718_v17 = vadd.f32 %v4010_v8, %v1717_v52  ;;  %v1835_v53 = vmul.f32 %v2841_v11, %v1834_v45 }
 0x235   :  { %v2755_v9 = vmul.f32 -1.442695, %v1718_v17  ;;  %v1836_v40 = vadd.f32 %v2841_v11, %v1835_v53 }
 0x236   :  { %v2843_v61 = vpop.eup %2842 }
 0x237   :  { %2844 = vpow2.f32 %v2755_v9  ;;  %v1840_v27 = vsel %vm1839_vm12, %v2841_v11, %v1836_v40  ;;  %v1848_v48 = vmul.f32 %v2843_v61, %v1803_v26  ;;  %vm1853_vm14 = vweird.f32 %v2843_v61 }
 0x238   :  { %v1845_v57 = vsel %vm1842_vm13, %v1844_v43, %v1840_v27  ;;  %vm1854_vm0 = vmor %vm1852_vm15, %vm1853_vm14 }
 0x239   :  { %2086 = vperm.xlu2 %2817, %v1845_v57   ;;  %v1849_v55 = vsub.f32 1.0, %v1848_v48 }
 0x23a   :  { %v4031_v33 = vpop.f32.mrf.mxu1 }
 0x23b   :  { %v1850_v63 = vmul.f32 %v2843_v61, %v1849_v55 }
 0x23d   :  { %v2845_v41 = vpop.eup %2844  ;;  %v1851_v24 = vadd.f32 %v2843_v61, %v1850_v63 }
 0x23e   :  { %v1805_v54 = vadd.f32 1.0, %v2845_v41 }
 0x23f   :  { %v1855_v21 = vsel %vm1854_vm0, %v2843_v61, %v1851_v24 }
 0x240   :  { %2846 = vrcp.f32 %v1805_v54  ;;  %v1860_v13 = vsel %vm1857_vm1, %v1859_v1, %v1855_v21  ;;  %v1888_v51 = vand.u32 2147483648, %v1805_v54  ;;  %v1886_v3 = vand.u32 2147483647, %v1805_v54 }
 0x241   :  { %2091 = vperm.xlu0 %2818, %v1860_v13   ;;  %vm1882_vm4 = vweird.f32 %v1805_v54 }
 0x242   :  { %v1723_v20 = vpop.f32.mrf.mxu1  ;;  %v1889_v12 = vor.u32 1.1754944e-38, %v1888_v51  ;;  %vm1887_vm6 = vcmp.eq.f32.partialorder %v1886_v3, 8.507059e+37 }
 0x243   :  { %v1724_v19 = vadd.f32 %v4010_v8, %v1723_v20 }
 0x245   :  { %v2757_v47 = vmul.f32 -1.442695, %v1724_v19 }
 0x246   :  { %v2847_v49 = vpop.eup %2846 }
 0x247   :  { %2848 = vpow2.f32 %v2757_v47  ;;  %v1878_v6 = vmul.f32 %v2847_v49, %v1805_v54  ;;  %vm1883_vm3 = vweird.f32 %v2847_v49 }
 0x248   :  { %vm1884_vm5 = vmor %vm1882_vm4, %vm1883_vm3 }
 0x249   :  { %v1879_v36 = vsub.f32 1.0, %v1878_v6 }
 0x24a   :  { %v4034_v56 = vpop.f32.mrf.mxu1 }
 0x24b   :  { %v1880_v32 = vmul.f32 %v2847_v49, %v1879_v36 }
 0x24d   :  { %v2849_v15 = vpop.eup %2848  ;;  %v1881_v58 = vadd.f32 %v2847_v49, %v1880_v32 }
 0x24e   :  { %v1807_v7 = vadd.f32 1.0, %v2849_v15 }
 0x24f   :  { %v1885_v39 = vsel %vm1884_vm5, %v2847_v49, %v1881_v58  ;;  %v1715_v58 = vadd.f32 %v4010_v8, %v4027_v23 }
 0x250   :  { %2850 = vrcp.f32 %v1807_v7  ;;  %v1890_v11 = vsel %vm1887_vm6, %v1889_v12, %v1885_v39  ;;  %v1918_v60 = vand.u32 2147483648, %v1807_v7  ;;  %v1916_v53 = vand.u32 2147483647, %v1807_v7 }
 0x251   :  { %2101 = vperm.xlu2 %2817, %v1890_v11   ;;  %vm1912_vm8 = vweird.f32 %v1807_v7 }
 0x252   :  { %v1729_v26 = vpop.f32.mrf.mxu1  ;;  %v1919_v61 = vor.u32 1.1754944e-38, %v1918_v60  ;;  %vm1917_vm10 = vcmp.eq.f32.partialorder %v1916_v53, 8.507059e+37  ;;  %v2754_v60 = vmul.f32 -1.442695, %v1715_v58  ;;  %v2824_v58 = vld [vmem:[%s4427_s4] ss:$0 sm:$0xff] }
 0x253   :  { %v1730_v37 = vadd.f32 %v4010_v8, %v1729_v26 }
 0x255   :  { %v2759_v31 = vmul.f32 -1.442695, %v1730_v37 }
 0x256   :  { %v2851_v50 = vpop.eup %2850 }
 0x257   :  { %2852 = vpow2.f32 %v2759_v31  ;;  %v1908_v34 = vmul.f32 %v2851_v50, %v1807_v7  ;;  %vm1913_vm7 = vweird.f32 %v2851_v50 }
 0x258   :  { %vm1914_vm9 = vmor %vm1912_vm8, %vm1913_vm7 }
 0x259   :  { %v1909_v45 = vsub.f32 1.0, %v1908_v34 }
 0x25a   :  { %v4037_v52 = vpop.f32.mrf.mxu1 }
 0x25b   :  { %v1910_v17 = vmul.f32 %v2851_v50, %v1909_v45 }
 0x25d   :  { %v2853_v16 = vpop.eup %2852  ;;  %v1911_v9 = vadd.f32 %v2851_v50, %v1910_v17 }
 0x25e   :  { %v1809_v40 = vadd.f32 1.0, %v2853_v16  ;;  %v1721_v16 = vadd.f32 %v4010_v8, %v4031_v33  ;;  %v1727_v33 = vadd.f32 %v4010_v8, %v4034_v56 }
 0x25f   :  { %v1915_v43 = vsel %vm1914_vm9, %v2851_v50, %v1911_v9 }
 0x260   :  { %2854 = vrcp.f32 %v1809_v40  ;;  %v1920_v27 = vsel %vm1917_vm10, %v1919_v61, %v1915_v43  ;;  %v1948_v24 = vand.u32 2147483648, %v1809_v40  ;;  %v1946_v1 = vand.u32 2147483647, %v1809_v40 }
 0x261   :  { %2111 = vperm.xlu2 %2817, %v1920_v27   ;;  %vm1942_vm12 = vweird.f32 %v1809_v40  ;;  %v2756_v27 = vmul.f32 -1.442695, %v1721_v16 }
 0x262   :  { %v1735_v48 = vpop.f32.mrf.mxu1  ;;  %v1949_v19 = vor.u32 1.1754944e-38, %v1948_v24  ;;  %vm1947_vm14 = vcmp.eq.f32.partialorder %v1946_v1, 8.507059e+37 }
 0x263   :  { %v1736_v57 = vadd.f32 %v4010_v8, %v1735_v48 }
 0x265   :  { %v2761_v55 = vmul.f32 -1.442695, %v1736_v57 }
 0x266   :  { %v2855_v2 = vpop.eup %2854 }
 0x267   :  { %2856 = vpow2.f32 %v2761_v55  ;;  %v1938_v63 = vmul.f32 %v2855_v2, %v1809_v40  ;;  %vm1943_vm11 = vweird.f32 %v2855_v2 }
 0x268   :  { %vm1944_vm13 = vmor %vm1942_vm12, %vm1943_vm11 }
 0x269   :  { %v1939_v38 = vsub.f32 1.0, %v1938_v63 }
 0x26a   :  { %v4040_v41 = vpop.f32.mrf.mxu1 }
 0x26b   :  { %v1940_v54 = vmul.f32 %v2855_v2, %v1939_v38  ;;  %v1739_v16 = vadd.f32 %v4010_v8, %v4040_v41 }
 0x26d   :  { %v2857_v21 = vpop.eup %2856  ;;  %v1941_v13 = vadd.f32 %v2855_v2, %v1940_v54 }
 0x26e   :  { %v1811_v20 = vadd.f32 1.0, %v2857_v21 }
 0x26f   :  { %v1945_v47 = vsel %vm1944_vm13, %v2855_v2, %v1941_v13 }
 0x270   :  { %2858 = vrcp.f32 %v1811_v20  ;;  %v1950_v49 = vsel %vm1947_vm14, %v1949_v19, %v1945_v47  ;;  %v1978_v12 = vand.u32 2147483648, %v1811_v20  ;;  %v1976_v26 = vand.u32 2147483647, %v1811_v20 }
 0x271   :  { %2121 = vperm.xlu2 %2817, %v1950_v49   ;;  %vm1972_vm0 = vweird.f32 %v1811_v20  ;;  %v2758_v49 = vmul.f32 -1.442695, %v1727_v33 }
 0x272   :  { %v1741_v6 = vpop.f32.mrf.mxu1  ;;  %v1979_v45 = vor.u32 1.1754944e-38, %v1978_v12  ;;  %vm1977_vm3 = vcmp.eq.f32.partialorder %v1976_v26, 8.507059e+37 }
 0x273   :  { %v1742_v36 = vadd.f32 %v4010_v8, %v1741_v6 }
 0x275   :  { %v2763_v51 = vmul.f32 -1.442695, %v1742_v36 }
 0x276   :  { %v2859_v32 = vpop.eup %2858 }
 0x277   :  { %2860 = vpow2.f32 %v2763_v51  ;;  %v1968_v3 = vmul.f32 %v2859_v32, %v1811_v20  ;;  %vm1973_vm15 = vweird.f32 %v2859_v32 }
 0x278   :  { %vm1974_vm1 = vmor %vm1972_vm0, %vm1973_vm15 }
 0x279   :  { %v1969_v15 = vsub.f32 1.0, %v1968_v3 }
 0x27a   :  { %v1744_v7 = vpop.f32.mrf.mxu1 }
 0x27b   :  { %v1745_v39 = vadd.f32 %v4010_v8, %v1744_v7  ;;  %v1970_v11 = vmul.f32 %v2859_v32, %v1969_v15  ;;  %v1733_v15 = vadd.f32 %v4010_v8, %v4037_v52 }
 0x27d   :  { %v2861_v37 = vpop.eup %2860  ;;  %v2764_v31 = vmul.f32 -1.442695, %v1745_v39  ;;  %v1971_v50 = vadd.f32 %v2859_v32, %v1970_v11 }
 0x27e   :  { %v1813_v34 = vadd.f32 1.0, %v2861_v37 }
 0x27f   :  { %2862 = vpow2.f32 %v2764_v31  ;;  %v1975_v17 = vsel %vm1974_vm1, %v2859_v32, %v1971_v50 }
 0x280   :  { %2864 = vrcp.f32 %v1813_v34  ;;  %v1980_v23 = vsel %vm1977_vm3, %v1979_v45, %v1975_v17  ;;  %v2008_v2 = vand.u32 2147483648, %v1813_v34  ;;  %v2006_v24 = vand.u32 2147483647, %v1813_v34 }
 0x281   :  { %2131 = vperm.xlu2 %2817, %v1980_v23   ;;  %2866 = vpow2.f32 %v2754_v60  ;;  %vm2002_vm5 = vweird.f32 %v1813_v34 }
 0x282   :  { %v4046_v53 = vpop.f32.mrf.mxu1  ;;  %v2009_v20 = vor.u32 1.1754944e-38, %v2008_v2  ;;  %vm2007_vm7 = vcmp.eq.f32.partialorder %v2006_v24, 8.507059e+37 }
 0x285   :  { %v2863_v9 = vpop.eup %2862 }
 0x286   :  { %v2865_v40 = vpop.eup %2864  ;;  %v1814_v61 = vadd.f32 1.0, %v2863_v9 }
 0x287   :  { %v1998_v43 = vmul.f32 %v2865_v40, %v1813_v34  ;;  %v2867_v48 = vpop.eup %2866  ;;  %vm2003_vm4 = vweird.f32 %v2865_v40  ;;  %v2760_v34 = vmul.f32 -1.442695, %v1733_v15 }
 0x288   :  { %2868 = vrcp.f32 %v1814_v61  ;;  %v4051_v54 = vadd.f32 1.0, %v2867_v48  ;;  %vm2004_vm6 = vmor %vm2002_vm5, %vm2003_vm4  ;;  %v2023_v32 = vand.u32 2147483648, %v1814_v61  ;;  %v2021_v56 = vand.u32 2147483647, %v1814_v61 }
 0x289   :  { %v1999_v57 = vsub.f32 1.0, %v1998_v43  ;;  %2870 = vpow2.f32 %v2756_v27  ;;  %vm2017_vm9 = vweird.f32 %v1814_v61 }
 0x28a   :  { %v1750_v55 = vpop.f32.mrf.mxu1  ;;  %v2024_v26 = vor.u32 1.1754944e-38, %v2023_v32  ;;  %vm2022_vm11 = vcmp.eq.f32.partialorder %v2021_v56, 8.507059e+37  ;;  %vm1867_vm1 = vweird.f32 %v4051_v54  ;;  %v1871_v56 = vand.u32 2147483647, %v4051_v54 }
 0x28b   :  { %v1751_v63 = vadd.f32 %v4010_v8, %v1750_v55  ;;  %v2000_v38 = vmul.f32 %v2865_v40, %v1999_v57  ;;  %v2762_v57 = vmul.f32 -1.442695, %v1739_v16 }
 0x28c   :  { %vm1872_vm4 = vcmp.eq.f32.partialorder %v1871_v56, 8.507059e+37 }
 0x28d   :  { %v2766_v1 = vmul.f32 -1.442695, %v1751_v63  ;;  %v2001_v21 = vadd.f32 %v2865_v40, %v2000_v38 }
 0x28e   :  { %v2869_v13 = vpop.eup %2868 }
 0x28f   :  { %2872 = vpow2.f32 %v2766_v1  ;;  %v2005_v19 = vsel %vm2004_vm6, %v2865_v40, %v2001_v21  ;;  %v2013_v47 = vmul.f32 %v2869_v13, %v1814_v61  ;;  %v2871_v51 = vpop.eup %2870  ;;  %vm2018_vm8 = vweird.f32 %v2869_v13 }
 0x290   :  { %v2010_v6 = vsel %vm2007_vm7, %v2009_v20, %v2005_v19  ;;  %2874 = vrcp.f32 %v4051_v54  ;;  %v4061_v12 = vadd.f32 1.0, %v2871_v51  ;;  %vm2019_vm10 = vmor %vm2017_vm9, %vm2018_vm8  ;;  %v2907_v20 = vmov 1  }
 0x291   :  { %2141 = vperm.xlu2 %2817, %v2010_v6   ;;  %v2014_v36 = vsub.f32 1.0, %v2013_v47  ;;  %2876 = vpow2.f32 %v2758_v49 }
 0x292   :  { %vm1897_vm6 = vweird.f32 %v4061_v12 }
 0x293   :  { %v2015_v3 = vmul.f32 %v2869_v13, %v2014_v36 }
 0x295   :  { %v2873_v7 = vpop.eup %2872  ;;  %v2016_v39 = vadd.f32 %v2869_v13, %v2015_v3  ;;  %v1873_v3 = vand.u32 2147483648, %v4051_v54 }
 0x296   :  { %v1816_v11 = vadd.f32 1.0, %v2873_v7  ;;  %v4063_v37 = vpop.eup %2874 }
 0x297   :  { %v1574_v31 = vpop.xlane.xlu0 %1573  ;;  %v2020_v50 = vsel %vm2019_vm10, %v2869_v13, %v2016_v39  ;;  %v2877_v60 = vpop.eup %2876  ;;  %v1863_v23 = vmul.f32 %v4063_v37, %v4051_v54  ;;  %v1748_v13 = vadd.f32 %v4010_v8, %v4046_v53  ;;  %vm1868_vm15 = vweird.f32 %v4063_v37 }
 0x298   :  { %2878 = vrcp.f32 %v1816_v11  ;;  %v1579_v52 = vadd.f32 %v2824_v58, %v1574_v31  ;;  %v2025_v45 = vsel %vm2022_vm11, %v2024_v26, %v2020_v50  ;;  %v4070_v9 = vadd.f32 1.0, %v2877_v60  ;;  %vm1869_vm3 = vmor %vm1867_vm1, %vm1868_vm15 }
 0x299   :  { %2880 = vrcp.f32 %v4061_v12  ;;  %2146 = vperm.xlu0 %2818, %v2025_v45   ;;  %v1864_v61 = vsub.f32 1.0, %v1863_v23  ;;  %v2053_v24 = vand.u32 2147483648, %v1816_v11  ;;  %v2051_v21 = vand.u32 2147483647, %v1816_v11 }
 0x29a   :  { %v1580_v17 = vmax.f32 %v1579_v52, 0.0  ;;  %2882 = vpow2.f32 %v2760_v34  ;;  %vm2047_vm13 = vweird.f32 %v1816_v11  ;;  %v2765_v8 = vmul.f32 -1.442695, %v1748_v13 }
 0x29b   :  { %2884 = vrcp.f32 %v4070_v9  ;;  %v1865_v33 = vmul.f32 %v4063_v37, %v1864_v61  ;;  %v2054_v49 = vor.u32 1.1754944e-38, %v2053_v24  ;;  %vm2052_vm0 = vcmp.eq.f32.partialorder %v2051_v21, 8.507059e+37 }
 0x29c   :  { %1584 = vperm.xlu1 %2815, %v1580_v17   ;;  %2886 = vpow2.f32 %v2762_v57  ;;  %v1901_v52 = vand.u32 2147483647, %v4061_v12  ;;  %vm1927_vm10 = vweird.f32 %v4070_v9  ;;  %v1931_v57 = vand.u32 2147483647, %v4070_v9 }
 0x29d   :  { %v1866_v6 = vadd.f32 %v4063_v37, %v1865_v33 }
 0x29e   :  { %v2879_v40 = vpop.eup %2878  ;;  %vm1902_vm8 = vcmp.eq.f32.partialorder %v1901_v52, 8.507059e+37  ;;  %v2827_v52 = vld [vmem:[%s4428_s5 + $0x1] ss:$0 sm:$0xff] }
 0x29f   :  { %v4072_v43 = vpop.eup %2880  ;;  %v1601_v27 = vpop.xlane.xlu0 %1600  ;;  %v2043_v48 = vmul.f32 %v2879_v40, %v1816_v11  ;;  %vm2048_vm12 = vweird.f32 %v2879_v40  ;;  %v1874_v11 = vor.u32 1.1754944e-38, %v1873_v3 }
 0x2a0   :  { %v1602_v55 = vadd.f32 %v2824_v58, %v1601_v27  ;;  %v2883_v63 = vpop.eup %2882  ;;  %v1893_v41 = vmul.f32 %v4072_v43, %v4061_v12  ;;  %vm2049_vm14 = vmor %vm2047_vm13, %vm2048_vm12  ;;  %v1870_v58 = vsel %vm1869_vm3, %v4063_v37, %v1866_v6  ;;  %vm1898_vm5 = vweird.f32 %v4072_v43 }
 0x2a1   :  { %v2044_v2 = vsub.f32 1.0, %v2043_v48  ;;  %v4080_v19 = vadd.f32 1.0, %v2883_v63  ;;  %v2885_v51 = vpop.eup %2884  ;;  %v1875_v31 = vsel %vm1872_vm4, %v1874_v11, %v1870_v58  ;;  %v1903_v37 = vand.u32 2147483648, %v4061_v12  ;;  %vm1899_vm7 = vmor %vm1897_vm6, %vm1898_vm5 }
 0x2a2   :  { %v1603_v38 = vmax.f32 %v1602_v55, 0.0  ;;  %v1894_v36 = vsub.f32 1.0, %v1893_v41  ;;  %v2887_v15 = vpop.eup %2886  ;;  %v1923_v39 = vmul.f32 %v2885_v51, %v4070_v9  ;;  %vm1928_vm9 = vweird.f32 %v2885_v51 }
 0x2a3   :  { %v2045_v1 = vmul.f32 %v2879_v40, %v2044_v2  ;;  %2888 = vrcp.f32 %v4080_v19  ;;  %v4091_v26 = vadd.f32 1.0, %v2887_v15  ;;  %v1904_v23 = vor.u32 1.1754944e-38, %v1903_v37  ;;  %vm1929_vm11 = vmor %vm1927_vm10, %vm1928_vm9 }
 0x2a4   :  { %2816 = vset.pattern.permute.xlu1 %v2907_v20  ;;  %v1895_v7 = vmul.f32 %v4072_v43, %v1894_v36  ;;  %2890 = vpow2.f32 %v2765_v8  ;;  %v1924_v50 = vsub.f32 1.0, %v1923_v39  ;;  %v1933_v12 = vand.u32 2147483648, %v4070_v9 }
 0x2a5   :  { %1607 = vperm.xlu1 %2816, %v1603_v38   ;;  %v2046_v47 = vadd.f32 %v2879_v40, %v2045_v1  ;;  %2892 = vrcp.f32 %v4091_v26  ;;  %vm1932_vm12 = vcmp.eq.f32.partialorder %v1931_v57, 8.507059e+37  ;;  %v1963_v1 = vand.u32 2147483648, %v4080_v19  ;;  %v2379_v57 = vld [vmem:[%s4430_s11 + $0x10] sm:$0xff] }
 0x2a6   :  { %v1896_v54 = vadd.f32 %v4072_v43, %v1895_v7  ;;  %v1925_v60 = vmul.f32 %v2885_v51, %v1924_v50  ;;  %v1934_v63 = vor.u32 1.1754944e-38, %v1933_v12  ;;  %v1961_v9 = vand.u32 2147483647, %v4080_v19  ;;  %v2082_v50 = vpop.permute.xlu2 %2081 }
 0x2a7   :  { %v2050_v32 = vsel %vm2049_vm14, %v2879_v40, %v2046_v47  ;;  %vm1957_vm14 = vweird.f32 %v4080_v19  ;;  %v1964_v47 = vor.u32 1.1754944e-38, %v1963_v1  ;;  %vm1987_vm3 = vweird.f32 %v4091_v26 }
 0x2a8   :  { %v2055_v53 = vsel %vm2052_vm0, %v2054_v49, %v2050_v32  ;;  %v1926_v61 = vadd.f32 %v2885_v51, %v1925_v60  ;;  %vm1962_vm0 = vcmp.eq.f32.partialorder %v1961_v9, 8.507059e+37  ;;  %v1991_v32 = vand.u32 2147483647, %v4091_v26 }
 0x2a9   :  { %2156 = vperm.xlu2 %2817, %v2055_v53   ;;  %v2889_v34 = vpop.eup %2888 }
 0x2aa   :  { %v2891_v45 = vpop.eup %2890  ;;  %v1953_v17 = vmul.f32 %v2889_v34, %v4080_v19  ;;  %vm1958_vm13 = vweird.f32 %v2889_v34  ;;  %vm1992_vm5 = vcmp.eq.f32.partialorder %v1991_v32, 8.507059e+37 }
 0x2ab   :  { %v1815_v16 = vadd.f32 1.0, %v2891_v45  ;;  %v2893_v48 = vpop.eup %2892  ;;  %vm1959_vm15 = vmor %vm1957_vm14, %vm1958_vm13 }
 0x2ac   :  { %v1954_v27 = vsub.f32 1.0, %v1953_v17  ;;  %v1983_v2 = vmul.f32 %v2893_v48, %v4091_v26  ;;  %vm1988_vm1 = vweird.f32 %v2893_v48 }
 0x2ad   :  { %2819 = vset.pattern.permute.xlu1 %v2906_v22  ;;  %v1900_v22 = vsel %vm1899_vm7, %v4072_v43, %v1896_v54  ;;  %2894 = vrcp.f32 %v1815_v16  ;;  %v1930_v43 = vsel %vm1929_vm11, %v2885_v51, %v1926_v61  ;;  %v1993_v51 = vand.u32 2147483648, %v4091_v26  ;;  %vm1989_vm4 = vmor %vm1987_vm3, %vm1988_vm1  ;;  %v2380_v26 = vld [vmem:[%s4430_s11 + $0x18] sm:$0xff]  ;;  %v2826_v54 = vld [vmem:[%s4428_s5] ss:$0 sm:$0xff] }
 0x2ae   :  { %2096 = vperm.xlu1 %2819, %v1875_v31   ;;  %v1905_v40 = vsel %vm1902_vm8, %v1904_v23, %v1900_v22  ;;  %v1955_v55 = vmul.f32 %v2889_v34, %v1954_v27  ;;  %v1935_v38 = vsel %vm1932_vm12, %v1934_v63, %v1930_v43  ;;  %v1984_v33 = vsub.f32 1.0, %v1983_v2  ;;  %2445 = vmatpush.msra.mxu2 %v2380_v26 }
 0x2af   :  { %v1994_v8 = vor.u32 1.1754944e-38, %v1993_v51  ;;  %v2038_v15 = vand.u32 2147483648, %v1815_v16  ;;  %vm2032_vm7 = vweird.f32 %v1815_v16  ;;  %v2036_v58 = vand.u32 2147483647, %v1815_v16 }
 0x2b0   :  { %v1956_v24 = vadd.f32 %v2889_v34, %v1955_v55  ;;  %v1985_v13 = vmul.f32 %v2893_v48, %v1984_v33  ;;  %2446 = vmatpush.msra.mxu2 %v2379_v57 }
 0x2b1   :  { %v2039_v39 = vor.u32 1.1754944e-38, %v2038_v15  ;;  %vm2037_vm9 = vcmp.eq.f32.partialorder %v2036_v58, 8.507059e+37 }
 0x2b2   :  { %v1960_v21 = vsel %vm1959_vm15, %v2889_v34, %v1956_v24  ;;  %v1986_v6 = vadd.f32 %v2893_v48, %v1985_v13  ;;  %v2825_v34 = vld [vmem:[%s4429_s6] ss:$0 sm:$0xff] }
 0x2b3   :  { %v2895_v41 = vpop.eup %2894  ;;  %v1965_v49 = vsel %vm1962_vm0, %v1964_v47, %v1960_v21  ;;  %v2092_v21 = vpop.permute.xlu0 %2091 }
 0x2b4   :  { %v2028_v20 = vmul.f32 %v2895_v41, %v1815_v16  ;;  %v1990_v3 = vsel %vm1989_vm4, %v2893_v48, %v1986_v6  ;;  %vm2033_vm6 = vweird.f32 %v2895_v41  ;;  %v2087_v16 = vpop.permute.xlu2 %2086  ;;  %v2161_v32 = vmul.f32 %v2092_v21, %v3894_v42 }
 0x2b5   :  { %v1995_v53 = vsel %vm1992_vm5, %v1994_v8, %v1990_v3  ;;  %vm2034_vm8 = vmor %vm2032_vm7, %vm2033_vm6  ;;  %v2160_v6 = vmul.f32 %v2087_v16, %v3888_v46 }
 0x2b6   :  { %2106 = vperm.xlu1 %2819, %v1905_v40   ;;  %v2029_v36 = vsub.f32 1.0, %v2028_v20 }
 0x2b8   :  { %v2030_v19 = vmul.f32 %v2895_v41, %v2029_v36 }
 0x2ba   :  { %v2031_v56 = vadd.f32 %v2895_v41, %v2030_v19 }
 0x2bc   :  { %v2035_v7 = vsel %vm2034_vm8, %v2895_v41, %v2031_v56  ;;  %v2102_v48 = vpop.permute.xlu2 %2101 }
 0x2bd   :  { %v2040_v11 = vsel %vm2037_vm9, %v2039_v39, %v2035_v7  ;;  %v2163_v36 = vmul.f32 %v2102_v48, %v3906_v28 }
 0x2be   :  { %2116 = vperm.xlu1 %2819, %v1935_v38  }
 0x2c4   :  { %v2112_v55 = vpop.permute.xlu2 %2111 }
 0x2c5   :  { %v2165_v3 = vmul.f32 %v2112_v55, %v3918_v5 }
 0x2c6   :  { %2126 = vperm.xlu1 %2819, %v1965_v49   ;;  %v2159_v49 = vmul.f32 %v2082_v50, %v3882_v10 }
 0x2cc   :  { %v2122_v13 = vpop.permute.xlu2 %2121 }
 0x2cd   :  { %v2167_v19 = vmul.f32 %v2122_v13, %v3930_v25 }
 0x2ce   :  { %2136 = vperm.xlu1 %2819, %v1995_v53  }
 0x2d6   :  { %2151 = vperm.xlu1 %2819, %v2040_v11  }
 0x30e   :  { %v1585_v31 = vpop.permute.xlu1 %1584 }
 0x30f   :  { %v1588_v37 = vmul.f32 %v2826_v54, %v1585_v31 }
 0x311   :  { %v1589_v22 = vadd.f32 %v2825_v34, %v1588_v37 }
 0x317   :  { %v1608_v45 = vpop.permute.xlu1 %1607 }
 0x318   :  { %v1611_v60 = vmul.f32 %v2827_v52, %v1608_v45 }
 0x31a   :  { %v1612_v17 = vadd.f32 %v1611_v60, %v1589_v22 }
 0x31c   :  { %v2734_v23 = vmul.f32 -1.442695, %v1612_v17 }
 0x31e   :  { %2896 = vpow2.f32 %v2734_v23 }
 0x320   :  { %v2097_v40 = vpop.permute.xlu1 %2096 }
 0x321   :  { %v2162_v7 = vmul.f32 %v2097_v40, %v3900_v18 }
 0x324   :  { %v2897_v61 = vpop.eup %2896 }
 0x325   :  { %v1616_v27 = vadd.f32 1.0, %v2897_v61 }
 0x327   :  { %2898 = vrcp.f32 %v1616_v27  ;;  %v1628_v24 = vand.u32 2147483648, %v1616_v27  ;;  %v1626_v41 = vand.u32 2147483647, %v1616_v27  ;;  %vm1622_vm11 = vweird.f32 %v1616_v27 }
 0x328   :  { %v2107_v12 = vpop.permute.xlu1 %2106 }
 0x329   :  { %v1629_v9 = vor.u32 1.1754944e-38, %v1628_v24  ;;  %vm1627_vm13 = vcmp.eq.f32.partialorder %v1626_v41, 8.507059e+37 }
 0x32d   :  { %v2899_v43 = vpop.eup %2898 }
 0x32e   :  { %v1618_v2 = vmul.f32 %v2899_v43, %v1616_v27  ;;  %vm1623_vm10 = vweird.f32 %v2899_v43 }
 0x32f   :  { %vm1624_vm12 = vmor %vm1622_vm11, %vm1623_vm10 }
 0x330   :  { %v1619_v63 = vsub.f32 1.0, %v1618_v2  ;;  %v2117_v38 = vpop.permute.xlu1 %2116 }
 0x331   :  { %v2166_v57 = vmul.f32 %v2117_v38, %v3924_v14 }
 0x332   :  { %v1620_v33 = vmul.f32 %v2899_v43, %v1619_v63 }
 0x334   :  { %v1621_v1 = vadd.f32 %v2899_v43, %v1620_v33 }
 0x336   :  { %v1625_v20 = vsel %vm1624_vm12, %v2899_v43, %v1621_v1 }
 0x337   :  { %v1630_v47 = vsel %vm1627_vm13, %v1629_v9, %v1625_v20 }
 0x338   :  { %v2059_v51 = vperm.slane %v1630_v47, 0  ;;  %v2058_v8 = vrot.slane %v1630_v47, 1  ;;  %v2127_v53 = vpop.permute.xlu1 %2126 }
 0x339   :  { %v2168_v43 = vmul.f32 %v2127_v53, %v3936_v35 }
 0x33a   :  { %v2063_v56 = vmul.f32 %v2059_v51, %v3882_v10  ;;  %v2064_v15 = vmul.f32 %v2059_v51, %v3888_v46  ;;  %v2065_v58 = vmul.f32 %v2059_v51, %v3894_v42  ;;  %v2066_v39 = vmul.f32 %v2059_v51, %v3900_v18 }
 0x33b   :  { %v2067_v11 = vmul.f32 %v2059_v51, %v3906_v28  ;;  %v2068_v26 = vmul.f32 %v2059_v51, %v3912_v0  ;;  %v2069_v31 = vmul.f32 %v2059_v51, %v3918_v5  ;;  %v2164_v10 = vmul.f32 %v2107_v12, %v3912_v0  ;;  %v2132_v28 = vpop.permute.xlu2 %2131 }
 0x33c   :  { %v4141_v54 = vadd.f32 %v2159_v49, %v2063_v56  ;;  %v4143_v50 = vadd.f32 %v2160_v6, %v2064_v15  ;;  %v4145_v34 = vadd.f32 %v2161_v32, %v2065_v58  ;;  %v4148_v46 = vperm.slane %v2058_v8, 0  ;;  %v2147_v15 = vpop.permute.xlu0 %2146 }
 0x33d   :  { %v4150_v42 = vadd.f32 %v2162_v7, %v2066_v39  ;;  %v4152_v37 = vadd.f32 %v2163_v36, %v2067_v11  ;;  %v2070_v18 = vmul.f32 %v2059_v51, %v3924_v14  ;;  %v4165_v17 = vadd.f32 %v2164_v10, %v2068_v26 }
 0x33e   :  { %v2191_v5 = vsel %vm1504_vm2, %v4141_v54, 0.0  ;;  %v2192_v52 = vsel %vm1504_vm2, %v4143_v50, 0.0  ;;  %v2236_v45 = vmul.f32 %v4141_v54, %v4141_v54  ;;  %v2237_v0 = vmul.f32 %v4143_v50, %v4143_v50 }
 0x33f   :  { %v2193_v22 = vadd.f32 %v2192_v52, %v2191_v5  ;;  %v2238_v60 = vmul.f32 %v4145_v34, %v4145_v34  ;;  %v4167_v23 = vadd.f32 %v2165_v3, %v2069_v31  ;;  %v2194_v61 = vsel %vm1504_vm2, %v4145_v34, 0.0 }
 0x340   :  { %v2252_v16 = vsel %vm1504_vm2, %v2236_v45, 0.0  ;;  %v2253_v40 = vsel %vm1504_vm2, %v2237_v0, 0.0  ;;  %v2239_v27 = vmul.f32 %v4150_v42, %v4150_v42  ;;  %v2196_v55 = vsel %vm1504_vm2, %v4150_v42, 0.0  ;;  %v2137_v38 = vpop.permute.xlu1 %2136 }
 0x341   :  { %v2254_v48 = vadd.f32 %v2253_v40, %v2252_v16  ;;  %v2195_v12 = vadd.f32 %v2194_v61, %v2193_v22  ;;  %v2255_v2 = vsel %vm1504_vm2, %v2238_v60, 0.0  ;;  %v2198_v63 = vsel %vm1504_vm2, %v4152_v37, 0.0 }
 0x342   :  { %v2240_v24 = vmul.f32 %v4152_v37, %v4152_v37  ;;  %v2257_v1 = vsel %vm1504_vm2, %v2239_v27, 0.0  ;;  %v2241_v14 = vmul.f32 %v4165_v17, %v4165_v17  ;;  %v2242_v9 = vmul.f32 %v4167_v23, %v4167_v23 }
 0x343   :  { %v2197_v33 = vadd.f32 %v2196_v55, %v2195_v12  ;;  %v2256_v41 = vadd.f32 %v2255_v2, %v2254_v48  ;;  %v4189_v21 = vadd.f32 %v2166_v57, %v2070_v18  ;;  %v2071_v13 = vmul.f32 %v4148_v46, %v3930_v25  ;;  %v2142_v51 = vpop.permute.xlu2 %2141 }
 0x344   :  { %v2072_v20 = vmul.f32 %v4148_v46, %v3936_v35  ;;  %v2169_v47 = vmul.f32 %v2132_v28, %v3942_v44  ;;  %v2200_v36 = vsel %vm1504_vm2, %v4165_v17, 0.0  ;;  %v2259_v32 = vsel %vm1504_vm2, %v2240_v24, 0.0 }
 0x345   :  { %v2258_v49 = vadd.f32 %v2257_v1, %v2256_v41  ;;  %v2199_v6 = vadd.f32 %v2198_v63, %v2197_v33  ;;  %v4199_v3 = vadd.f32 %v2167_v19, %v2071_v13  ;;  %v2073_v25 = vmul.f32 %v4148_v46, %v3942_v44 }
 0x346   :  { %v4201_v8 = vadd.f32 %v2168_v43, %v2072_v20  ;;  %v2202_v35 = vsel %vm1504_vm2, %v4167_v23, 0.0  ;;  %v2261_v58 = vsel %vm1504_vm2, %v2241_v14, 0.0  ;;  %v2263_v7 = vsel %vm1504_vm2, %v2242_v9, 0.0 }
 0x347   :  { %v2201_v53 = vadd.f32 %v2200_v36, %v2199_v6  ;;  %v2260_v56 = vadd.f32 %v2259_v32, %v2258_v49  ;;  %v2204_v39 = vsel %vm1504_vm2, %v4189_v21, 0.0  ;;  %v2243_v19 = vmul.f32 %v4189_v21, %v4189_v21 }
 0x348   :  { %v2074_v44 = vmul.f32 %v4148_v46, %v3951_v62  ;;  %v2075_v31 = vmul.f32 %v4148_v46, %v3963_v29  ;;  %v2244_v10 = vmul.f32 %v4199_v3, %v4199_v3  ;;  %v2245_v18 = vmul.f32 %v4201_v8, %v4201_v8  ;;  %v2152_v12 = vpop.permute.xlu1 %2151 }
 0x349   :  { %v2262_v11 = vadd.f32 %v2261_v58, %v2260_v56  ;;  %v2203_v26 = vadd.f32 %v2202_v35, %v2201_v53  ;;  %v4221_v28 = vadd.f32 %v2169_v47, %v2073_v25  ;;  %v2170_v5 = vmul.f32 %v2137_v38, %v3951_v62 }
 0x34a   :  { %v2171_v52 = vmul.f32 %v2142_v51, %v3963_v29  ;;  %v2172_v45 = vmul.f32 %v2147_v15, %v3977_v59  ;;  %v2265_v60 = vsel %vm1504_vm2, %v2243_v19, 0.0  ;;  %v2206_v16 = vsel %vm1504_vm2, %v4199_v3, 0.0 }
 0x34b   :  { %v2205_v0 = vadd.f32 %v2204_v39, %v2203_v26  ;;  %v2264_v22 = vadd.f32 %v2263_v7, %v2262_v11  ;;  %v4229_v40 = vadd.f32 %v2170_v5, %v2074_v44  ;;  %v2076_v61 = vmul.f32 %v4148_v46, %v3977_v59  ;;  %v2157_v57 = vpop.permute.xlu2 %2156 }
 0x34c   :  { %v2208_v62 = vsel %vm1504_vm2, %v4201_v8, 0.0  ;;  %v2908_v29 = vmov 128.0   ;;  %v2267_v43 = vsel %vm1504_vm2, %v2244_v10, 0.0  ;;  %v2269_v55 = vsel %vm1504_vm2, %v2245_v18, 0.0 }
 0x34d   :  { %v2266_v27 = vadd.f32 %v2265_v60, %v2264_v22  ;;  %v2207_v48 = vadd.f32 %v2206_v16, %v2205_v0  ;;  %2900 = vrcp.f32 %v2908_v29  ;;  %v4237_v2 = vadd.f32 %v2171_v52, %v2075_v31 }
 0x34e   :  { %v2246_v63 = vmul.f32 %v4221_v28, %v4221_v28  ;;  %v2210_v33 = vsel %vm1504_vm2, %v4221_v28, 0.0  ;;  %v2077_v41 = vmul.f32 %v4148_v46, %v3993_v4  ;;  %v2247_v1 = vmul.f32 %v4229_v40, %v4229_v40 }
 0x34f   :  { %v2209_v24 = vadd.f32 %v2208_v62, %v2207_v48  ;;  %v2268_v59 = vadd.f32 %v2267_v43, %v2266_v27  ;;  %v2078_v14 = vmul.f32 %v4148_v46, %v4004_v30  ;;  %v2173_v38 = vmul.f32 %v2152_v12, %v3993_v4 }
 0x350   :  { %v4250_v9 = vadd.f32 %v2172_v45, %v2076_v61  ;;  %v2174_v13 = vmul.f32 %v2157_v57, %v4004_v30  ;;  %v2248_v49 = vmul.f32 %v4237_v2, %v4237_v2  ;;  %v2271_v6 = vsel %vm1504_vm2, %v2246_v63, 0.0 }
 0x351   :  { %v2270_v20 = vadd.f32 %v2269_v55, %v2268_v59  ;;  %v2211_v47 = vadd.f32 %v2210_v33, %v2209_v24  ;;  %v2212_v36 = vsel %vm1504_vm2, %v4229_v40, 0.0  ;;  %v4258_v51 = vadd.f32 %v2173_v38, %v2077_v41 }
 0x352   :  { %v2214_v4 = vsel %vm1504_vm2, %v4237_v2, 0.0  ;;  %v2273_v30 = vsel %vm1504_vm2, %v2247_v1, 0.0  ;;  %v4263_v53 = vadd.f32 %v2174_v13, %v2078_v14  ;;  %v2249_v56 = vmul.f32 %v4250_v9, %v4250_v9  ;;  %v2378_v13 = vld [vmem:[%s4430_s11 + $0x8] sm:$0xff] }
 0x353   :  { %v2901_v32 = vpop.eup %2900  ;;  %v2213_v46 = vadd.f32 %v2212_v36, %v2211_v47  ;;  %v2272_v25 = vadd.f32 %v2271_v6, %v2270_v20  ;;  %v2275_v58 = vsel %vm1504_vm2, %v2248_v49, 0.0  ;;  %v2216_v39 = vsel %vm1504_vm2, %v4250_v9, 0.0  ;;  %v2377_v20 = vld [vmem:[%s4430_s11] sm:$0xff]  ;;  %2447 = vmatpush.msra.mxu2 %v2378_v13 }
 0x354   :  { %v2229_v7 = vmul.f32 128.0, %v2901_v32  ;;  %v2250_v19 = vmul.f32 %v4258_v51, %v4258_v51  ;;  %v2251_v44 = vmul.f32 %v4263_v53, %v4263_v53  ;;  %v2218_v31 = vsel %vm1504_vm2, %v4258_v51, 0.0 }
 0x355   :  { %v2215_v35 = vadd.f32 %v2214_v4, %v2213_v46  ;;  %v2274_v15 = vadd.f32 %v2273_v30, %v2272_v25  ;;  %v2277_v10 = vsel %vm1504_vm2, %v2249_v56, 0.0  ;;  %v2220_v52 = vsel %vm1504_vm2, %v4263_v53, 0.0  ;;  %2448 = vmatpush.msra.mxu2 %v2377_v20 }
 0x356   :  { %v2230_v45 = vsub.f32 1.0, %v2229_v7  ;;  %v2279_v0 = vsel %vm1504_vm2, %v2250_v19, 0.0  ;;  %v2281_v16 = vsel %vm1504_vm2, %v2251_v44, 0.0  ;;  %vm2233_vm14 = vweird.f32 %v2901_v32 }
 0x357   :  { %v2276_v11 = vadd.f32 %v2275_v58, %v2274_v15  ;;  %v2217_v26 = vadd.f32 %v2216_v39, %v2215_v35 }
 0x358   :  { %v2231_v48 = vmul.f32 %v2901_v32, %v2230_v45 }
 0x359   :  { %v2219_v18 = vadd.f32 %v2218_v31, %v2217_v26  ;;  %v2278_v5 = vadd.f32 %v2277_v10, %v2276_v11  ;;  %v2828_v31 = vld [vmem:[%s4431_s10] ss:$0 sm:$0xff] }
 0x35a   :  { %v2232_v43 = vadd.f32 %v2901_v32, %v2231_v48 }
 0x35b   :  { %v2221_v22 = vadd.f32 %v2220_v52, %v2219_v18  ;;  %v2280_v60 = vadd.f32 %v2279_v0, %v2278_v5 }
 0x35c   :  { %v2234_v33 = vsel %vm2233_vm14, %v2901_v32, %v2232_v43 }
 0x35d   :  { %v2222_v61 = vrot.slane %v2221_v22, 4  ;;  %v2282_v27 = vadd.f32 %v2281_v16, %v2280_v60 }
 0x35f   :  { %v2223_v62 = vadd.f32 %v2222_v61, %v2221_v22  ;;  %v2283_v29 = vrot.slane %v2282_v27, 4 }
 0x361   :  { %v2224_v12 = vrot.slane %v2223_v62, 2  ;;  %v2284_v57 = vadd.f32 %v2283_v29, %v2282_v27 }
 0x363   :  { %v2225_v55 = vadd.f32 %v2224_v12, %v2223_v62  ;;  %v2285_v63 = vrot.slane %v2284_v57, 2 }
 0x365   :  { %v2226_v24 = vrot.slane %v2225_v55, 1  ;;  %v2286_v59 = vadd.f32 %v2285_v63, %v2284_v57 }
 0x367   :  { %v2227_v41 = vadd.f32 %v2226_v24, %v2225_v55  ;;  %v2287_v1 = vrot.slane %v2286_v59, 1 }
 0x369   :  { %v4281_v14 = vmul.f32 %v2234_v33, %v2227_v41  ;;  %v2288_v38 = vadd.f32 %v2287_v1, %v2286_v59 }
 0x36b   :  { %v2289_v47 = vmul.f32 %v2288_v38, %v2234_v33  ;;  %v2290_v49 = vmul.f32 %v4281_v14, %v4281_v14  ;;  %v2320_v6 = vsub.f32 %v4258_v51, %v4281_v14  ;;  %v2311_v32 = vsub.f32 %v4165_v17, %v4281_v14 }
 0x36c   :  { %v2312_v46 = vsub.f32 %v4167_v23, %v4281_v14  ;;  %v2313_v25 = vsub.f32 %v4189_v21, %v4281_v14  ;;  %v2314_v4 = vsub.f32 %v4199_v3, %v4281_v14  ;;  %v2315_v30 = vsub.f32 %v4201_v8, %v4281_v14 }
 0x36d   :  { %v2291_v36 = vsub.f32 %v2289_v47, %v2290_v49  ;;  %v2316_v51 = vsub.f32 %v4221_v28, %v4281_v14  ;;  %v2317_v56 = vsub.f32 %v4229_v40, %v4281_v14  ;;  %v2318_v15 = vsub.f32 %v4237_v2, %v4281_v14  ;;  %v2293_v40 = vld [vmem:[%s4432_s9] sm:$0x1] }
 0x36e   :  { %v2319_v58 = vsub.f32 %v4250_v9, %v4281_v14  ;;  %v2321_v7 = vsub.f32 %v4263_v53, %v4281_v14  ;;  %v2306_v53 = vsub.f32 %v4141_v54, %v4281_v14  ;;  %v2307_v5 = vsub.f32 %v4143_v50, %v4281_v14 }
 0x36f   :  { %v2292_v35 = vmax.f32 %v2291_v36, 0.0  ;;  %v2308_v24 = vsub.f32 %v4145_v34, %v4281_v14  ;;  %v2309_v38 = vsub.f32 %v4150_v42, %v4281_v14  ;;  %v2310_v49 = vsub.f32 %v4152_v37, %v4281_v14 }
 0x371   :  { %v2294_v3 = vadd.f32 1e-05, %v2292_v35 }
 0x373   :  { %2902 = vrsqrt.f32 %v2294_v3  ;;  %vm2301_vm0 = vweird.f32 %v2294_v3 }
 0x379   :  { %v2903_v39 = vpop.eup %2902 }
 0x37a   :  { %v2296_v8 = vmul.f32 %v2903_v39, %v2294_v3  ;;  %vm2302_vm15 = vweird.f32 %v2903_v39 }
 0x37b   :  { %vm2303_vm1 = vmor %vm2301_vm0, %vm2302_vm15 }
 0x37c   :  { %v2297_v19 = vmul.f32 %v2903_v39, %v2296_v8 }
 0x37e   :  { %v2298_v11 = vmul.f32 0.5, %v2297_v19 }
 0x380   :  { %v2299_v28 = vsub.f32 1.5, %v2298_v11 }
 0x382   :  { %v2300_v26 = vmul.f32 %v2903_v39, %v2299_v28 }
 0x384   :  { %v2304_v2 = vsel %vm2303_vm1, %v2903_v39, %v2300_v26  ;;  %v2829_v39 = vld [vmem:[%s4433_s12] ss:$0 sm:$0xff] }
 0x385   :  { %v2305_v9 = vmul.f32 %v2304_v2, %v2293_v40 }
 0x387   :  { %v2323_v44 = vperm.slane %v2305_v9, 0 }
 0x389   :  { %v2339_v10 = vmul.f32 %v2323_v44, %v2320_v6  ;;  %v2325_v18 = vmul.f32 %v2323_v44, %v2306_v53  ;;  %v2326_v45 = vmul.f32 %v2323_v44, %v2307_v5  ;;  %v2333_v60 = vmul.f32 %v2323_v44, %v2314_v4 }
 0x38a   :  { %v2334_v16 = vmul.f32 %v2323_v44, %v2315_v30  ;;  %v2335_v61 = vmul.f32 %v2323_v44, %v2316_v51  ;;  %v2336_v27 = vmul.f32 %v2323_v44, %v2317_v56  ;;  %v2337_v54 = vmul.f32 %v2323_v44, %v2318_v15 }
 0x38b   :  { %v2345_v52 = vadd.f32 %v2828_v31, %v2325_v18  ;;  %v2346_v22 = vadd.f32 %v2828_v31, %v2326_v45  ;;  %v2338_v48 = vmul.f32 %v2323_v44, %v2319_v58  ;;  %v2359_v62 = vadd.f32 %v2828_v31, %v2339_v10 }
 0x38c   :  { %v2353_v29 = vadd.f32 %v2828_v31, %v2333_v60  ;;  %v2354_v12 = vadd.f32 %v2828_v31, %v2334_v16  ;;  %v2355_v57 = vadd.f32 %v2828_v31, %v2335_v61  ;;  %v2340_v43 = vmul.f32 %v2323_v44, %v2321_v7 }
 0x38d   :  { %v2361_v0 = vmax.f32 %v2345_v52, 0.0  ;;  %v2356_v55 = vadd.f32 %v2828_v31, %v2336_v27  ;;  %v2357_v63 = vadd.f32 %v2828_v31, %v2337_v54  ;;  %v2358_v50 = vadd.f32 %v2828_v31, %v2338_v48 }
 0x38e   :  { %v2360_v59 = vadd.f32 %v2828_v31, %v2340_v43  ;;  %v2362_v33 = vmax.f32 %v2346_v22, 0.0  ;;  %v2327_v41 = vmul.f32 %v2323_v44, %v2308_v24  ;;  %v2328_v20 = vmul.f32 %v2323_v44, %v2309_v38 }
 0x38f   :  { %2767 = vmatmul.msk.f32.vlgmr.msra.gmra.mxu2 %vm1504_vm2, %v2361_v0  ;;  %v2329_v36 = vmul.f32 %v2323_v44, %v2310_v49  ;;  %v2330_v30 = vmul.f32 %v2323_v44, %v2311_v32  ;;  %v2331_v56 = vmul.f32 %v2323_v44, %v2312_v46  ;;  %v2332_v15 = vmul.f32 %v2323_v44, %v2313_v25 }
 0x390   :  { %v2347_v1 = vadd.f32 %v2828_v31, %v2327_v41  ;;  %v2348_v47 = vadd.f32 %v2828_v31, %v2328_v20  ;;  %v2369_v58 = vmax.f32 %v2353_v29, 0.0  ;;  %v2370_v7 = vmax.f32 %v2354_v12, 0.0 }
 0x391   :  { %v2349_v34 = vadd.f32 %v2828_v31, %v2329_v36  ;;  %v2350_v42 = vadd.f32 %v2828_v31, %v2330_v30  ;;  %v2351_v37 = vadd.f32 %v2828_v31, %v2331_v56  ;;  %v2352_v17 = vadd.f32 %v2828_v31, %v2332_v15 }
 0x392   :  { %v2363_v13 = vmax.f32 %v2347_v1, 0.0  ;;  %v2364_v6 = vmax.f32 %v2348_v47, 0.0  ;;  %v2371_v23 = vmax.f32 %v2355_v57, 0.0  ;;  %v2372_v46 = vmax.f32 %v2356_v55, 0.0 }
 0x393   :  { %v2365_v4 = vmax.f32 %v2349_v34, 0.0  ;;  %v2366_v51 = vmax.f32 %v2350_v42, 0.0  ;;  %v2367_v35 = vmax.f32 %v2351_v37, 0.0  ;;  %v2368_v32 = vmax.f32 %v2352_v17, 0.0 }
 0x394   :  { %v2373_v21 = vmax.f32 %v2357_v63, 0.0  ;;  %v2374_v14 = vmax.f32 %v2358_v50, 0.0  ;;  %v2375_v25 = vmax.f32 %v2359_v62, 0.0  ;;  %v2376_v3 = vmax.f32 %v2360_v59, 0.0 }
 0x397   :  { %2768 = vmatmul.msk.f32.gmra.mxu2 %vm1504_vm2, %v2362_v33 }
 0x39f   :  { %2769 = vmatmul.msk.f32.gmra.mxu2 %vm1504_vm2, %v2363_v13 }
 0x3a7   :  { %2770 = vmatmul.msk.f32.gmra.mxu2 %vm1504_vm2, %v2364_v6 }
 0x3af   :  { %2771 = vmatmul.msk.f32.gmra.mxu2 %vm1504_vm2, %v2365_v4 }
 0x3b7   :  { %2772 = vmatmul.msk.f32.gmra.mxu2 %vm1504_vm2, %v2366_v51 }
 0x3bf   :  { %2773 = vmatmul.msk.f32.gmra.mxu2 %vm1504_vm2, %v2367_v35 }
 0x3c7   :  { %2774 = vmatmul.msk.f32.gmra.mxu2 %vm1504_vm2, %v2368_v32 }
 0x3cf   :  { %2775 = vmatmul.msk.f32.gmra.mxu2 %vm1504_vm2, %v2369_v58 }
 0x3d7   :  { %2776 = vmatmul.msk.f32.gmra.mxu2 %vm1504_vm2, %v2370_v7 }
 0x3df   :  { %2777 = vmatmul.msk.f32.gmra.mxu2 %vm1504_vm2, %v2371_v23 }
 0x3e7   :  { %2778 = vmatmul.msk.f32.gmra.mxu2 %vm1504_vm2, %v2372_v46 }
 0x3ef   :  { %2779 = vmatmul.msk.f32.gmra.mxu2 %vm1504_vm2, %v2373_v21 }
 0x3f7   :  { %2780 = vmatmul.msk.f32.gmra.mxu2 %vm1504_vm2, %v2374_v14 }
 0x3ff   :  { %2781 = vmatmul.msk.f32.gmra.mxu2 %vm1504_vm2, %v2375_v25 }
 0x407   :  { %2782 = vmatmul.msk.f32.gmra.mxu2 %vm1504_vm2, %v2376_v3 }
 0x412   :  { %v2450_v8 = vpop.f32.mrf.mxu2 }
 0x413   :  { %v2451_v19 = vadd.f32 %v2829_v39, %v2450_v8 }
 0x415   :  { %2498 = vst.msk [vmem:[%s4434_s13] sm:$0xff] %vm1504_vm2, %v2451_v19 }
 0x41a   :  { %v2453_v11 = vpop.f32.mrf.mxu2 }
 0x41b   :  { %v2454_v28 = vadd.f32 %v2829_v39, %v2453_v11 }
 0x41d   :  { %2499 = vst.msk [vmem:[%s4434_s13 + $0x8] sm:$0xff] %vm1504_vm2, %v2454_v28 }
 0x422   :  { %v2456_v40 = vpop.f32.mrf.mxu2 }
 0x423   :  { %v2457_v26 = vadd.f32 %v2829_v39, %v2456_v40 }
 0x425   :  { %2500 = vst.msk [vmem:[%s4434_s13 + $0x10] sm:$0xff] %vm1504_vm2, %v2457_v26 }
 0x42a   :  { %v2459_v2 = vpop.f32.mrf.mxu2 }
 0x42b   :  { %v2460_v9 = vadd.f32 %v2829_v39, %v2459_v2 }
 0x42d   :  { %2501 = vst.msk [vmem:[%s4434_s13 + $0x18] sm:$0xff] %vm1504_vm2, %v2460_v9 }
 0x432   :  { %v2462_v44 = vpop.f32.mrf.mxu2 }
 0x433   :  { %v2463_v53 = vadd.f32 %v2829_v39, %v2462_v44 }
 0x435   :  { %2502 = vst.msk [vmem:[%s4434_s13 + $0x20] sm:$0xff] %vm1504_vm2, %v2463_v53 }
 0x43a   :  { %v2465_v31 = vpop.f32.mrf.mxu2 }
 0x43b   :  { %v2466_v10 = vadd.f32 %v2829_v39, %v2465_v31 }
 0x43d   :  { %2503 = vst.msk [vmem:[%s4434_s13 + $0x28] sm:$0xff] %vm1504_vm2, %v2466_v10 }
 0x442   :  { %v2468_v18 = vpop.f32.mrf.mxu2 }
 0x443   :  { %v2469_v5 = vadd.f32 %v2829_v39, %v2468_v18 }
 0x445   :  { %2504 = vst.msk [vmem:[%s4434_s13 + $0x30] sm:$0xff] %vm1504_vm2, %v2469_v5 }
 0x44a   :  { %v2471_v52 = vpop.f32.mrf.mxu2 }
 0x44b   :  { %v2472_v45 = vadd.f32 %v2829_v39, %v2471_v52 }
 0x44d   :  { %2505 = vst.msk [vmem:[%s4434_s13 + $0x38] sm:$0xff] %vm1504_vm2, %v2472_v45 }
 0x452   :  { %v2474_v0 = vpop.f32.mrf.mxu2 }
 0x453   :  { %v2475_v22 = vadd.f32 %v2829_v39, %v2474_v0 }
 0x455   :  { %2506 = vst.msk [vmem:[%s4434_s13 + $0x40] sm:$0xff] %vm1504_vm2, %v2475_v22 }
 0x45a   :  { %v2477_v60 = vpop.f32.mrf.mxu2 }
 0x45b   :  { %v2478_v16 = vadd.f32 %v2829_v39, %v2477_v60 }
 0x45d   :  { %2507 = vst.msk [vmem:[%s4434_s13 + $0x48] sm:$0xff] %vm1504_vm2, %v2478_v16 }
 0x462   :  { %v2480_v61 = vpop.f32.mrf.mxu2 }
 0x463   :  { %v2481_v27 = vadd.f32 %v2829_v39, %v2480_v61 }
 0x465   :  { %2508 = vst.msk [vmem:[%s4434_s13 + $0x50] sm:$0xff] %vm1504_vm2, %v2481_v27 }
 0x46a   :  { %v2483_v54 = vpop.f32.mrf.mxu2 }
 0x46b   :  { %v2484_v48 = vadd.f32 %v2829_v39, %v2483_v54 }
 0x46d   :  { %2509 = vst.msk [vmem:[%s4434_s13 + $0x58] sm:$0xff] %vm1504_vm2, %v2484_v48 }
 0x472   :  { %v2486_v62 = vpop.f32.mrf.mxu2 }
 0x473   :  { %v2487_v29 = vadd.f32 %v2829_v39, %v2486_v62 }
 0x475   :  { %2510 = vst.msk [vmem:[%s4434_s13 + $0x60] sm:$0xff] %vm1504_vm2, %v2487_v29 }
 0x47a   :  { %v2489_v12 = vpop.f32.mrf.mxu2 }
 0x47b   :  { %v2490_v57 = vadd.f32 %v2829_v39, %v2489_v12 }
 0x47d   :  { %2511 = vst.msk [vmem:[%s4434_s13 + $0x68] sm:$0xff] %vm1504_vm2, %v2490_v57 }
 0x482   :  { %v2492_v43 = vpop.f32.mrf.mxu2 }
 0x483   :  { %v2493_v55 = vadd.f32 %v2829_v39, %v2492_v43 }
 0x485   :  { %2512 = vst.msk [vmem:[%s4434_s13 + $0x70] sm:$0xff] %vm1504_vm2, %v2493_v55 }
 0x48a   :  { %v2495_v63 = vpop.f32.mrf.mxu2 }
 0x48b   :  { %v2496_v50 = vadd.f32 %v2829_v39, %v2495_v63 }
 0x48d   :  { %2513 = vst.msk [vmem:[%s4434_s13 + $0x78] sm:$0xff] %vm1504_vm2, %v2496_v50 }

</bundles_post_ra>
